<compile_context>
chip_gen: v7x
topology: tpu7x:2x2x1
jax: 0.10.0
libtpu: 0.0.40
codegen_flags: <defaults>
</compile_context>

<pallas_src>
import math

import jax
import jax.numpy as jnp
from jax.experimental import pallas as pl
from jax.experimental.pallas import tpu as pltpu

# ---- config (mirrors config['d_model'], config['n_head'], config['d_inner']) ----
D_MODEL = 32
N_HEAD = 4
D_HEAD = D_MODEL // N_HEAD
D_INNER = 64
LN_EPS = 1e-5           # nn.LayerNorm default


def _gelu_tanh(x):
    # TODO(synk): PyTorch F.gelu default is the exact erf form; tanh approximation
    # used here (and in the reference) since erf is not reliably lowerable in Mosaic.
    c = math.sqrt(2.0 / math.pi)
    return 0.5 * x * (1.0 + jnp.tanh(c * (x + 0.044715 * x * x * x)))


def _layernorm(v, gamma, beta):
    mu = jnp.mean(v, axis=-1, keepdims=True)
    var = jnp.mean(jnp.square(v - mu), axis=-1, keepdims=True)
    return (v - mu) * jax.lax.rsqrt(var + LN_EPS) * gamma + beta


def _attend(q, k, v, bt, sq, sk, mxu_dt):
    """Multi-head attention over one block of `bt` batch elements.

    q: (bt*sq, D_MODEL) f32; k, v: (bt*sk, D_MODEL) f32.  The 1/sqrt(D_HEAD) scale is
    already folded into the query projection on the host.  Heads occupy contiguous
    D_HEAD lane chunks; per-head contexts are concatenated in registers so the caller
    feeds them straight into the output projection (no VMEM scratch, no narrow masked
    stores).  Batched dot_general keeps attention inside each batch element, so no
    block-diagonal bias and no wasted cross-batch FLOPs.
    """
    ctx = []
    for h in range(N_HEAD):
        lo = h * D_HEAD
        qh = q[:, lo:lo + D_HEAD].reshape(bt, sq, D_HEAD).astype(mxu_dt)
        kh = k[:, lo:lo + D_HEAD].reshape(bt, sk, D_HEAD).astype(mxu_dt)
        vh = v[:, lo:lo + D_HEAD].reshape(bt, sk, D_HEAD).astype(mxu_dt)
        s = jnp.einsum("bqd,bkd->bqk", qh, kh,
                       preferred_element_type=jnp.float32)          # (bt, sq, sk)
        s = s - jnp.max(s, axis=-1, keepdims=True)
        p = jnp.exp(s)
        p = p / jnp.sum(p, axis=-1, keepdims=True)                   # exact softmax (f32)
        ctx.append(jnp.einsum("bqk,bkd->bqd", p.astype(mxu_dt), vh,
                              preferred_element_type=jnp.float32))
    return jnp.concatenate(ctx, axis=-1).reshape(bt * sq, D_MODEL)


def decoder_layer(tgt, memory, packed, *, block_batch=None, core_parallel=False):
    """packed = pack_params(params): fused QKV / KV weights, packed biases & LN.
    block_batch=None -> whole batch in one grid step (best on single-TC v5e/v6e).
    core_parallel=True -> shard the batch-block grid axis across TensorCores (v7x)."""
    B, S, D = tgt.shape
    _, Sm, _ = memory.shape
    assert D == D_MODEL
    if block_batch is None:
        block_batch = B
    assert B % block_batch == 0, "batch must be divisible by block_batch"
    Bt = block_batch
    grid_steps = B // Bt
    rows_q = Bt * S
    rows_kv = Bt * Sm
    cdt = packed[0].dtype                 # MXU compute dtype (f32 or bf16)
    single_buffer_weights = grid_steps > 1

    def kernel(tgt_ref, mem_ref,
               w_qkv_s_ref, b_qkv_s_ref, wo_s_ref,
               wq_c_ref, w_kv_c_ref, b_kv_c_ref, wo_c_ref,
               w1_ref, b1_ref, w2_ref,
               bias_ref, ln_ref,
               out_ref):
        # TODO(synk): tgt_mask / memory_mask / key-padding masks not implemented
        # (forward defaults them to None).  Dropout is inference-mode identity.
        mxu_dt = w_qkv_s_ref.dtype

        def mm(a, w_ref):      # activations cast to MXU dtype, f32 accumulation
            return jnp.dot(a.astype(mxu_dt), w_ref[...],
                           preferred_element_type=jnp.float32)

        x = tgt_ref[...].astype(jnp.float32)     # (Bt*S, D) residual stream, f32
        mem = mem_ref[...]                       # (Bt*Sm, D) compute dtype

        # ---- self-attention (fused QKV, scale folded into Wq) + residual + norm1
        qkv = mm(x, w_qkv_s_ref) + b_qkv_s_ref[...]
        ctx = _attend(qkv[:, 0:D_MODEL], qkv[:, D_MODEL:2 * D_MODEL],
                      qkv[:, 2 * D_MODEL:3 * D_MODEL], Bt, S, S, mxu_dt)
        sa = mm(ctx, wo_s_ref) + bias_ref[0:1, :]
        x = _layernorm(x + sa, ln_ref[0:1, :], ln_ref[1:2, :])

        # ---- cross-attention (fused KV) + residual + norm_cross ----
        qc = mm(x, wq_c_ref) + bias_ref[1:2, :]
        kv = jnp.dot(mem, w_kv_c_ref[...],
                     preferred_element_type=jnp.float32) + b_kv_c_ref[...]
        ctx = _attend(qc, kv[:, 0:D_MODEL], kv[:, D_MODEL:2 * D_MODEL],
                      Bt, S, Sm, mxu_dt)
        ca = mm(ctx, wo_c_ref) + bias_ref[2:3, :]
        x = _layernorm(x + ca, ln_ref[2:3, :], ln_ref[3:4, :])

        # ---- feed-forward + residual + norm2 ----
        h = _gelu_tanh(mm(x, w1_ref) + b1_ref[...])
        h = mm(h, w2_ref) + bias_ref[3:4, :]
        # TODO(synk): with D_MODEL=32 this store is lane-masked; at production d_model
        # (multiple of 128) the output store is lane-dense automatically.
        out_ref[...] = _layernorm(x + h, ln_ref[4:5, :], ln_ref[5:6, :])

    def const_spec(p):
        # Grid-invariant weights: never re-fetched; single-buffer them when the grid
        # has more than one step so v7x's smaller VMEM is not double-charged.
        if single_buffer_weights:
            return pl.BlockSpec(p.shape, lambda *_, _n=p.ndim: (0,) * _n,
                                pipeline_mode=pl.Buffered(1))
        return pl.BlockSpec(p.shape, lambda *_, _n=p.ndim: (0,) * _n)

    in_specs = [
        pl.BlockSpec((rows_q, D), lambda b: (b, 0)),
        pl.BlockSpec((rows_kv, D), lambda b: (b, 0)),
    ] + [const_spec(p) for p in packed]

    dims = (pltpu.CORE_PARALLEL,) if core_parallel else ("arbitrary",)

    out_flat = pl.pallas_call(
        kernel,
        out_shape=jax.ShapeDtypeStruct((B * S, D), jnp.float32),
        grid_spec=pltpu.PrefetchScalarGridSpec(
            num_scalar_prefetch=0,
            grid=(grid_steps,),
            in_specs=in_specs,
            out_specs=pl.BlockSpec((rows_q, D), lambda b: (b, 0)),
        ),
        compiler_params=pltpu.CompilerParams(
            dimension_semantics=dims,
            vmem_limit_bytes=32 * 1024 * 1024),
    )(tgt.astype(cdt).reshape(B * S, D),
      memory.astype(cdt).reshape(B * Sm, D), *packed)
    return out_flat.reshape(B, S, D)


def init_params(key):
    """Deterministic synthetic parameters in 'natural' (PyTorch-like) layout."""
    ks = list(jax.random.split(key, 32))

    def lin(kw, kb, fan_in, fan_out):
        w = jax.random.normal(kw, (fan_in, fan_out), jnp.float32) * 0.05
        b = jax.random.normal(kb, (1, fan_out), jnp.float32) * 0.05
        return w, b

    params = []
    # self-attention q/k/v/o
    ws, bs = [], []
    for i in range(4):
        w, b = lin(ks[2 * i], ks[2 * i + 1], D_MODEL, D_MODEL)
        ws.append(w); bs.append(b)
    params += ws + bs
    # cross-attention q/k/v/o
    ws, bs = [], []
    for i in range(4):
        w, b = lin(ks[8 + 2 * i], ks[9 + 2 * i], D_MODEL, D_MODEL)
        ws.append(w); bs.append(b)
    params += ws + bs
    # ff1 / ff2
    w1, b1 = lin(ks[16], ks[17], D_MODEL, D_INNER)
    w2, b2 = lin(ks[18], ks[19], D_INNER, D_MODEL)
    params += [w1, b1, w2, b2]
    # norm1, norm_cross, norm2 (gamma=1, beta=0, as nn.LayerNorm init)
    for _ in range(3):
        params += [jnp.ones((1, D_MODEL), jnp.float32),
                   jnp.zeros((1, D_MODEL), jnp.float32)]
    return params


def pack_params(params, dtype=jnp.float32):
    """Host-side packing: fuse QKV / KV, fold softmax scale into Wq, pack the small
    (1, D) biases and LN params into two f32 arrays.  `dtype` is the MXU operand
    dtype for the large weight matrices (bf16 for production, f32 for tight parity);
    biases / LN params always stay f32."""
    (wq_s, wk_s, wv_s, wo_s, bq_s, bk_s, bv_s, bo_s,
     wq_c, wk_c, wv_c, wo_c, bq_c, bk_c, bv_c, bo_c,
     w1, b1, w2, b2, g1, be1, gc, bec, g2, be2) = params
    scale = 1.0 / math.sqrt(D_HEAD)
    w_qkv_s = jnp.concatenate([wq_s * scale, wk_s, wv_s], axis=1).astype(dtype)  # (D, 3D)
    b_qkv_s = jnp.concatenate([bq_s * scale, bk_s, bv_s], axis=1)                # (1, 3D) f32
    w_kv_c = jnp.concatenate([wk_c, wv_c], axis=1).astype(dtype)                 # (D, 2D)
    b_kv_c = jnp.concatenate([bk_c, bv_c], axis=1)                               # (1, 2D) f32
    bias_pack = jnp.concatenate([bo_s, bq_c * scale, bo_c, b2], axis=0)          # (4, D) f32
    ln_pack = jnp.concatenate([g1, be1, gc, bec, g2, be2], axis=0)               # (6, D) f32
    return (w_qkv_s, b_qkv_s, wo_s.astype(dtype),
            (wq_c * scale).astype(dtype), w_kv_c, b_kv_c, wo_c.astype(dtype),
            w1.astype(dtype), b1, w2.astype(dtype), bias_pack, ln_pack)


def reference(tgt, memory, params):
    (wq_s, wk_s, wv_s, wo_s, bq_s, bk_s, bv_s, bo_s,
     wq_c, wk_c, wv_c, wo_c, bq_c, bk_c, bv_c, bo_c,
     w1, b1, w2, b2, g1, be1, gc, bec, g2, be2) = params

    def ln(v, g, b):
        mu = jnp.mean(v, -1, keepdims=True)
        var = jnp.mean(jnp.square(v - mu), -1, keepdims=True)
        return (v - mu) * jax.lax.rsqrt(var + LN_EPS) * g + b

    def mha(q_in, kv_in, wq, wk, wv, wo, bq, bk, bv, bo):
        B, Sq, D = q_in.shape
        Sk = kv_in.shape[1]
        q = (q_in @ wq + bq).reshape(B, Sq, N_HEAD, D_HEAD).transpose(0, 2, 1, 3)
        k = (kv_in @ wk + bk).reshape(B, Sk, N_HEAD, D_HEAD).transpose(0, 2, 1, 3)
        v = (kv_in @ wv + bv).reshape(B, Sk, N_HEAD, D_HEAD).transpose(0, 2, 1, 3)
        s = jnp.einsum("bhqd,bhkd->bhqk", q, k) / math.sqrt(D_HEAD)
        p = jax.nn.softmax(s, axis=-1)
        o = jnp.einsum("bhqk,bhkd->bhqd", p, v)
        o = o.transpose(0, 2, 1, 3).reshape(B, Sq, D)
        return o @ wo + bo

    x = tgt
    x = ln(x + mha(x, x, wq_s, wk_s, wv_s, wo_s, bq_s, bk_s, bv_s, bo_s), g1, be1)
    x = ln(x + mha(x, memory, wq_c, wk_c, wv_c, wo_c, bq_c, bk_c, bv_c, bo_c), gc, bec)
    h = _gelu_tanh(x @ w1 + b1)
    h = h @ w2 + b2
    return ln(x + h, g2, be2)


if __name__ == "__main__":
    key = jax.random.PRNGKey(0)
    k_tgt, k_mem, k_par = jax.random.split(key, 3)

    B, S_TGT, S_MEM = 4, 8, 12
    tgt = jax.random.normal(k_tgt, (B, S_TGT, D_MODEL), jnp.float32)
    memory = jax.random.normal(k_mem, (B, S_MEM, D_MODEL), jnp.float32)
    params = init_params(k_par)
    ref = reference(tgt, memory, params)

    # Grid choice: single grid step on single-TensorCore chips (v5e/v6e); on v7x split
    # the batch across the two TensorCores with CORE_PARALLEL (fallback to grid=1).
    dk = jax.devices()[0].device_kind.lower()
    prefer_core_parallel = (("v7" in dk) or ("7x" in dk)) and B % 2 == 0

    def run(packed):
        if prefer_core_parallel:
            try:
                return jax.block_until_ready(decoder_layer(
                    tgt, memory, packed, block_batch=B // 2, core_parallel=True))
            except Exception:
                pass  # fall back to the single-step path below
        return jax.block_until_ready(decoder_layer(
            tgt, memory, packed, block_batch=B, core_parallel=False))

    # 1) f32 MXU operands: tight parity check against the f32 JAX reference.
    out_f32 = run(pack_params(params, dtype=jnp.float32))
    assert out_f32.shape == (B, S_TGT, D_MODEL)
    assert bool(jnp.all(jnp.isfinite(out_f32)))
    err_f32 = float(jnp.max(jnp.abs(out_f32 - ref)))
    assert err_f32 < 1e-2, f"f32 mismatch vs JAX reference: {err_f32}"

    # 2) bf16 MXU operands (f32 accumulation, f32 LN/softmax): production MXU path,
    #    sanity-checked against the f32 reference with a bf16-appropriate tolerance.
    out_bf16 = run(pack_params(params, dtype=jnp.bfloat16))
    assert bool(jnp.all(jnp.isfinite(out_bf16)))
    err_bf16 = float(jnp.max(jnp.abs(out_bf16 - ref)))
    assert err_bf16 < 2.5e-1, f"bf16 mismatch vs JAX reference: {err_bf16}"

    print("KERNEL_OK")
</pallas_src>

<mosaic_0001>
module attributes {stable_mosaic.version = 11 : i64} {
  func.func @kernel(%arg0: i32, %arg1: memref<32x32xf32, #tpu.memory_space<vmem>>, %arg2: memref<48x32xf32, #tpu.memory_space<vmem>>, %arg3: memref<32x96xf32, #tpu.memory_space<vmem>>, %arg4: memref<1x96xf32, #tpu.memory_space<vmem>>, %arg5: memref<32x32xf32, #tpu.memory_space<vmem>>, %arg6: memref<32x32xf32, #tpu.memory_space<vmem>>, %arg7: memref<32x64xf32, #tpu.memory_space<vmem>>, %arg8: memref<1x64xf32, #tpu.memory_space<vmem>>, %arg9: memref<32x32xf32, #tpu.memory_space<vmem>>, %arg10: memref<32x64xf32, #tpu.memory_space<vmem>>, %arg11: memref<1x64xf32, #tpu.memory_space<vmem>>, %arg12: memref<64x32xf32, #tpu.memory_space<vmem>>, %arg13: memref<4x32xf32, #tpu.memory_space<vmem>>, %arg14: memref<6x32xf32, #tpu.memory_space<vmem>>, %arg15: memref<32x32xf32, #tpu.memory_space<vmem>>) attributes {dimension_semantics = [#tpu.dimension_semantics<arbitrary>], iteration_bounds = array<i64: 1>, scalar_prefetch = 0 : i64, scratch_operands = 0 : i64, tpu.core_type = #tpu.core_type<tc>, window_params = [{transform_indices = @transform_0, window_bounds = array<i64: 32, 32>}, {transform_indices = @transform_1, window_bounds = array<i64: 48, 32>}, {pipeline_mode = #tpu.pipeline_mode<synchronous>, transform_indices = @transform_2, window_bounds = array<i64: 32, 96>}, {pipeline_mode = #tpu.pipeline_mode<synchronous>, transform_indices = @transform_3, window_bounds = array<i64: 1, 96>}, {pipeline_mode = #tpu.pipeline_mode<synchronous>, transform_indices = @transform_4, window_bounds = array<i64: 32, 32>}, {pipeline_mode = #tpu.pipeline_mode<synchronous>, transform_indices = @transform_5, window_bounds = array<i64: 32, 32>}, {pipeline_mode = #tpu.pipeline_mode<synchronous>, transform_indices = @transform_6, window_bounds = array<i64: 32, 64>}, {pipeline_mode = #tpu.pipeline_mode<synchronous>, transform_indices = @transform_7, window_bounds = array<i64: 1, 64>}, {pipeline_mode = #tpu.pipeline_mode<synchronous>, transform_indices = @transform_8, window_bounds = array<i64: 32, 32>}, {pipeline_mode = #tpu.pipeline_mode<synchronous>, transform_indices = @transform_9, window_bounds = array<i64: 32, 64>}, {pipeline_mode = #tpu.pipeline_mode<synchronous>, transform_indices = @transform_10, window_bounds = array<i64: 1, 64>}, {pipeline_mode = #tpu.pipeline_mode<synchronous>, transform_indices = @transform_11, window_bounds = array<i64: 64, 32>}, {pipeline_mode = #tpu.pipeline_mode<synchronous>, transform_indices = @transform_12, window_bounds = array<i64: 4, 32>}, {pipeline_mode = #tpu.pipeline_mode<synchronous>, transform_indices = @transform_13, window_bounds = array<i64: 6, 32>}, {transform_indices = @transform_14, window_bounds = array<i64: 32, 32>}]} {
    %c0 = arith.constant 0 : index
    %c0_0 = arith.constant 0 : index
    %0 = vector.load %arg1[%c0, %c0_0] : memref<32x32xf32, #tpu.memory_space<vmem>>, vector<32x32xf32>
    %c0_1 = arith.constant 0 : index
    %c0_2 = arith.constant 0 : index
    %1 = vector.load %arg2[%c0_1, %c0_2] : memref<48x32xf32, #tpu.memory_space<vmem>>, vector<48x32xf32>
    %c0_3 = arith.constant 0 : index
    %c0_4 = arith.constant 0 : index
    %2 = vector.load %arg3[%c0_3, %c0_4] : memref<32x96xf32, #tpu.memory_space<vmem>>, vector<32x96xf32>
    %cst = arith.constant dense<0.000000e+00> : vector<32x96xf32>
    %3 = tpu.matmul %0, %2, %cst {dimension_numbers = #tpu.dot_dimension_numbers<[1], [0], [0], [1], [0, 0, 1, 1], [], []>} : vector<32x32xf32>, vector<32x96xf32>, vector<32x96xf32> -> vector<32x96xf32>
    %c0_5 = arith.constant 0 : index
    %c0_6 = arith.constant 0 : index
    %4 = vector.load %arg4[%c0_5, %c0_6] : memref<1x96xf32, #tpu.memory_space<vmem>>, vector<1x96xf32>
    %5 = vector.broadcast %4 : vector<1x96xf32> to vector<32x96xf32>
    %6 = arith.addf %3, %5 : vector<32x96xf32>
    %7 = vector.extract_strided_slice %6 {offsets = [0, 0], sizes = [32, 32], strides = [1, 1]} : vector<32x96xf32> to vector<32x32xf32>
    %8 = vector.extract_strided_slice %6 {offsets = [0, 32], sizes = [32, 32], strides = [1, 1]} : vector<32x96xf32> to vector<32x32xf32>
    %9 = vector.extract_strided_slice %6 {offsets = [0, 64], sizes = [32, 32], strides = [1, 1]} : vector<32x96xf32> to vector<32x32xf32>
    %10 = vector.extract_strided_slice %7 {offsets = [0, 0], sizes = [32, 8], strides = [1, 1]} : vector<32x32xf32> to vector<32x8xf32>
    %11 = vector.shape_cast %10 : vector<32x8xf32> to vector<4x8x8xf32>
    %12 = vector.extract_strided_slice %8 {offsets = [0, 0], sizes = [32, 8], strides = [1, 1]} : vector<32x32xf32> to vector<32x8xf32>
    %13 = vector.shape_cast %12 : vector<32x8xf32> to vector<4x8x8xf32>
    %14 = vector.extract_strided_slice %9 {offsets = [0, 0], sizes = [32, 8], strides = [1, 1]} : vector<32x32xf32> to vector<32x8xf32>
    %15 = vector.shape_cast %14 : vector<32x8xf32> to vector<4x8x8xf32>
    "tpu.trace_start"() <{level = 10 : i32, message = "bqd,bkd->bqk"}> : () -> ()
    %cst_7 = arith.constant dense<0.000000e+00> : vector<4x8x8xf32>
    %16 = tpu.matmul %11, %13, %cst_7 {dimension_numbers = #tpu.dot_dimension_numbers<[2], [2], [1], [1], [0, 0, 0, 1, 1, 1], [0], [0]>} : vector<4x8x8xf32>, vector<4x8x8xf32>, vector<4x8x8xf32> -> vector<4x8x8xf32>
    "tpu.trace_stop"() : () -> ()
    %cst_8 = arith.constant dense<0xFF800000> : vector<4x8xf32>
    %17 = vector.multi_reduction <maximumf>, %16, %cst_8 [2] : vector<4x8x8xf32> to vector<4x8xf32>
    %18 = vector.shape_cast %17 : vector<4x8xf32> to vector<4x8x1xf32>
    %19 = vector.broadcast %18 : vector<4x8x1xf32> to vector<4x8x8xf32>
    %20 = arith.subf %16, %19 : vector<4x8x8xf32>
    %21 = math.exp %20 : vector<4x8x8xf32>
    %cst_9 = arith.constant dense<0.000000e+00> : vector<4x8xf32>
    %22 = vector.multi_reduction <add>, %21, %cst_9 [2] : vector<4x8x8xf32> to vector<4x8xf32>
    %23 = vector.shape_cast %22 : vector<4x8xf32> to vector<4x8x1xf32>
    %24 = vector.broadcast %23 : vector<4x8x1xf32> to vector<4x8x8xf32>
    %25 = arith.divf %21, %24 : vector<4x8x8xf32>
    "tpu.trace_start"() <{level = 10 : i32, message = "bqk,bkd->bqd"}> : () -> ()
    %cst_10 = arith.constant dense<0.000000e+00> : vector<4x8x8xf32>
    %26 = tpu.matmul %25, %15, %cst_10 {dimension_numbers = #tpu.dot_dimension_numbers<[2], [1], [1], [2], [0, 0, 0, 1, 1, 2], [0], [0]>} : vector<4x8x8xf32>, vector<4x8x8xf32>, vector<4x8x8xf32> -> vector<4x8x8xf32>
    "tpu.trace_stop"() : () -> ()
    %27 = vector.extract_strided_slice %7 {offsets = [0, 8], sizes = [32, 8], strides = [1, 1]} : vector<32x32xf32> to vector<32x8xf32>
    %28 = vector.shape_cast %27 : vector<32x8xf32> to vector<4x8x8xf32>
    %29 = vector.extract_strided_slice %8 {offsets = [0, 8], sizes = [32, 8], strides = [1, 1]} : vector<32x32xf32> to vector<32x8xf32>
    %30 = vector.shape_cast %29 : vector<32x8xf32> to vector<4x8x8xf32>
    %31 = vector.extract_strided_slice %9 {offsets = [0, 8], sizes = [32, 8], strides = [1, 1]} : vector<32x32xf32> to vector<32x8xf32>
    %32 = vector.shape_cast %31 : vector<32x8xf32> to vector<4x8x8xf32>
    "tpu.trace_start"() <{level = 10 : i32, message = "bqd,bkd->bqk"}> : () -> ()
    %cst_11 = arith.constant dense<0.000000e+00> : vector<4x8x8xf32>
    %33 = tpu.matmul %28, %30, %cst_11 {dimension_numbers = #tpu.dot_dimension_numbers<[2], [2], [1], [1], [0, 0, 0, 1, 1, 1], [0], [0]>} : vector<4x8x8xf32>, vector<4x8x8xf32>, vector<4x8x8xf32> -> vector<4x8x8xf32>
    "tpu.trace_stop"() : () -> ()
    %cst_12 = arith.constant dense<0xFF800000> : vector<4x8xf32>
    %34 = vector.multi_reduction <maximumf>, %33, %cst_12 [2] : vector<4x8x8xf32> to vector<4x8xf32>
    %35 = vector.shape_cast %34 : vector<4x8xf32> to vector<4x8x1xf32>
    %36 = vector.broadcast %35 : vector<4x8x1xf32> to vector<4x8x8xf32>
    %37 = arith.subf %33, %36 : vector<4x8x8xf32>
    %38 = math.exp %37 : vector<4x8x8xf32>
    %cst_13 = arith.constant dense<0.000000e+00> : vector<4x8xf32>
    %39 = vector.multi_reduction <add>, %38, %cst_13 [2] : vector<4x8x8xf32> to vector<4x8xf32>
    %40 = vector.shape_cast %39 : vector<4x8xf32> to vector<4x8x1xf32>
    %41 = vector.broadcast %40 : vector<4x8x1xf32> to vector<4x8x8xf32>
    %42 = arith.divf %38, %41 : vector<4x8x8xf32>
    "tpu.trace_start"() <{level = 10 : i32, message = "bqk,bkd->bqd"}> : () -> ()
    %cst_14 = arith.constant dense<0.000000e+00> : vector<4x8x8xf32>
    %43 = tpu.matmul %42, %32, %cst_14 {dimension_numbers = #tpu.dot_dimension_numbers<[2], [1], [1], [2], [0, 0, 0, 1, 1, 2], [0], [0]>} : vector<4x8x8xf32>, vector<4x8x8xf32>, vector<4x8x8xf32> -> vector<4x8x8xf32>
    "tpu.trace_stop"() : () -> ()
    %44 = vector.extract_strided_slice %7 {offsets = [0, 16], sizes = [32, 8], strides = [1, 1]} : vector<32x32xf32> to vector<32x8xf32>
    %45 = vector.shape_cast %44 : vector<32x8xf32> to vector<4x8x8xf32>
    %46 = vector.extract_strided_slice %8 {offsets = [0, 16], sizes = [32, 8], strides = [1, 1]} : vector<32x32xf32> to vector<32x8xf32>
    %47 = vector.shape_cast %46 : vector<32x8xf32> to vector<4x8x8xf32>
    %48 = vector.extract_strided_slice %9 {offsets = [0, 16], sizes = [32, 8], strides = [1, 1]} : vector<32x32xf32> to vector<32x8xf32>
    %49 = vector.shape_cast %48 : vector<32x8xf32> to vector<4x8x8xf32>
    "tpu.trace_start"() <{level = 10 : i32, message = "bqd,bkd->bqk"}> : () -> ()
    %cst_15 = arith.constant dense<0.000000e+00> : vector<4x8x8xf32>
    %50 = tpu.matmul %45, %47, %cst_15 {dimension_numbers = #tpu.dot_dimension_numbers<[2], [2], [1], [1], [0, 0, 0, 1, 1, 1], [0], [0]>} : vector<4x8x8xf32>, vector<4x8x8xf32>, vector<4x8x8xf32> -> vector<4x8x8xf32>
    "tpu.trace_stop"() : () -> ()
    %cst_16 = arith.constant dense<0xFF800000> : vector<4x8xf32>
    %51 = vector.multi_reduction <maximumf>, %50, %cst_16 [2] : vector<4x8x8xf32> to vector<4x8xf32>
    %52 = vector.shape_cast %51 : vector<4x8xf32> to vector<4x8x1xf32>
    %53 = vector.broadcast %52 : vector<4x8x1xf32> to vector<4x8x8xf32>
    %54 = arith.subf %50, %53 : vector<4x8x8xf32>
    %55 = math.exp %54 : vector<4x8x8xf32>
    %cst_17 = arith.constant dense<0.000000e+00> : vector<4x8xf32>
    %56 = vector.multi_reduction <add>, %55, %cst_17 [2] : vector<4x8x8xf32> to vector<4x8xf32>
    %57 = vector.shape_cast %56 : vector<4x8xf32> to vector<4x8x1xf32>
    %58 = vector.broadcast %57 : vector<4x8x1xf32> to vector<4x8x8xf32>
    %59 = arith.divf %55, %58 : vector<4x8x8xf32>
    "tpu.trace_start"() <{level = 10 : i32, message = "bqk,bkd->bqd"}> : () -> ()
    %cst_18 = arith.constant dense<0.000000e+00> : vector<4x8x8xf32>
    %60 = tpu.matmul %59, %49, %cst_18 {dimension_numbers = #tpu.dot_dimension_numbers<[2], [1], [1], [2], [0, 0, 0, 1, 1, 2], [0], [0]>} : vector<4x8x8xf32>, vector<4x8x8xf32>, vector<4x8x8xf32> -> vector<4x8x8xf32>
    "tpu.trace_stop"() : () -> ()
    %61 = vector.extract_strided_slice %7 {offsets = [0, 24], sizes = [32, 8], strides = [1, 1]} : vector<32x32xf32> to vector<32x8xf32>
    %62 = vector.shape_cast %61 : vector<32x8xf32> to vector<4x8x8xf32>
    %63 = vector.extract_strided_slice %8 {offsets = [0, 24], sizes = [32, 8], strides = [1, 1]} : vector<32x32xf32> to vector<32x8xf32>
    %64 = vector.shape_cast %63 : vector<32x8xf32> to vector<4x8x8xf32>
    %65 = vector.extract_strided_slice %9 {offsets = [0, 24], sizes = [32, 8], strides = [1, 1]} : vector<32x32xf32> to vector<32x8xf32>
    %66 = vector.shape_cast %65 : vector<32x8xf32> to vector<4x8x8xf32>
    "tpu.trace_start"() <{level = 10 : i32, message = "bqd,bkd->bqk"}> : () -> ()
    %cst_19 = arith.constant dense<0.000000e+00> : vector<4x8x8xf32>
    %67 = tpu.matmul %62, %64, %cst_19 {dimension_numbers = #tpu.dot_dimension_numbers<[2], [2], [1], [1], [0, 0, 0, 1, 1, 1], [0], [0]>} : vector<4x8x8xf32>, vector<4x8x8xf32>, vector<4x8x8xf32> -> vector<4x8x8xf32>
    "tpu.trace_stop"() : () -> ()
    %cst_20 = arith.constant dense<0xFF800000> : vector<4x8xf32>
    %68 = vector.multi_reduction <maximumf>, %67, %cst_20 [2] : vector<4x8x8xf32> to vector<4x8xf32>
    %69 = vector.shape_cast %68 : vector<4x8xf32> to vector<4x8x1xf32>
    %70 = vector.broadcast %69 : vector<4x8x1xf32> to vector<4x8x8xf32>
    %71 = arith.subf %67, %70 : vector<4x8x8xf32>
    %72 = math.exp %71 : vector<4x8x8xf32>
    %cst_21 = arith.constant dense<0.000000e+00> : vector<4x8xf32>
    %73 = vector.multi_reduction <add>, %72, %cst_21 [2] : vector<4x8x8xf32> to vector<4x8xf32>
    %74 = vector.shape_cast %73 : vector<4x8xf32> to vector<4x8x1xf32>
    %75 = vector.broadcast %74 : vector<4x8x1xf32> to vector<4x8x8xf32>
    %76 = arith.divf %72, %75 : vector<4x8x8xf32>
    "tpu.trace_start"() <{level = 10 : i32, message = "bqk,bkd->bqd"}> : () -> ()
    %cst_22 = arith.constant dense<0.000000e+00> : vector<4x8x8xf32>
    %77 = tpu.matmul %76, %66, %cst_22 {dimension_numbers = #tpu.dot_dimension_numbers<[2], [1], [1], [2], [0, 0, 0, 1, 1, 2], [0], [0]>} : vector<4x8x8xf32>, vector<4x8x8xf32>, vector<4x8x8xf32> -> vector<4x8x8xf32>
    "tpu.trace_stop"() : () -> ()
    %78 = tpu.concatenate %26, %43, %60, %77 in 2 : vector<4x8x8xf32>, vector<4x8x8xf32>, vector<4x8x8xf32>, vector<4x8x8xf32> -> vector<4x8x32xf32>
    %79 = vector.shape_cast %78 : vector<4x8x32xf32> to vector<32x32xf32>
    %c0_23 = arith.constant 0 : index
    %c0_24 = arith.constant 0 : index
    %80 = vector.load %arg5[%c0_23, %c0_24] : memref<32x32xf32, #tpu.memory_space<vmem>>, vector<32x32xf32>
    %cst_25 = arith.constant dense<0.000000e+00> : vector<32x32xf32>
    %81 = tpu.matmul %79, %80, %cst_25 {dimension_numbers = #tpu.dot_dimension_numbers<[1], [0], [0], [1], [0, 0, 1, 1], [], []>} : vector<32x32xf32>, vector<32x32xf32>, vector<32x32xf32> -> vector<32x32xf32>
    %c0_26 = arith.constant 0 : index
    %c0_27 = arith.constant 0 : index
    %82 = vector.load %arg13[%c0_26, %c0_27] : memref<4x32xf32, #tpu.memory_space<vmem>>, vector<1x32xf32>
    %83 = vector.broadcast %82 : vector<1x32xf32> to vector<32x32xf32>
    %84 = arith.addf %81, %83 : vector<32x32xf32>
    %85 = arith.addf %0, %84 : vector<32x32xf32>
    %c0_28 = arith.constant 0 : index
    %c0_29 = arith.constant 0 : index
    %86 = vector.load %arg14[%c0_28, %c0_29] : memref<6x32xf32, #tpu.memory_space<vmem>>, vector<1x32xf32>
    %c1 = arith.constant 1 : index
    %c0_30 = arith.constant 0 : index
    %87 = vector.load %arg14[%c1, %c0_30] : memref<6x32xf32, #tpu.memory_space<vmem>>, vector<1x32xf32>
    %cst_31 = arith.constant dense<0.000000e+00> : vector<32xf32>
    %88 = vector.multi_reduction <add>, %85, %cst_31 [1] : vector<32x32xf32> to vector<32xf32>
    %89 = vector.shape_cast %88 : vector<32xf32> to vector<32x1xf32>
    %cst_32 = arith.constant 3.200000e+01 : f32
    %90 = vector.broadcast %cst_32 : f32 to vector<32x1xf32>
    %91 = arith.divf %89, %90 : vector<32x1xf32>
    %92 = vector.broadcast %91 : vector<32x1xf32> to vector<32x32xf32>
    %93 = arith.subf %85, %92 : vector<32x32xf32>
    %94 = arith.mulf %93, %93 : vector<32x32xf32>
    %cst_33 = arith.constant dense<0.000000e+00> : vector<32xf32>
    %95 = vector.multi_reduction <add>, %94, %cst_33 [1] : vector<32x32xf32> to vector<32xf32>
    %96 = vector.shape_cast %95 : vector<32xf32> to vector<32x1xf32>
    %cst_34 = arith.constant 3.200000e+01 : f32
    %97 = vector.broadcast %cst_34 : f32 to vector<32x1xf32>
    %98 = arith.divf %96, %97 : vector<32x1xf32>
    %99 = vector.broadcast %91 : vector<32x1xf32> to vector<32x32xf32>
    %100 = arith.subf %85, %99 : vector<32x32xf32>
    %cst_35 = arith.constant 9.99999974E-6 : f32
    %101 = vector.broadcast %cst_35 : f32 to vector<32x1xf32>
    %102 = arith.addf %98, %101 : vector<32x1xf32>
    %103 = math.rsqrt %102 : vector<32x1xf32>
    %104 = vector.broadcast %103 : vector<32x1xf32> to vector<32x32xf32>
    %105 = arith.mulf %100, %104 : vector<32x32xf32>
    %106 = vector.broadcast %86 : vector<1x32xf32> to vector<32x32xf32>
    %107 = arith.mulf %105, %106 : vector<32x32xf32>
    %108 = vector.broadcast %87 : vector<1x32xf32> to vector<32x32xf32>
    %109 = arith.addf %107, %108 : vector<32x32xf32>
    %c0_36 = arith.constant 0 : index
    %c0_37 = arith.constant 0 : index
    %110 = vector.load %arg6[%c0_36, %c0_37] : memref<32x32xf32, #tpu.memory_space<vmem>>, vector<32x32xf32>
    %cst_38 = arith.constant dense<0.000000e+00> : vector<32x32xf32>
    %111 = tpu.matmul %109, %110, %cst_38 {dimension_numbers = #tpu.dot_dimension_numbers<[1], [0], [0], [1], [0, 0, 1, 1], [], []>} : vector<32x32xf32>, vector<32x32xf32>, vector<32x32xf32> -> vector<32x32xf32>
    %c1_39 = arith.constant 1 : index
    %c0_40 = arith.constant 0 : index
    %112 = vector.load %arg13[%c1_39, %c0_40] : memref<4x32xf32, #tpu.memory_space<vmem>>, vector<1x32xf32>
    %113 = vector.broadcast %112 : vector<1x32xf32> to vector<32x32xf32>
    %114 = arith.addf %111, %113 : vector<32x32xf32>
    %c0_41 = arith.constant 0 : index
    %c0_42 = arith.constant 0 : index
    %115 = vector.load %arg7[%c0_41, %c0_42] : memref<32x64xf32, #tpu.memory_space<vmem>>, vector<32x64xf32>
    %cst_43 = arith.constant dense<0.000000e+00> : vector<48x64xf32>
    %116 = tpu.matmul %1, %115, %cst_43 {dimension_numbers = #tpu.dot_dimension_numbers<[1], [0], [0], [1], [0, 0, 1, 1], [], []>} : vector<48x32xf32>, vector<32x64xf32>, vector<48x64xf32> -> vector<48x64xf32>
    %c0_44 = arith.constant 0 : index
    %c0_45 = arith.constant 0 : index
    %117 = vector.load %arg8[%c0_44, %c0_45] : memref<1x64xf32, #tpu.memory_space<vmem>>, vector<1x64xf32>
    %118 = vector.broadcast %117 : vector<1x64xf32> to vector<48x64xf32>
    %119 = arith.addf %116, %118 : vector<48x64xf32>
    %120 = vector.extract_strided_slice %119 {offsets = [0, 0], sizes = [48, 32], strides = [1, 1]} : vector<48x64xf32> to vector<48x32xf32>
    %121 = vector.extract_strided_slice %119 {offsets = [0, 32], sizes = [48, 32], strides = [1, 1]} : vector<48x64xf32> to vector<48x32xf32>
    %122 = vector.extract_strided_slice %114 {offsets = [0, 0], sizes = [32, 8], strides = [1, 1]} : vector<32x32xf32> to vector<32x8xf32>
    %123 = vector.shape_cast %122 : vector<32x8xf32> to vector<4x8x8xf32>
    %124 = vector.extract_strided_slice %120 {offsets = [0, 0], sizes = [48, 8], strides = [1, 1]} : vector<48x32xf32> to vector<48x8xf32>
    %125 = vector.shape_cast %124 : vector<48x8xf32> to vector<4x12x8xf32>
    %126 = vector.extract_strided_slice %121 {offsets = [0, 0], sizes = [48, 8], strides = [1, 1]} : vector<48x32xf32> to vector<48x8xf32>
    %127 = vector.shape_cast %126 : vector<48x8xf32> to vector<4x12x8xf32>
    "tpu.trace_start"() <{level = 10 : i32, message = "bqd,bkd->bqk"}> : () -> ()
    %cst_46 = arith.constant dense<0.000000e+00> : vector<4x8x12xf32>
    %128 = tpu.matmul %123, %125, %cst_46 {dimension_numbers = #tpu.dot_dimension_numbers<[2], [2], [1], [1], [0, 0, 0, 1, 1, 1], [0], [0]>} : vector<4x8x8xf32>, vector<4x12x8xf32>, vector<4x8x12xf32> -> vector<4x8x12xf32>
    "tpu.trace_stop"() : () -> ()
    %cst_47 = arith.constant dense<0xFF800000> : vector<4x8xf32>
    %129 = vector.multi_reduction <maximumf>, %128, %cst_47 [2] : vector<4x8x12xf32> to vector<4x8xf32>
    %130 = vector.shape_cast %129 : vector<4x8xf32> to vector<4x8x1xf32>
    %131 = vector.broadcast %130 : vector<4x8x1xf32> to vector<4x8x12xf32>
    %132 = arith.subf %128, %131 : vector<4x8x12xf32>
    %133 = math.exp %132 : vector<4x8x12xf32>
    %cst_48 = arith.constant dense<0.000000e+00> : vector<4x8xf32>
    %134 = vector.multi_reduction <add>, %133, %cst_48 [2] : vector<4x8x12xf32> to vector<4x8xf32>
    %135 = vector.shape_cast %134 : vector<4x8xf32> to vector<4x8x1xf32>
    %136 = vector.broadcast %135 : vector<4x8x1xf32> to vector<4x8x12xf32>
    %137 = arith.divf %133, %136 : vector<4x8x12xf32>
    "tpu.trace_start"() <{level = 10 : i32, message = "bqk,bkd->bqd"}> : () -> ()
    %cst_49 = arith.constant dense<0.000000e+00> : vector<4x8x8xf32>
    %138 = tpu.matmul %137, %127, %cst_49 {dimension_numbers = #tpu.dot_dimension_numbers<[2], [1], [1], [2], [0, 0, 0, 1, 1, 2], [0], [0]>} : vector<4x8x12xf32>, vector<4x12x8xf32>, vector<4x8x8xf32> -> vector<4x8x8xf32>
    "tpu.trace_stop"() : () -> ()
    %139 = vector.extract_strided_slice %114 {offsets = [0, 8], sizes = [32, 8], strides = [1, 1]} : vector<32x32xf32> to vector<32x8xf32>
    %140 = vector.shape_cast %139 : vector<32x8xf32> to vector<4x8x8xf32>
    %141 = vector.extract_strided_slice %120 {offsets = [0, 8], sizes = [48, 8], strides = [1, 1]} : vector<48x32xf32> to vector<48x8xf32>
    %142 = vector.shape_cast %141 : vector<48x8xf32> to vector<4x12x8xf32>
    %143 = vector.extract_strided_slice %121 {offsets = [0, 8], sizes = [48, 8], strides = [1, 1]} : vector<48x32xf32> to vector<48x8xf32>
    %144 = vector.shape_cast %143 : vector<48x8xf32> to vector<4x12x8xf32>
    "tpu.trace_start"() <{level = 10 : i32, message = "bqd,bkd->bqk"}> : () -> ()
    %cst_50 = arith.constant dense<0.000000e+00> : vector<4x8x12xf32>
    %145 = tpu.matmul %140, %142, %cst_50 {dimension_numbers = #tpu.dot_dimension_numbers<[2], [2], [1], [1], [0, 0, 0, 1, 1, 1], [0], [0]>} : vector<4x8x8xf32>, vector<4x12x8xf32>, vector<4x8x12xf32> -> vector<4x8x12xf32>
    "tpu.trace_stop"() : () -> ()
    %cst_51 = arith.constant dense<0xFF800000> : vector<4x8xf32>
    %146 = vector.multi_reduction <maximumf>, %145, %cst_51 [2] : vector<4x8x12xf32> to vector<4x8xf32>
    %147 = vector.shape_cast %146 : vector<4x8xf32> to vector<4x8x1xf32>
    %148 = vector.broadcast %147 : vector<4x8x1xf32> to vector<4x8x12xf32>
    %149 = arith.subf %145, %148 : vector<4x8x12xf32>
    %150 = math.exp %149 : vector<4x8x12xf32>
    %cst_52 = arith.constant dense<0.000000e+00> : vector<4x8xf32>
    %151 = vector.multi_reduction <add>, %150, %cst_52 [2] : vector<4x8x12xf32> to vector<4x8xf32>
    %152 = vector.shape_cast %151 : vector<4x8xf32> to vector<4x8x1xf32>
    %153 = vector.broadcast %152 : vector<4x8x1xf32> to vector<4x8x12xf32>
    %154 = arith.divf %150, %153 : vector<4x8x12xf32>
    "tpu.trace_start"() <{level = 10 : i32, message = "bqk,bkd->bqd"}> : () -> ()
    %cst_53 = arith.constant dense<0.000000e+00> : vector<4x8x8xf32>
    %155 = tpu.matmul %154, %144, %cst_53 {dimension_numbers = #tpu.dot_dimension_numbers<[2], [1], [1], [2], [0, 0, 0, 1, 1, 2], [0], [0]>} : vector<4x8x12xf32>, vector<4x12x8xf32>, vector<4x8x8xf32> -> vector<4x8x8xf32>
    "tpu.trace_stop"() : () -> ()
    %156 = vector.extract_strided_slice %114 {offsets = [0, 16], sizes = [32, 8], strides = [1, 1]} : vector<32x32xf32> to vector<32x8xf32>
    %157 = vector.shape_cast %156 : vector<32x8xf32> to vector<4x8x8xf32>
    %158 = vector.extract_strided_slice %120 {offsets = [0, 16], sizes = [48, 8], strides = [1, 1]} : vector<48x32xf32> to vector<48x8xf32>
    %159 = vector.shape_cast %158 : vector<48x8xf32> to vector<4x12x8xf32>
    %160 = vector.extract_strided_slice %121 {offsets = [0, 16], sizes = [48, 8], strides = [1, 1]} : vector<48x32xf32> to vector<48x8xf32>
    %161 = vector.shape_cast %160 : vector<48x8xf32> to vector<4x12x8xf32>
    "tpu.trace_start"() <{level = 10 : i32, message = "bqd,bkd->bqk"}> : () -> ()
    %cst_54 = arith.constant dense<0.000000e+00> : vector<4x8x12xf32>
    %162 = tpu.matmul %157, %159, %cst_54 {dimension_numbers = #tpu.dot_dimension_numbers<[2], [2], [1], [1], [0, 0, 0, 1, 1, 1], [0], [0]>} : vector<4x8x8xf32>, vector<4x12x8xf32>, vector<4x8x12xf32> -> vector<4x8x12xf32>
    "tpu.trace_stop"() : () -> ()
    %cst_55 = arith.constant dense<0xFF800000> : vector<4x8xf32>
    %163 = vector.multi_reduction <maximumf>, %162, %cst_55 [2] : vector<4x8x12xf32> to vector<4x8xf32>
    %164 = vector.shape_cast %163 : vector<4x8xf32> to vector<4x8x1xf32>
    %165 = vector.broadcast %164 : vector<4x8x1xf32> to vector<4x8x12xf32>
    %166 = arith.subf %162, %165 : vector<4x8x12xf32>
    %167 = math.exp %166 : vector<4x8x12xf32>
    %cst_56 = arith.constant dense<0.000000e+00> : vector<4x8xf32>
    %168 = vector.multi_reduction <add>, %167, %cst_56 [2] : vector<4x8x12xf32> to vector<4x8xf32>
    %169 = vector.shape_cast %168 : vector<4x8xf32> to vector<4x8x1xf32>
    %170 = vector.broadcast %169 : vector<4x8x1xf32> to vector<4x8x12xf32>
    %171 = arith.divf %167, %170 : vector<4x8x12xf32>
    "tpu.trace_start"() <{level = 10 : i32, message = "bqk,bkd->bqd"}> : () -> ()
    %cst_57 = arith.constant dense<0.000000e+00> : vector<4x8x8xf32>
    %172 = tpu.matmul %171, %161, %cst_57 {dimension_numbers = #tpu.dot_dimension_numbers<[2], [1], [1], [2], [0, 0, 0, 1, 1, 2], [0], [0]>} : vector<4x8x12xf32>, vector<4x12x8xf32>, vector<4x8x8xf32> -> vector<4x8x8xf32>
    "tpu.trace_stop"() : () -> ()
    %173 = vector.extract_strided_slice %114 {offsets = [0, 24], sizes = [32, 8], strides = [1, 1]} : vector<32x32xf32> to vector<32x8xf32>
    %174 = vector.shape_cast %173 : vector<32x8xf32> to vector<4x8x8xf32>
    %175 = vector.extract_strided_slice %120 {offsets = [0, 24], sizes = [48, 8], strides = [1, 1]} : vector<48x32xf32> to vector<48x8xf32>
    %176 = vector.shape_cast %175 : vector<48x8xf32> to vector<4x12x8xf32>
    %177 = vector.extract_strided_slice %121 {offsets = [0, 24], sizes = [48, 8], strides = [1, 1]} : vector<48x32xf32> to vector<48x8xf32>
    %178 = vector.shape_cast %177 : vector<48x8xf32> to vector<4x12x8xf32>
    "tpu.trace_start"() <{level = 10 : i32, message = "bqd,bkd->bqk"}> : () -> ()
    %cst_58 = arith.constant dense<0.000000e+00> : vector<4x8x12xf32>
    %179 = tpu.matmul %174, %176, %cst_58 {dimension_numbers = #tpu.dot_dimension_numbers<[2], [2], [1], [1], [0, 0, 0, 1, 1, 1], [0], [0]>} : vector<4x8x8xf32>, vector<4x12x8xf32>, vector<4x8x12xf32> -> vector<4x8x12xf32>
    "tpu.trace_stop"() : () -> ()
    %cst_59 = arith.constant dense<0xFF800000> : vector<4x8xf32>
    %180 = vector.multi_reduction <maximumf>, %179, %cst_59 [2] : vector<4x8x12xf32> to vector<4x8xf32>
    %181 = vector.shape_cast %180 : vector<4x8xf32> to vector<4x8x1xf32>
    %182 = vector.broadcast %181 : vector<4x8x1xf32> to vector<4x8x12xf32>
    %183 = arith.subf %179, %182 : vector<4x8x12xf32>
    %184 = math.exp %183 : vector<4x8x12xf32>
    %cst_60 = arith.constant dense<0.000000e+00> : vector<4x8xf32>
    %185 = vector.multi_reduction <add>, %184, %cst_60 [2] : vector<4x8x12xf32> to vector<4x8xf32>
    %186 = vector.shape_cast %185 : vector<4x8xf32> to vector<4x8x1xf32>
    %187 = vector.broadcast %186 : vector<4x8x1xf32> to vector<4x8x12xf32>
    %188 = arith.divf %184, %187 : vector<4x8x12xf32>
    "tpu.trace_start"() <{level = 10 : i32, message = "bqk,bkd->bqd"}> : () -> ()
    %cst_61 = arith.constant dense<0.000000e+00> : vector<4x8x8xf32>
    %189 = tpu.matmul %188, %178, %cst_61 {dimension_numbers = #tpu.dot_dimension_numbers<[2], [1], [1], [2], [0, 0, 0, 1, 1, 2], [0], [0]>} : vector<4x8x12xf32>, vector<4x12x8xf32>, vector<4x8x8xf32> -> vector<4x8x8xf32>
    "tpu.trace_stop"() : () -> ()
    %190 = tpu.concatenate %138, %155, %172, %189 in 2 : vector<4x8x8xf32>, vector<4x8x8xf32>, vector<4x8x8xf32>, vector<4x8x8xf32> -> vector<4x8x32xf32>
    %191 = vector.shape_cast %190 : vector<4x8x32xf32> to vector<32x32xf32>
    %c0_62 = arith.constant 0 : index
    %c0_63 = arith.constant 0 : index
    %192 = vector.load %arg9[%c0_62, %c0_63] : memref<32x32xf32, #tpu.memory_space<vmem>>, vector<32x32xf32>
    %cst_64 = arith.constant dense<0.000000e+00> : vector<32x32xf32>
    %193 = tpu.matmul %191, %192, %cst_64 {dimension_numbers = #tpu.dot_dimension_numbers<[1], [0], [0], [1], [0, 0, 1, 1], [], []>} : vector<32x32xf32>, vector<32x32xf32>, vector<32x32xf32> -> vector<32x32xf32>
    %c2 = arith.constant 2 : index
    %c0_65 = arith.constant 0 : index
    %194 = vector.load %arg13[%c2, %c0_65] : memref<4x32xf32, #tpu.memory_space<vmem>>, vector<1x32xf32>
    %195 = vector.broadcast %194 : vector<1x32xf32> to vector<32x32xf32>
    %196 = arith.addf %193, %195 : vector<32x32xf32>
    %197 = arith.addf %109, %196 : vector<32x32xf32>
    %c2_66 = arith.constant 2 : index
    %c0_67 = arith.constant 0 : index
    %198 = vector.load %arg14[%c2_66, %c0_67] : memref<6x32xf32, #tpu.memory_space<vmem>>, vector<1x32xf32>
    %c3 = arith.constant 3 : index
    %c0_68 = arith.constant 0 : index
    %199 = vector.load %arg14[%c3, %c0_68] : memref<6x32xf32, #tpu.memory_space<vmem>>, vector<1x32xf32>
    %cst_69 = arith.constant dense<0.000000e+00> : vector<32xf32>
    %200 = vector.multi_reduction <add>, %197, %cst_69 [1] : vector<32x32xf32> to vector<32xf32>
    %201 = vector.shape_cast %200 : vector<32xf32> to vector<32x1xf32>
    %cst_70 = arith.constant 3.200000e+01 : f32
    %202 = vector.broadcast %cst_70 : f32 to vector<32x1xf32>
    %203 = arith.divf %201, %202 : vector<32x1xf32>
    %204 = vector.broadcast %203 : vector<32x1xf32> to vector<32x32xf32>
    %205 = arith.subf %197, %204 : vector<32x32xf32>
    %206 = arith.mulf %205, %205 : vector<32x32xf32>
    %cst_71 = arith.constant dense<0.000000e+00> : vector<32xf32>
    %207 = vector.multi_reduction <add>, %206, %cst_71 [1] : vector<32x32xf32> to vector<32xf32>
    %208 = vector.shape_cast %207 : vector<32xf32> to vector<32x1xf32>
    %cst_72 = arith.constant 3.200000e+01 : f32
    %209 = vector.broadcast %cst_72 : f32 to vector<32x1xf32>
    %210 = arith.divf %208, %209 : vector<32x1xf32>
    %211 = vector.broadcast %203 : vector<32x1xf32> to vector<32x32xf32>
    %212 = arith.subf %197, %211 : vector<32x32xf32>
    %cst_73 = arith.constant 9.99999974E-6 : f32
    %213 = vector.broadcast %cst_73 : f32 to vector<32x1xf32>
    %214 = arith.addf %210, %213 : vector<32x1xf32>
    %215 = math.rsqrt %214 : vector<32x1xf32>
    %216 = vector.broadcast %215 : vector<32x1xf32> to vector<32x32xf32>
    %217 = arith.mulf %212, %216 : vector<32x32xf32>
    %218 = vector.broadcast %198 : vector<1x32xf32> to vector<32x32xf32>
    %219 = arith.mulf %217, %218 : vector<32x32xf32>
    %220 = vector.broadcast %199 : vector<1x32xf32> to vector<32x32xf32>
    %221 = arith.addf %219, %220 : vector<32x32xf32>
    %c0_74 = arith.constant 0 : index
    %c0_75 = arith.constant 0 : index
    %222 = vector.load %arg10[%c0_74, %c0_75] : memref<32x64xf32, #tpu.memory_space<vmem>>, vector<32x64xf32>
    %cst_76 = arith.constant dense<0.000000e+00> : vector<32x64xf32>
    %223 = tpu.matmul %221, %222, %cst_76 {dimension_numbers = #tpu.dot_dimension_numbers<[1], [0], [0], [1], [0, 0, 1, 1], [], []>} : vector<32x32xf32>, vector<32x64xf32>, vector<32x64xf32> -> vector<32x64xf32>
    %c0_77 = arith.constant 0 : index
    %c0_78 = arith.constant 0 : index
    %224 = vector.load %arg11[%c0_77, %c0_78] : memref<1x64xf32, #tpu.memory_space<vmem>>, vector<1x64xf32>
    %225 = vector.broadcast %224 : vector<1x64xf32> to vector<32x64xf32>
    %226 = arith.addf %223, %225 : vector<32x64xf32>
    %cst_79 = arith.constant 5.000000e-01 : f32
    %227 = vector.broadcast %cst_79 : f32 to vector<32x64xf32>
    %228 = arith.mulf %227, %226 : vector<32x64xf32>
    %cst_80 = arith.constant 4.471500e-02 : f32
    %229 = vector.broadcast %cst_80 : f32 to vector<32x64xf32>
    %230 = arith.mulf %229, %226 : vector<32x64xf32>
    %231 = arith.mulf %230, %226 : vector<32x64xf32>
    %232 = arith.mulf %231, %226 : vector<32x64xf32>
    %233 = arith.addf %226, %232 : vector<32x64xf32>
    %cst_81 = arith.constant 0.797884583 : f32
    %234 = vector.broadcast %cst_81 : f32 to vector<32x64xf32>
    %235 = arith.mulf %234, %233 : vector<32x64xf32>
    %236 = math.tanh %235 : vector<32x64xf32>
    %cst_82 = arith.constant 1.000000e+00 : f32
    %237 = vector.broadcast %cst_82 : f32 to vector<32x64xf32>
    %238 = arith.addf %237, %236 : vector<32x64xf32>
    %239 = arith.mulf %228, %238 : vector<32x64xf32>
    %c0_83 = arith.constant 0 : index
    %c0_84 = arith.constant 0 : index
    %240 = vector.load %arg12[%c0_83, %c0_84] : memref<64x32xf32, #tpu.memory_space<vmem>>, vector<64x32xf32>
    %cst_85 = arith.constant dense<0.000000e+00> : vector<32x32xf32>
    %241 = tpu.matmul %239, %240, %cst_85 {dimension_numbers = #tpu.dot_dimension_numbers<[1], [0], [0], [1], [0, 0, 1, 1], [], []>} : vector<32x64xf32>, vector<64x32xf32>, vector<32x32xf32> -> vector<32x32xf32>
    %c3_86 = arith.constant 3 : index
    %c0_87 = arith.constant 0 : index
    %242 = vector.load %arg13[%c3_86, %c0_87] : memref<4x32xf32, #tpu.memory_space<vmem>>, vector<1x32xf32>
    %243 = vector.broadcast %242 : vector<1x32xf32> to vector<32x32xf32>
    %244 = arith.addf %241, %243 : vector<32x32xf32>
    %245 = arith.addf %221, %244 : vector<32x32xf32>
    %c4 = arith.constant 4 : index
    %c0_88 = arith.constant 0 : index
    %246 = vector.load %arg14[%c4, %c0_88] : memref<6x32xf32, #tpu.memory_space<vmem>>, vector<1x32xf32>
    %c5 = arith.constant 5 : index
    %c0_89 = arith.constant 0 : index
    %247 = vector.load %arg14[%c5, %c0_89] : memref<6x32xf32, #tpu.memory_space<vmem>>, vector<1x32xf32>
    %cst_90 = arith.constant dense<0.000000e+00> : vector<32xf32>
    %248 = vector.multi_reduction <add>, %245, %cst_90 [1] : vector<32x32xf32> to vector<32xf32>
    %249 = vector.shape_cast %248 : vector<32xf32> to vector<32x1xf32>
    %cst_91 = arith.constant 3.200000e+01 : f32
    %250 = vector.broadcast %cst_91 : f32 to vector<32x1xf32>
    %251 = arith.divf %249, %250 : vector<32x1xf32>
    %252 = vector.broadcast %251 : vector<32x1xf32> to vector<32x32xf32>
    %253 = arith.subf %245, %252 : vector<32x32xf32>
    %254 = arith.mulf %253, %253 : vector<32x32xf32>
    %cst_92 = arith.constant dense<0.000000e+00> : vector<32xf32>
    %255 = vector.multi_reduction <add>, %254, %cst_92 [1] : vector<32x32xf32> to vector<32xf32>
    %256 = vector.shape_cast %255 : vector<32xf32> to vector<32x1xf32>
    %cst_93 = arith.constant 3.200000e+01 : f32
    %257 = vector.broadcast %cst_93 : f32 to vector<32x1xf32>
    %258 = arith.divf %256, %257 : vector<32x1xf32>
    %259 = vector.broadcast %251 : vector<32x1xf32> to vector<32x32xf32>
    %260 = arith.subf %245, %259 : vector<32x32xf32>
    %cst_94 = arith.constant 9.99999974E-6 : f32
    %261 = vector.broadcast %cst_94 : f32 to vector<32x1xf32>
    %262 = arith.addf %258, %261 : vector<32x1xf32>
    %263 = math.rsqrt %262 : vector<32x1xf32>
    %264 = vector.broadcast %263 : vector<32x1xf32> to vector<32x32xf32>
    %265 = arith.mulf %260, %264 : vector<32x32xf32>
    %266 = vector.broadcast %246 : vector<1x32xf32> to vector<32x32xf32>
    %267 = arith.mulf %265, %266 : vector<32x32xf32>
    %268 = vector.broadcast %247 : vector<1x32xf32> to vector<32x32xf32>
    %269 = arith.addf %267, %268 : vector<32x32xf32>
    %c0_95 = arith.constant 0 : index
    %c0_96 = arith.constant 0 : index
    %270 = vector.load %arg15[%c0_95, %c0_96] : memref<32x32xf32, #tpu.memory_space<vmem>>, vector<32x32xf32>
    tpu.vector_store %arg15[%c0_95, %c0_96], %269 {strides = array<i32>} : memref<32x32xf32, #tpu.memory_space<vmem>>, vector<32x32xf32>,
    return
  }
  func.func @transform_0(%arg0: i32) -> (i32, i32) {
    %c0_i32 = arith.constant 0 : i32
    %c0_i32_0 = arith.constant 0 : i32
    return %arg0, %c0_i32 : i32, i32
  }
  func.func @transform_1(%arg0: i32) -> (i32, i32) {
    %c0_i32 = arith.constant 0 : i32
    %c0_i32_0 = arith.constant 0 : i32
    return %arg0, %c0_i32 : i32, i32
  }
  func.func @transform_2(%arg0: i32) -> (i32, i32) {
    %c0_i32 = arith.constant 0 : i32
    %c0_i32_0 = arith.constant 0 : i32
    %c0_i32_1 = arith.constant 0 : i32
    return %c0_i32, %c0_i32_0 : i32, i32
  }
  func.func @transform_3(%arg0: i32) -> (i32, i32) {
    %c0_i32 = arith.constant 0 : i32
    %c0_i32_0 = arith.constant 0 : i32
    %c0_i32_1 = arith.constant 0 : i32
    return %c0_i32, %c0_i32_0 : i32, i32
  }
  func.func @transform_4(%arg0: i32) -> (i32, i32) {
    %c0_i32 = arith.constant 0 : i32
    %c0_i32_0 = arith.constant 0 : i32
    %c0_i32_1 = arith.constant 0 : i32
    return %c0_i32, %c0_i32_0 : i32, i32
  }
  func.func @transform_5(%arg0: i32) -> (i32, i32) {
    %c0_i32 = arith.constant 0 : i32
    %c0_i32_0 = arith.constant 0 : i32
    %c0_i32_1 = arith.constant 0 : i32
    return %c0_i32, %c0_i32_0 : i32, i32
  }
  func.func @transform_6(%arg0: i32) -> (i32, i32) {
    %c0_i32 = arith.constant 0 : i32
    %c0_i32_0 = arith.constant 0 : i32
    %c0_i32_1 = arith.constant 0 : i32
    return %c0_i32, %c0_i32_0 : i32, i32
  }
  func.func @transform_7(%arg0: i32) -> (i32, i32) {
    %c0_i32 = arith.constant 0 : i32
    %c0_i32_0 = arith.constant 0 : i32
    %c0_i32_1 = arith.constant 0 : i32
    return %c0_i32, %c0_i32_0 : i32, i32
  }
  func.func @transform_8(%arg0: i32) -> (i32, i32) {
    %c0_i32 = arith.constant 0 : i32
    %c0_i32_0 = arith.constant 0 : i32
    %c0_i32_1 = arith.constant 0 : i32
    return %c0_i32, %c0_i32_0 : i32, i32
  }
  func.func @transform_9(%arg0: i32) -> (i32, i32) {
    %c0_i32 = arith.constant 0 : i32
    %c0_i32_0 = arith.constant 0 : i32
    %c0_i32_1 = arith.constant 0 : i32
    return %c0_i32, %c0_i32_0 : i32, i32
  }
  func.func @transform_10(%arg0: i32) -> (i32, i32) {
    %c0_i32 = arith.constant 0 : i32
    %c0_i32_0 = arith.constant 0 : i32
    %c0_i32_1 = arith.constant 0 : i32
    return %c0_i32, %c0_i32_0 : i32, i32
  }
  func.func @transform_11(%arg0: i32) -> (i32, i32) {
    %c0_i32 = arith.constant 0 : i32
    %c0_i32_0 = arith.constant 0 : i32
    %c0_i32_1 = arith.constant 0 : i32
    return %c0_i32, %c0_i32_0 : i32, i32
  }
  func.func @transform_12(%arg0: i32) -> (i32, i32) {
    %c0_i32 = arith.constant 0 : i32
    %c0_i32_0 = arith.constant 0 : i32
    %c0_i32_1 = arith.constant 0 : i32
    return %c0_i32, %c0_i32_0 : i32, i32
  }
  func.func @transform_13(%arg0: i32) -> (i32, i32) {
    %c0_i32 = arith.constant 0 : i32
    %c0_i32_0 = arith.constant 0 : i32
    %c0_i32_1 = arith.constant 0 : i32
    return %c0_i32, %c0_i32_0 : i32, i32
  }
  func.func @transform_14(%arg0: i32) -> (i32, i32) {
    %c0_i32 = arith.constant 0 : i32
    %c0_i32_0 = arith.constant 0 : i32
    return %arg0, %c0_i32 : i32, i32
  }
}

</mosaic_0001>

<bundles_post_ra>
// kernel: tpu_custom_call.1
= control target key start
LH: loop header
LB: loop body
LE: loop exit
PB: predicated region body
PF: predicated region fallthrough
CT: control target
= control target key end

     0   :  { %19 = vsyncpa [#allocation3], 0  ;;  %s9225_s0 = inlined_call_operand.vmem [shape: f32[32,32], index: 0, kind: input, shape index: {}]   ;;  %s9226_s1 = inlined_call_operand.vmem [shape: f32[48,32], index: 1, kind: input, shape index: {}]   ;;  %s9227_s2 = inlined_call_operand.vmem [shape: f32[32,96], index: 2, kind: input, shape index: {}]   ;;  %s9228_s3 = inlined_call_operand.vmem [shape: f32[1,96], index: 3, kind: input, shape index: {}]   ;;  %s9229_s4 = inlined_call_operand.vmem [shape: f32[32,32], index: 4, kind: input, shape index: {}]   ;;  %s9230_s5 = inlined_call_operand.vmem [shape: f32[32,32], index: 5, kind: input, shape index: {}]   ;;  %s9231_s6 = inlined_call_operand.vmem [shape: f32[32,64], index: 6, kind: input, shape index: {}]   ;;  %s9232_s7 = inlined_call_operand.vmem [shape: f32[1,64], index: 7, kind: input, shape index: {}]   ;;  %s9233_s8 = inlined_call_operand.hbm [shape: f32[32,32], index: 8, kind: input, shape index: {}]   ;;  %s9234_s9 = inlined_call_operand.hbm [shape: f32[32,64], index: 9, kind: input, shape index: {}]   ;;  %s9235_s10 = inlined_call_operand.vmem [shape: f32[1,64], index: 10, kind: input, shape index: {}]   ;;  %s9236_s11 = inlined_call_operand.vmem [shape: f32[64,32], index: 11, kind: input, shape index: {}]   ;;  %s9237_s12 = inlined_call_operand.vmem [shape: f32[4,32], index: 12, kind: input, shape index: {}]   ;;  %s9238_s13 = inlined_call_operand.vmem [shape: f32[6,32], index: 13, kind: input, shape index: {}]   ;;  %s9239_s14 = inlined_call_operand.hbm [shape: f32[32,32], index: 14, kind: output, shape index: {}]  }
   0x1   :  { %20 = vsyncpa [#allocation6], 0 }
   0x2   :  { %21 = vsyncpa [#allocation4], 0  ;;  %s8138_s29 = smov [#allocation2]   ;;  %s8066_s17 = scalar_lea.hbm %s9233_s8, 512 }
   0x3   :  { %s43_s30 = sshll.u32 %s8138_s29, 4  ;;  %p8067_p0 = scmp.ne.s32.totalorder %s9233_s8, %s8066_s17  ;;  %s44_s30 = int_to_ptr.vmem [resolvable:$true] %s43_s30 }
   0x4   :  { %p8070_p1 = scmp.lt.u32.totalorder %s8066_s17, %s9233_s8 }
   0x6   :  { %p8072_p2 = pnand %p8070_p1, %p8067_p0 }
   0x8   :  { %8075 = shalt.err (!%p8072_p2)
}
   0x9   :  { %s8076_s22 = scalar_lea.vmem %s44_s30, 512  ;;  %p8081_p4 = scmp.lt.s32.totalorder %s44_s30, %s44_s30 }
   0xa   :  { %p8077_p3 = scmp.ne.s32.totalorder %s44_s30, %s8076_s22  ;;  %p8082_p5 = scmp.lt.s32.totalorder %s8076_s22, %s8076_s22 }
   0xc   :  { %p8083_p6 = por %p8082_p5, %p8081_p4 }
   0xe   :  { %p8084_p7 = pnand %p8083_p6, %p8077_p3 }
  0x10   :  { %8087 = shalt.err (!%p8084_p7)
}
  0x11   :  { %s8139_s23 = smov 128   ;;  %s8140_s24 = smov 8  }
  0x12   :  { %49 = dma.hbm_to_vmem [thread:$0]  %s9233_s8, 512, %s44_s30, [#allocation3], %s8139_s23, %s8139_s23, %s8140_s24  }
  0x13   :  { %s8141_s27 = smov [#allocation5]   ;;  %s8088_s16 = scalar_lea.hbm %s9234_s9, 512 }
  0x14   :  { %s55_s28 = sshll.u32 %s8141_s27, 4  ;;  %p8089_p8 = scmp.ne.s32.totalorder %s9234_s9, %s8088_s16  ;;  %s56_s28 = int_to_ptr.vmem [resolvable:$true] %s55_s28 }
  0x15   :  { %p8092_p9 = scmp.lt.u32.totalorder %s8088_s16, %s9234_s9 }
  0x17   :  { %p8094_p10 = pnand %p8092_p9, %p8089_p8 }
  0x19   :  { %8097 = shalt.err (!%p8094_p10)
}
  0x1a   :  { %s8098_s21 = scalar_lea.vmem %s56_s28, 512  ;;  %p8103_p12 = scmp.lt.s32.totalorder %s56_s28, %s56_s28 }
  0x1b   :  { %p8099_p11 = scmp.ne.s32.totalorder %s56_s28, %s8098_s21  ;;  %p8104_p13 = scmp.lt.s32.totalorder %s8098_s21, %s8098_s21 }
  0x1d   :  { %p8105_p0 = por %p8104_p13, %p8103_p12 }
  0x1f   :  { %p8106_p1 = pnand %p8105_p0, %p8099_p11 }
  0x21   :  { %8109 = shalt.err (!%p8106_p1)
}
  0x22   :  { %61 = dma.hbm_to_vmem [thread:$0]  %s9234_s9, 512, %s56_s28, [#allocation6], %s8139_s23, %s8139_s23, %s8140_s24  }
  0x23   :  { %8132 = dma.done.wait [#allocation3], 512  }
  0x24   :  { %8133 = vsyncadd [#allocation3], 4294966784 }
  0x25   :  { %8134 = dma.done.wait [#allocation6], 512  }
  0x26   :  { %8135 = vsyncadd [#allocation6], 4294966784  ;;  %vm97_vm0 = vcmask 261120   ;;  %v86_v0 = vld [vmem:[%s9227_s2] sm:$0xff]  ;;  %v87_v1 = vld [vmem:[%s9227_s2 + $0x8] sm:$0xff]  ;;  %v8142_v10 = vmov 0.0  }
  0x27   :  { %v88_v2 = vld [vmem:[%s9227_s2 + $0x10] sm:$0xff]  ;;  %v7548_v3 = vpack.c.bf16 %v87_v1, %v86_v0  ;;  %v89_v4 = vld [vmem:[%s9227_s2 + $0x18] sm:$0xff]  ;;  %v76_v5 = vld [vmem:[%s9225_s0] sm:$0xff]  ;;  %7069 = vmatprep.subr.mxu1 %v8142_v10  ;;  %vm8143_vm1 = vmmov 0   ;;  %s8144_s25 = smov 96   ;;  %vm198_vm2 = vcmask 64512  }
  0x28   :  { %v7552_v6 = vpack.c.bf16 %v89_v4, %v88_v2  ;;  %7063 = vmatprep.mubr.msk.f32.mxu0 %vm97_vm0, %v76_v5  ;;  %v77_v7 = vld [vmem:[%s9225_s0 + $0x8] sm:$0xff]  ;;  %v78_v8 = vld [vmem:[%s9225_s0 + $0x10] sm:$0xff]  ;;  %v79_v9 = vld [vmem:[%s9225_s0 + $0x18] sm:$0xff]  ;;  %7071 = vmatprep.mubr.msk.f32.mxu1 %vm8143_vm1, %v8142_v10  ;;  %s8146_s26 = smov 88   ;;  %s8147_s27 = smov 120   ;;  %vm2884_vm3 = vcmask 130048  }
  0x29   :  { %7549 = vmatprep.subr.bf16.mxu0 %v7548_v3  ;;  %v6662_v11 = vld [vmem:[%s9228_s3] ss:$0 sm:$0xff]  ;;  %s8145_s3 = smov 64   ;;  %s8148_s29 = smov 56   ;;  %vm2889_vm4 = vcmask 195584   ;;  %vm8739_vm5 = vmpackc.low %vm198_vm2, %vm198_vm2  ;;  %vm3629_vm6 = vcmask 97280  }
  0x2a   :  { %7551 = vmatpush3.bf16.msra.mxu0 %v7548_v3  ;;  %s8149_s15 = smov 80   ;;  %s8150_s16 = smov 112   ;;  %vm3682_vm7 = vcmask 1043456   ;;  %vm8158_vm8 = vmmov 1   ;;  %vm6468_vm10 = vcmask 523264  }
  0x2b   :  { %7553 = vmatprep.subr.bf16.mxu0 %v7552_v6  ;;  %s8151_s9 = smov 48   ;;  %s8152_s28 = smov 72   ;;  %vm8797_vm9 = vmpackc.low %vm3682_vm7, %vm8158_vm8 }
  0x2c   :  { %s8153_s17 = smov 104   ;;  %s8154_s18 = smov 40  }
  0x2d   :  { %s8155_s19 = smov 16  }
  0x2e   :  { %7555 = vmatpush3.bf16.msra.mxu0 %v7552_v6 }
  0x2f   :  { %7084 = vmatprep.subr.mxu0 %v8142_v10 }
  0x31   :  { %7064 = vmatmul.mubr.msk.f32.vlgmr.msra.gmra.mrb[0].mxu0 %vm97_vm0, %v77_v7 }
  0x32   :  { %7066 = vmatprep.mubr.msk.f32.mxu0 %vm97_vm0, %v78_v8 }
  0x35   :  { %7067 = vmatmul.mubr.msk.f32.gmra.mrb[2].mxu0 %vm97_vm0, %v79_v9 }
  0x36   :  { %7086 = vmatprep.mubr.msk.f32.mxu0 %vm8143_vm1, %v8142_v10 }
 0x104   :  { %v7065_v12 = vpop.f32.mrb[0].mxu0 }
 0x105   :  { %v176_v13 = vpop.f32.mrb[1].mxu0  ;;  %v8306_v17 = vadd.f32 %v7065_v12, %v6662_v11 }
 0x106   :  { %v8302_v14 = vadd.f32 %v6662_v11, %v176_v13 }
 0x108   :  { %v7068_v15 = vpop.f32.mrb[2].mxu0  ;;  %196 = vrot.lane.b32.xlu0 %v8302_v14, %s8144_s25 }
 0x109   :  { %v186_v16 = vpop.f32.mrb[3].mxu0  ;;  %v8310_v19 = vadd.f32 %v7068_v15, %v6662_v11 }
 0x10a   :  { %v8308_v18 = vadd.f32 %v6662_v11, %v186_v16 }
 0x10c   :  { %351 = vrot.lane.b32.xlu1 %v8308_v18, %s8144_s25  ;;  %274 = vrot.lane.b32.xlu0 %v8306_v17, %s8144_s25 }
 0x110   :  { %428 = vrot.lane.b32.xlu1 %v8310_v19, %s8144_s25 }
 0x17a   :  { %v197_v20 = vpop.permute.xlu0 %196 }
 0x17b   :  { %7070 = vmatpush3.xpose.msk.msra.mxu1 %vm198_vm2, %v197_v20 }
 0x17c   :  { %7074 = vmatprep.subr.mxu1 %v8142_v10 }
 0x17e   :  { %v352_v21 = vpop.permute.xlu1 %351  ;;  %7072 = vmatmul.mubr.msk.f32.vlgmr.msra.gmra.mrb[0].mxu1 %vm198_vm2, %v8302_v14  ;;  %v275_v22 = vpop.permute.xlu0 %274 }
 0x17f   :  { %7075 = vmatpush3.xpose.msk.msra.mxu1 %vm198_vm2, %v275_v22  ;;  %7076 = vmatprep.mubr.msk.f32.mxu1 %vm8143_vm1, %v8142_v10 }
 0x180   :  { %7079 = vmatprep.subr.mxu1 %v8142_v10 }
 0x182   :  { %v429_v23 = vpop.permute.xlu1 %428  ;;  %7077 = vmatmul.mubr.msk.f32.vlgmr.msra.gmra.mrb[2].mxu1 %vm198_vm2, %v8306_v17 }
 0x183   :  { %7080 = vmatpush3.xpose.msk.msra.mxu1 %vm198_vm2, %v352_v21  ;;  %7085 = vmatpush3.xpose.msk.msra.mxu0 %vm198_vm2, %v429_v23 }
 0x184   :  { %7081 = vmatprep.mubr.msk.f32.mxu1 %vm8143_vm1, %v8142_v10  ;;  %7089 = vmatprep.subr.mxu1 %v8142_v10 }
 0x185   :  { %7094 = vmatprep.subr.mxu0 %v8142_v10 }
 0x186   :  { %7082 = vmatmul.mubr.msk.f32.vlgmr.msra.gmra.mrb[4].mxu1 %vm198_vm2, %v8308_v18  ;;  %7087 = vmatmul.mubr.msk.f32.vlgmr.msra.gmra.mrb[4].mxu0 %vm198_vm2, %v8310_v19 }
 0x187   :  { %7091 = vmatprep.mubr.msk.f32.mxu1 %vm8143_vm1, %v8142_v10  ;;  %7096 = vmatprep.mubr.msk.f32.mxu0 %vm8143_vm1, %v8142_v10 }
 0x251   :  { %v269_v24 = vpop.f32.mrb[0].mxu1 }
 0x252   :  { %v7073_v25 = vpop.f32.mrb[1].mxu1  ;;  %v504_v26 = vsel %vm198_vm2, %v269_v24, -inf }
 0x253   :  { %505 = vmax.xlane.f32.xlu0 %v504_v26 }
 0x255   :  { %v346_v27 = vpop.f32.mrb[2].mxu1 }
 0x256   :  { %v7078_v28 = vpop.f32.mrb[3].mxu1  ;;  %v507_v29 = vsel %vm198_vm2, %v346_v27, -inf }
 0x257   :  { %508 = vmax.xlane.f32.xlu1 %v507_v29 }
 0x259   :  { %v423_v30 = vpop.f32.mrb[4].mxu1  ;;  %v500_v31 = vpop.f32.mrb[4].mxu0 }
 0x25a   :  { %v7083_v32 = vpop.f32.mrb[5].mxu1  ;;  %v7088_v33 = vpop.f32.mrb[5].mxu0  ;;  %v510_v34 = vsel %vm198_vm2, %v423_v30, -inf  ;;  %v513_v35 = vsel %vm198_vm2, %v500_v31, -inf }
 0x25b   :  { %511 = vmax.xlane.f32.xlu0 %v510_v34 }
 0x25f   :  { %514 = vmax.xlane.f32.xlu0 %v513_v35 }
 0x268   :  { %548 = vrot.lane.b32.xlu1 %v8302_v14, %s8145_s3 }
 0x26c   :  { %700 = vrot.lane.b32.xlu1 %v8308_v18, %s8145_s3 }
 0x270   :  { %776 = vrot.lane.b32.xlu1 %v8310_v19, %s8145_s3 }
 0x275   :  { %624 = vrot.lane.b32.xlu0 %v8306_v17, %s8145_s3 }
 0x2e0   :  { %v506_v36 = vpop.xlane.xlu0 %505 }
 0x2e1   :  { %v516_v37 = vsub.f32 %v269_v24, %v506_v36 }
 0x2e3   :  { %v520_v38 = vmul.f32 1.442695, %v516_v37 }
 0x2e4   :  { %v509_v39 = vpop.xlane.xlu1 %508 }
 0x2e5   :  { %7902 = vpow2.f32 %v520_v38  ;;  %v517_v42 = vsub.f32 %v346_v27, %v509_v39 }
 0x2e7   :  { %v522_v46 = vmul.f32 1.442695, %v517_v42 }
 0x2e8   :  { %v549_v40 = vpop.permute.xlu1 %548  ;;  %v512_v41 = vpop.xlane.xlu0 %511 }
 0x2e9   :  { %7090 = vmatpush3.msra.mxu1 %v549_v40  ;;  %v518_v54 = vsub.f32 %v423_v30, %v512_v41 }
 0x2ea   :  { %7099 = vmatprep.subr.mxu1 %v8142_v10 }
 0x2eb   :  { %v524_v55 = vmul.f32 1.442695, %v518_v54 }
 0x2ec   :  { %v515_v43 = vpop.xlane.xlu0 %514  ;;  %v701_v58 = vpop.permute.xlu1 %700 }
 0x2ed   :  { %v519_v44 = vsub.f32 %v500_v31, %v515_v43 }
 0x2ef   :  { %v7903_v45 = vpop.eup %7902  ;;  %v526_v47 = vmul.f32 1.442695, %v519_v44 }
 0x2f0   :  { %v625_v48 = vpop.permute.xlu0 %624  ;;  %v528_v49 = vsel %vm198_vm2, %v7903_v45, 0.0  ;;  %v777_v59 = vpop.permute.xlu1 %776 }
 0x2f1   :  { %7904 = vpow2.f32 %v526_v47  ;;  %529 = vadd.xlane.f32.xlu1 %v528_v49  ;;  %7095 = vmatpush3.msra.mxu0 %v625_v48 }
 0x2f2   :  { %7104 = vmatprep.subr.mxu0 %v8142_v10  ;;  %7906 = vpow2.f32 %v522_v46 }
 0x2f3   :  { %7908 = vpow2.f32 %v524_v55 }
 0x2fb   :  { %v7905_v50 = vpop.eup %7904 }
 0x2fc   :  { %v537_v51 = vsel %vm198_vm2, %v7905_v50, 0.0  ;;  %v7907_v52 = vpop.eup %7906 }
 0x2fd   :  { %538 = vadd.xlane.f32.xlu0 %v537_v51  ;;  %v531_v53 = vsel %vm198_vm2, %v7907_v52, 0.0  ;;  %v7909_v56 = vpop.eup %7908 }
 0x2fe   :  { %v534_v57 = vsel %vm198_vm2, %v7909_v56, 0.0 }
 0x301   :  { %532 = vadd.xlane.f32.xlu0 %v531_v53 }
 0x302   :  { %932 = vrot.lane.b32.xlu1 %v8306_v17, %s8146_s26 }
 0x306   :  { %930 = vrot.lane.b32.xlu1 %v8306_v17, %s8147_s27 }
 0x317   :  { %854 = vrot.lane.b32.xlu0 %v8302_v14, %s8146_s26 }
 0x31b   :  { %852 = vrot.lane.b32.xlu0 %v8302_v14, %s8147_s27 }
 0x31f   :  { %1010 = vrot.lane.b32.xlu0 %v8308_v18, %s8146_s26 }
 0x323   :  { %1008 = vrot.lane.b32.xlu0 %v8308_v18, %s8147_s27 }
 0x32a   :  { %535 = vadd.xlane.f32.xlu1 %v534_v57 }
 0x33b   :  { %1088 = vrot.lane.b32.xlu1 %v8310_v19, %s8146_s26 }
 0x33f   :  { %1086 = vrot.lane.b32.xlu1 %v8310_v19, %s8147_s27 }
 0x37e   :  { %v530_v60 = vpop.xlane.xlu1 %529 }
 0x37f   :  { %7910 = vrcp.f32 %v530_v60 }
 0x382   :  { %v933_v5 = vpop.permute.xlu1 %932 }
 0x386   :  { %v931_v6 = vpop.permute.xlu1 %930 }
 0x389   :  { %v7911_v61 = vpop.eup %7910 }
 0x38a   :  { %v539_v62 = vpop.xlane.xlu0 %538  ;;  %v541_v63 = vmul.f32 %v7911_v61, %v7903_v45 }
 0x38c   :  { %7092 = vmatmul.mubr.msk.f32.vlgmr.msra.gmra.mrb[6].mxu1 %vm198_vm2, %v541_v63 }
 0x38d   :  { %7100 = vmatpush3.msra.mxu1 %v701_v58  ;;  %7101 = vmatprep.mubr.msk.f32.mxu1 %vm8143_vm1, %v8142_v10 }
 0x38e   :  { %v533_v0 = vpop.xlane.xlu0 %532  ;;  %7109 = vmatprep.subr.mxu1 %v8142_v10 }
 0x38f   :  { %7912 = vrcp.f32 %v533_v0 }
 0x390   :  { %7914 = vrcp.f32 %v539_v62 }
 0x392   :  { %v855_v8 = vpop.permute.xlu0 %854 }
 0x396   :  { %v853_v12 = vpop.permute.xlu0 %852 }
 0x399   :  { %v7913_v1 = vpop.eup %7912 }
 0x39a   :  { %v543_v2 = vmul.f32 %v7913_v1, %v7907_v52  ;;  %v7915_v3 = vpop.eup %7914  ;;  %v1011_v16 = vpop.permute.xlu0 %1010 }
 0x39b   :  { %v547_v4 = vmul.f32 %v7915_v3, %v7905_v50 }
 0x39c   :  { %7097 = vmatmul.mubr.msk.f32.vlgmr.msra.gmra.mrb[6].mxu0 %vm198_vm2, %v543_v2 }
 0x39d   :  { %7105 = vmatpush3.msra.mxu0 %v777_v59  ;;  %7106 = vmatprep.mubr.msk.f32.mxu0 %vm8143_vm1, %v8142_v10 }
 0x39e   :  { %7114 = vmatprep.subr.mxu0 %v8142_v10  ;;  %v1009_v20 = vpop.permute.xlu0 %1008 }
 0x3a0   :  { %7107 = vmatmul.mubr.msk.f32.vlgmr.msra.gmra.mrb[8].mxu0 %vm198_vm2, %v547_v4 }
 0x3a1   :  { %7116 = vmatprep.mubr.msk.f32.mxu0 %vm8143_vm1, %v8142_v10 }
 0x3a4   :  { %7115 = vmatpush3.xpose.msk.msra.mxu0 %vm198_vm2, %v933_v5 }
 0x3a5   :  { %7124 = vmatprep.subr.mxu0 %v8142_v10 }
 0x3a7   :  { %7117 = vmatmul.mubr.msk.f32.vlgmr.msra.gmra.mrb[10].mxu0 %vm198_vm2, %v931_v6 }
 0x3a8   :  { %7126 = vmatprep.mubr.msk.f32.mxu0 %vm8143_vm1, %v8142_v10 }
 0x3b7   :  { %v536_v7 = vpop.xlane.xlu1 %535 }
 0x3b8   :  { %7916 = vrcp.f32 %v536_v7 }
 0x3bb   :  { %v1089_v9 = vpop.permute.xlu1 %1088 }
 0x3bc   :  { %7125 = vmatpush3.xpose.msk.msra.mxu0 %vm198_vm2, %v1089_v9 }
 0x3bd   :  { %7134 = vmatprep.subr.mxu0 %v8142_v10 }
 0x3bf   :  { %v1087_v11 = vpop.permute.xlu1 %1086 }
 0x3c0   :  { %7127 = vmatmul.mubr.msk.f32.vlgmr.msra.gmra.mrb[12].mxu0 %vm198_vm2, %v1087_v11 }
 0x3c1   :  { %7136 = vmatprep.mubr.msk.f32.mxu0 %vm8143_vm1, %v8142_v10 }
 0x3c2   :  { %v7917_v13 = vpop.eup %7916 }
 0x3c3   :  { %v545_v15 = vmul.f32 %v7917_v13, %v7909_v56 }
 0x3c5   :  { %7102 = vmatmul.mubr.msk.f32.vlgmr.msra.gmra.mrb[8].mxu1 %vm198_vm2, %v545_v15 }
 0x3c6   :  { %7110 = vmatpush3.xpose.msk.msra.mxu1 %vm198_vm2, %v855_v8  ;;  %7111 = vmatprep.mubr.msk.f32.mxu1 %vm8143_vm1, %v8142_v10 }
 0x3c7   :  { %7119 = vmatprep.subr.mxu1 %v8142_v10 }
 0x3c9   :  { %7112 = vmatmul.mubr.msk.f32.vlgmr.msra.gmra.mrb[10].mxu1 %vm198_vm2, %v853_v12 }
 0x3ca   :  { %7120 = vmatpush3.xpose.msk.msra.mxu1 %vm198_vm2, %v1011_v16  ;;  %7121 = vmatprep.mubr.msk.f32.mxu1 %vm8143_vm1, %v8142_v10 }
 0x3cb   :  { %7129 = vmatprep.subr.mxu1 %v8142_v10 }
 0x3cd   :  { %7122 = vmatmul.mubr.msk.f32.vlgmr.msra.gmra.mrb[12].mxu1 %vm198_vm2, %v1009_v20 }
 0x3ce   :  { %7131 = vmatprep.mubr.msk.f32.mxu1 %vm8143_vm1, %v8142_v10 }
 0x45f   :  { %v8406_v21 = vpop.f32.mrb[6].mxu1 }
 0x460   :  { %v7093_v22 = vpop.f32.mrb[7].mxu1 }
 0x46f   :  { %v8408_v23 = vpop.f32.mrb[6].mxu0 }
 0x470   :  { %v7098_v24 = vpop.f32.mrb[7].mxu0 }
 0x473   :  { %v8410_v25 = vpop.f32.mrb[8].mxu0 }
 0x474   :  { %v7108_v26 = vpop.f32.mrb[9].mxu0 }
 0x47a   :  { %v1004_v27 = vpop.f32.mrb[10].mxu0 }
 0x47b   :  { %v7118_v28 = vpop.f32.mrb[11].mxu0  ;;  %v1167_v29 = vsel %vm198_vm2, %v1004_v27, -inf }
 0x47c   :  { %1168 = vmax.xlane.f32.xlu1 %v1167_v29 }
 0x48d   :  { %1208 = vrot.lane.b32.xlu1 %v8302_v14, %s8148_s29 }
 0x491   :  { %1360 = vrot.lane.b32.xlu1 %v8308_v18, %s8148_s29 }
 0x493   :  { %v1160_v30 = vpop.f32.mrb[12].mxu0 }
 0x494   :  { %v7128_v31 = vpop.f32.mrb[13].mxu0  ;;  %v1173_v40 = vsel %vm198_vm2, %v1160_v30, -inf }
 0x495   :  { %1436 = vrot.lane.b32.xlu1 %v8310_v19, %s8148_s29 }
 0x498   :  { %v8416_v32 = vpop.f32.mrb[8].mxu1 }
 0x499   :  { %1592 = vrot.lane.b32.xlu1 %v8306_v17, %s8149_s15  ;;  %v7103_v33 = vpop.f32.mrb[9].mxu1 }
 0x49c   :  { %v926_v34 = vpop.f32.mrb[10].mxu1 }
 0x49d   :  { %v7113_v35 = vpop.f32.mrb[11].mxu1  ;;  %v1164_v36 = vsel %vm198_vm2, %v926_v34, -inf }
 0x49e   :  { %1165 = vmax.xlane.f32.xlu0 %v1164_v36 }
 0x4a0   :  { %v1082_v37 = vpop.f32.mrb[12].mxu1 }
 0x4a1   :  { %v7123_v38 = vpop.f32.mrb[13].mxu1  ;;  %v1170_v39 = vsel %vm198_vm2, %v1082_v37, -inf }
 0x4a2   :  { %1171 = vmax.xlane.f32.xlu0 %v1170_v39 }
 0x4a6   :  { %1174 = vmax.xlane.f32.xlu0 %v1173_v40 }
 0x4bc   :  { %1284 = vrot.lane.b32.xlu0 %v8306_v17, %s8148_s29 }
 0x4c0   :  { %1514 = vrot.lane.b32.xlu0 %v8302_v14, %s8149_s15 }
 0x509   :  { %v1169_v41 = vpop.xlane.xlu1 %1168 }
 0x50a   :  { %v1177_v42 = vsub.f32 %v1004_v27, %v1169_v41 }
 0x50c   :  { %v1182_v43 = vmul.f32 1.442695, %v1177_v42 }
 0x50d   :  { %v1209_v44 = vpop.permute.xlu1 %1208 }
 0x50e   :  { %7918 = vpow2.f32 %v1182_v43  ;;  %7130 = vmatpush3.msra.mxu1 %v1209_v44 }
 0x50f   :  { %7139 = vmatprep.subr.mxu1 %v8142_v10 }
 0x511   :  { %v1361_v1 = vpop.permute.xlu1 %1360 }
 0x515   :  { %v1437_v4 = vpop.permute.xlu1 %1436 }
 0x518   :  { %v7919_v45 = vpop.eup %7918 }
 0x519   :  { %v1191_v46 = vsel %vm198_vm2, %v7919_v45, 0.0  ;;  %v1593_v5 = vpop.permute.xlu1 %1592 }
 0x51a   :  { %1192 = vadd.xlane.f32.xlu0 %v1191_v46 }
 0x52b   :  { %v1166_v47 = vpop.xlane.xlu0 %1165 }
 0x52c   :  { %v1176_v48 = vsub.f32 %v926_v34, %v1166_v47 }
 0x52e   :  { %v1180_v49 = vmul.f32 1.442695, %v1176_v48 }
 0x52f   :  { %v1172_v50 = vpop.xlane.xlu0 %1171 }
 0x530   :  { %7920 = vpow2.f32 %v1180_v49  ;;  %v1178_v51 = vsub.f32 %v1082_v37, %v1172_v50 }
 0x532   :  { %v1184_v52 = vmul.f32 1.442695, %v1178_v51 }
 0x533   :  { %v1175_v53 = vpop.xlane.xlu0 %1174 }
 0x534   :  { %7922 = vpow2.f32 %v1184_v52  ;;  %v1179_v54 = vsub.f32 %v1160_v30, %v1175_v53 }
 0x536   :  { %v1186_v55 = vmul.f32 1.442695, %v1179_v54 }
 0x537   :  { %v1285_v56 = vpop.permute.xlu0 %1284 }
 0x538   :  { %7924 = vpow2.f32 %v1186_v55  ;;  %7135 = vmatpush3.msra.mxu0 %v1285_v56 }
 0x539   :  { %7144 = vmatprep.subr.mxu0 %v8142_v10 }
 0x53a   :  { %v7921_v57 = vpop.eup %7920 }
 0x53b   :  { %v1188_v58 = vsel %vm198_vm2, %v7921_v57, 0.0  ;;  %v1515_v63 = vpop.permute.xlu0 %1514 }
 0x53c   :  { %1189 = vadd.xlane.f32.xlu1 %v1188_v58 }
 0x53e   :  { %v7923_v59 = vpop.eup %7922 }
 0x53f   :  { %v1194_v60 = vsel %vm198_vm2, %v7923_v59, 0.0 }
 0x540   :  { %1195 = vadd.xlane.f32.xlu1 %v1194_v60 }
 0x542   :  { %v7925_v61 = vpop.eup %7924 }
 0x543   :  { %v1197_v62 = vsel %vm198_vm2, %v7925_v61, 0.0 }
 0x544   :  { %1198 = vadd.xlane.f32.xlu0 %v1197_v62 }
 0x551   :  { %1590 = vrot.lane.b32.xlu1 %v8306_v17, %s8150_s16 }
 0x555   :  { %1748 = vrot.lane.b32.xlu1 %v8310_v19, %s8149_s15 }
 0x559   :  { %1746 = vrot.lane.b32.xlu1 %v8310_v19, %s8150_s16 }
 0x55a   :  { %1512 = vrot.lane.b32.xlu0 %v8302_v14, %s8150_s16 }
 0x55d   :  { %1868 = vrot.lane.b32.xlu1 %v8302_v14, %s8151_s9 }
 0x55e   :  { %1670 = vrot.lane.b32.xlu0 %v8308_v18, %s8149_s15 }
 0x561   :  { %2020 = vrot.lane.b32.xlu1 %v8308_v18, %s8151_s9 }
 0x562   :  { %1668 = vrot.lane.b32.xlu0 %v8308_v18, %s8150_s16 }
 0x565   :  { %2096 = vrot.lane.b32.xlu1 %v8310_v19, %s8151_s9 }
 0x566   :  { %1944 = vrot.lane.b32.xlu0 %v8306_v17, %s8151_s9  ;;  %s8156_s9 = smov 24  }
 0x5a7   :  { %v1193_v0 = vpop.xlane.xlu0 %1192 }
 0x5a8   :  { %7926 = vrcp.f32 %v1193_v0 }
 0x5b2   :  { %v7927_v2 = vpop.eup %7926 }
 0x5b3   :  { %v1203_v3 = vmul.f32 %v7927_v2, %v7919_v45 }
 0x5b5   :  { %7137 = vmatmul.mubr.msk.f32.vlgmr.msra.gmra.mrb[14].mxu0 %vm198_vm2, %v1203_v3 }
 0x5b6   :  { %7145 = vmatpush3.msra.mxu0 %v1437_v4  ;;  %7146 = vmatprep.mubr.msk.f32.mxu0 %vm8143_vm1, %v8142_v10 }
 0x5b7   :  { %7154 = vmatprep.subr.mxu0 %v8142_v10 }
 0x5c9   :  { %v1190_v6 = vpop.xlane.xlu1 %1189 }
 0x5ca   :  { %7928 = vrcp.f32 %v1190_v6 }
 0x5cd   :  { %v1196_v7 = vpop.xlane.xlu1 %1195 }
 0x5ce   :  { %7930 = vrcp.f32 %v1196_v7 }
 0x5d1   :  { %v1199_v8 = vpop.xlane.xlu0 %1198  ;;  %v1591_v11 = vpop.permute.xlu1 %1590 }
 0x5d2   :  { %7932 = vrcp.f32 %v1199_v8 }
 0x5d4   :  { %v7929_v9 = vpop.eup %7928 }
 0x5d5   :  { %v1513_v12 = vpop.permute.xlu0 %1512  ;;  %v1201_v13 = vmul.f32 %v7929_v9, %v7921_v57  ;;  %v1749_v20 = vpop.permute.xlu1 %1748 }
 0x5d7   :  { %7132 = vmatmul.mubr.msk.f32.vlgmr.msra.gmra.mrb[14].mxu1 %vm198_vm2, %v1201_v13 }
 0x5d8   :  { %v7931_v15 = vpop.eup %7930  ;;  %7140 = vmatpush3.msra.mxu1 %v1361_v1  ;;  %7141 = vmatprep.mubr.msk.f32.mxu1 %vm8143_vm1, %v8142_v10 }
 0x5d9   :  { %v1205_v16 = vmul.f32 %v7931_v15, %v7923_v59  ;;  %7149 = vmatprep.subr.mxu1 %v8142_v10  ;;  %v1671_v22 = vpop.permute.xlu0 %1670  ;;  %v1747_v27 = vpop.permute.xlu1 %1746 }
 0x5db   :  { %7142 = vmatmul.mubr.msk.f32.vlgmr.msra.gmra.mrb[16].mxu1 %vm198_vm2, %v1205_v16 }
 0x5dc   :  { %v7933_v24 = vpop.eup %7932  ;;  %7151 = vmatprep.mubr.msk.f32.mxu1 %vm8143_vm1, %v8142_v10 }
 0x5dd   :  { %v1207_v26 = vmul.f32 %v7933_v24, %v7925_v61  ;;  %v1669_v28 = vpop.permute.xlu0 %1668  ;;  %v1869_v29 = vpop.permute.xlu1 %1868 }
 0x5df   :  { %7150 = vmatpush3.xpose.msk.msra.mxu1 %vm198_vm2, %v1515_v63  ;;  %7147 = vmatmul.mubr.msk.f32.vlgmr.msra.gmra.mrb[16].mxu0 %vm198_vm2, %v1207_v26 }
 0x5e0   :  { %7155 = vmatpush3.xpose.msk.msra.mxu0 %vm198_vm2, %v1593_v5  ;;  %7159 = vmatprep.subr.mxu1 %v8142_v10 }
 0x5e1   :  { %7156 = vmatprep.mubr.msk.f32.mxu0 %vm8143_vm1, %v8142_v10  ;;  %7164 = vmatprep.subr.mxu0 %v8142_v10  ;;  %v1945_v30 = vpop.permute.xlu0 %1944  ;;  %v2021_v52 = vpop.permute.xlu1 %2020 }
 0x5e2   :  { %7152 = vmatmul.mubr.msk.f32.vlgmr.msra.gmra.mrb[18].mxu1 %vm198_vm2, %v1513_v12 }
 0x5e3   :  { %7160 = vmatpush3.xpose.msk.msra.mxu1 %vm198_vm2, %v1671_v22  ;;  %7157 = vmatmul.mubr.msk.f32.vlgmr.msra.gmra.mrb[18].mxu0 %vm198_vm2, %v1591_v11 }
 0x5e4   :  { %7165 = vmatpush3.xpose.msk.msra.mxu0 %vm198_vm2, %v1749_v20  ;;  %7161 = vmatprep.mubr.msk.f32.mxu1 %vm8143_vm1, %v8142_v10 }
 0x5e5   :  { %7169 = vmatprep.subr.mxu1 %v8142_v10  ;;  %7166 = vmatprep.mubr.msk.f32.mxu0 %vm8143_vm1, %v8142_v10  ;;  %v2097_v53 = vpop.permute.xlu1 %2096 }
 0x5e6   :  { %7162 = vmatmul.mubr.msk.f32.vlgmr.msra.gmra.mrb[20].mxu1 %vm198_vm2, %v1669_v28  ;;  %7174 = vmatprep.subr.mxu0 %v8142_v10 }
 0x5e7   :  { %7170 = vmatpush3.msra.mxu1 %v1869_v29  ;;  %7167 = vmatmul.mubr.msk.f32.vlgmr.msra.gmra.mrb[20].mxu0 %vm198_vm2, %v1747_v27 }
 0x5e8   :  { %7175 = vmatpush3.msra.mxu0 %v1945_v30  ;;  %7171 = vmatprep.mubr.msk.f32.mxu1 %vm8143_vm1, %v8142_v10 }
 0x5e9   :  { %7179 = vmatprep.subr.mxu1 %v8142_v10  ;;  %7176 = vmatprep.mubr.msk.f32.mxu0 %vm8143_vm1, %v8142_v10 }
 0x5ea   :  { %7184 = vmatprep.subr.mxu0 %v8142_v10 }
 0x688   :  { %v8484_v31 = vpop.f32.mrb[14].mxu0 }
 0x689   :  { %v7138_v33 = vpop.f32.mrb[15].mxu0 }
 0x6aa   :  { %v8486_v34 = vpop.f32.mrb[14].mxu1 }
 0x6ab   :  { %v7133_v35 = vpop.f32.mrb[15].mxu1 }
 0x6ae   :  { %v8488_v36 = vpop.f32.mrb[16].mxu1 }
 0x6af   :  { %v7143_v37 = vpop.f32.mrb[17].mxu1 }
 0x6b2   :  { %v8490_v38 = vpop.f32.mrb[16].mxu0 }
 0x6b3   :  { %v7148_v39 = vpop.f32.mrb[17].mxu0 }
 0x6b5   :  { %v1586_v40 = vpop.f32.mrb[18].mxu1 }
 0x6b6   :  { %v7153_v41 = vpop.f32.mrb[19].mxu1  ;;  %v1664_v42 = vpop.f32.mrb[18].mxu0  ;;  %v1824_v43 = vsel %vm198_vm2, %v1586_v40, -inf }
 0x6b7   :  { %1825 = vmax.xlane.f32.xlu0 %v1824_v43  ;;  %v7158_v44 = vpop.f32.mrb[19].mxu0  ;;  %v1827_v45 = vsel %vm198_vm2, %v1664_v42, -inf }
 0x6b8   :  { %1828 = vmax.xlane.f32.xlu1 %v1827_v45 }
 0x6b9   :  { %v1742_v46 = vpop.f32.mrb[20].mxu1 }
 0x6ba   :  { %v7163_v47 = vpop.f32.mrb[21].mxu1  ;;  %v1820_v48 = vpop.f32.mrb[20].mxu0  ;;  %v1830_v49 = vsel %vm198_vm2, %v1742_v46, -inf }
 0x6bb   :  { %1831 = vmax.xlane.f32.xlu0 %v1830_v49  ;;  %v7168_v50 = vpop.f32.mrb[21].mxu0  ;;  %v1833_v51 = vsel %vm198_vm2, %v1820_v48, -inf }
 0x6bf   :  { %1834 = vmax.xlane.f32.xlu0 %v1833_v51 }
 0x6c9   :  { %2252 = vrot.lane.b32.xlu1 %v8306_v17, %s8152_s28 }
 0x6d5   :  { %2174 = vrot.lane.b32.xlu0 %v8302_v14, %s8152_s28 }
 0x744   :  { %v1826_v54 = vpop.xlane.xlu0 %1825 }
 0x745   :  { %v1836_v55 = vsub.f32 %v1586_v40, %v1826_v54  ;;  %v1829_v56 = vpop.xlane.xlu1 %1828 }
 0x746   :  { %v1837_v57 = vsub.f32 %v1664_v42, %v1829_v56 }
 0x747   :  { %v1840_v58 = vmul.f32 1.442695, %v1836_v55 }
 0x748   :  { %v1842_v59 = vmul.f32 1.442695, %v1837_v57  ;;  %v1832_v0 = vpop.xlane.xlu0 %1831 }
 0x749   :  { %7934 = vpow2.f32 %v1840_v58  ;;  %v1838_v2 = vsub.f32 %v1742_v46, %v1832_v0  ;;  %v2253_v11 = vpop.permute.xlu1 %2252 }
 0x74a   :  { %7936 = vpow2.f32 %v1842_v59 }
 0x74b   :  { %v1844_v4 = vmul.f32 1.442695, %v1838_v2 }
 0x74c   :  { %v1835_v1 = vpop.xlane.xlu0 %1834 }
 0x74d   :  { %v1839_v3 = vsub.f32 %v1820_v48, %v1835_v1  ;;  %7938 = vpow2.f32 %v1844_v4 }
 0x74f   :  { %v1846_v5 = vmul.f32 1.442695, %v1839_v3 }
 0x750   :  { %v2175_v12 = vpop.permute.xlu0 %2174 }
 0x751   :  { %7940 = vpow2.f32 %v1846_v5 }
 0x753   :  { %v7935_v60 = vpop.eup %7934 }
 0x754   :  { %v7937_v61 = vpop.eup %7936  ;;  %v1848_v62 = vsel %vm198_vm2, %v7935_v60, 0.0 }
 0x755   :  { %1849 = vadd.xlane.f32.xlu1 %v1848_v62  ;;  %v1851_v63 = vsel %vm198_vm2, %v7937_v61, 0.0 }
 0x756   :  { %1852 = vadd.xlane.f32.xlu0 %v1851_v63 }
 0x757   :  { %v7939_v6 = vpop.eup %7938 }
 0x758   :  { %v1854_v8 = vsel %vm198_vm2, %v7939_v6, 0.0 }
 0x75b   :  { %v7941_v7 = vpop.eup %7940 }
 0x75c   :  { %v1857_v9 = vsel %vm198_vm2, %v7941_v7, 0.0 }
 0x766   :  { %2250 = vrot.lane.b32.xlu1 %v8306_v17, %s8153_s17 }
 0x76c   :  { %2172 = vrot.lane.b32.xlu0 %v8302_v14, %s8153_s17 }
 0x78a   :  { %1855 = vadd.xlane.f32.xlu1 %v1854_v8 }
 0x78b   :  { %1858 = vadd.xlane.f32.xlu0 %v1857_v9 }
 0x79b   :  { %2408 = vrot.lane.b32.xlu1 %v8310_v19, %s8152_s28 }
 0x79f   :  { %2406 = vrot.lane.b32.xlu1 %v8310_v19, %s8153_s17 }
 0x7a1   :  { %2330 = vrot.lane.b32.xlu0 %v8308_v18, %s8152_s28 }
 0x7a5   :  { %2328 = vrot.lane.b32.xlu0 %v8308_v18, %s8153_s17 }
 0x7e2   :  { %v1850_v13 = vpop.xlane.xlu1 %1849 }
 0x7e3   :  { %7942 = vrcp.f32 %v1850_v13  ;;  %v1853_v15 = vpop.xlane.xlu0 %1852 }
 0x7e4   :  { %7944 = vrcp.f32 %v1853_v15 }
 0x7e6   :  { %v2251_v26 = vpop.permute.xlu1 %2250 }
 0x7e7   :  { %v2173_v27 = vpop.permute.xlu0 %2172 }
 0x7ed   :  { %v7943_v16 = vpop.eup %7942 }
 0x7ee   :  { %v7945_v20 = vpop.eup %7944  ;;  %v1861_v22 = vmul.f32 %v7943_v16, %v7935_v60 }
 0x7ef   :  { %v1863_v24 = vmul.f32 %v7945_v20, %v7937_v61 }
 0x7f0   :  { %7172 = vmatmul.mubr.msk.f32.vlgmr.msra.gmra.mrb[22].mxu1 %vm198_vm2, %v1861_v22 }
 0x7f1   :  { %7180 = vmatpush3.msra.mxu1 %v2021_v52  ;;  %7177 = vmatmul.mubr.msk.f32.vlgmr.msra.gmra.mrb[22].mxu0 %vm198_vm2, %v1863_v24 }
 0x7f2   :  { %7185 = vmatpush3.msra.mxu0 %v2097_v53  ;;  %7181 = vmatprep.mubr.msk.f32.mxu1 %vm8143_vm1, %v8142_v10 }
 0x7f3   :  { %7189 = vmatprep.subr.mxu1 %v8142_v10  ;;  %7186 = vmatprep.mubr.msk.f32.mxu0 %vm8143_vm1, %v8142_v10 }
 0x7f4   :  { %7194 = vmatprep.subr.mxu0 %v8142_v10 }
 0x817   :  { %v1856_v28 = vpop.xlane.xlu1 %1855 }
 0x818   :  { %7946 = vrcp.f32 %v1856_v28  ;;  %v1859_v29 = vpop.xlane.xlu0 %1858 }
 0x819   :  { %7948 = vrcp.f32 %v1859_v29 }
 0x81b   :  { %v2409_v40 = vpop.permute.xlu1 %2408 }
 0x81c   :  { %v2331_v39 = vpop.permute.xlu0 %2330 }
 0x81f   :  { %v2407_v42 = vpop.permute.xlu1 %2406 }
 0x820   :  { %v2329_v41 = vpop.permute.xlu0 %2328 }
 0x822   :  { %v7947_v30 = vpop.eup %7946 }
 0x823   :  { %v7949_v33 = vpop.eup %7948  ;;  %v1865_v35 = vmul.f32 %v7947_v30, %v7939_v6 }
 0x824   :  { %v1867_v37 = vmul.f32 %v7949_v33, %v7941_v7 }
 0x825   :  { %7182 = vmatmul.mubr.msk.f32.vlgmr.msra.gmra.mrb[24].mxu1 %vm198_vm2, %v1865_v35 }
 0x826   :  { %7190 = vmatpush3.xpose.msk.msra.mxu1 %vm198_vm2, %v2175_v12  ;;  %7187 = vmatmul.mubr.msk.f32.vlgmr.msra.gmra.mrb[24].mxu0 %vm198_vm2, %v1867_v37 }
 0x827   :  { %7195 = vmatpush3.xpose.msk.msra.mxu0 %vm198_vm2, %v2253_v11  ;;  %7191 = vmatprep.mubr.msk.f32.mxu1 %vm8143_vm1, %v8142_v10 }
 0x828   :  { %7199 = vmatprep.subr.mxu1 %v8142_v10  ;;  %7196 = vmatprep.mubr.msk.f32.mxu0 %vm8143_vm1, %v8142_v10 }
 0x829   :  { %7192 = vmatmul.mubr.msk.f32.vlgmr.msra.gmra.mrb[26].mxu1 %vm198_vm2, %v2173_v27  ;;  %7204 = vmatprep.subr.mxu0 %v8142_v10 }
 0x82a   :  { %7200 = vmatpush3.xpose.msk.msra.mxu1 %vm198_vm2, %v2331_v39  ;;  %7197 = vmatmul.mubr.msk.f32.vlgmr.msra.gmra.mrb[26].mxu0 %vm198_vm2, %v2251_v26 }
 0x82b   :  { %7205 = vmatpush3.xpose.msk.msra.mxu0 %vm198_vm2, %v2409_v40  ;;  %7201 = vmatprep.mubr.msk.f32.mxu1 %vm8143_vm1, %v8142_v10  ;;  %v2894_v40 = vld [vmem:[%s9229_s4] sm:$0xff] }
 0x82c   :  { %7206 = vmatprep.mubr.msk.f32.mxu0 %vm8143_vm1, %v8142_v10  ;;  %7209 = vmatprep.subr.mxu1 %v8142_v10 }
 0x82d   :  { %7202 = vmatmul.mubr.msk.f32.vlgmr.msra.gmra.mrb[28].mxu1 %vm198_vm2, %v2329_v41  ;;  %7214 = vmatprep.subr.mxu0 %v8142_v10  ;;  %v2895_v41 = vld [vmem:[%s9229_s4 + $0x8] sm:$0xff] }
 0x82e   :  { %7207 = vmatmul.mubr.msk.f32.vlgmr.msra.gmra.mrb[28].mxu0 %vm198_vm2, %v2407_v42  ;;  %7211 = vmatprep.mubr.msk.f32.mxu1 %vm8143_vm1, %v8142_v10  ;;  %v2896_v42 = vld [vmem:[%s9229_s4 + $0x10] sm:$0xff] }
 0x82f   :  { %7216 = vmatprep.mubr.msk.f32.mxu0 %vm8143_vm1, %v8142_v10 }
 0x8c3   :  { %v8550_v43 = vpop.f32.mrb[22].mxu1 }
 0x8c4   :  { %v7173_v44 = vpop.f32.mrb[23].mxu1  ;;  %v2016_v45 = vpop.f32.mrb[22].mxu0 }
 0x8c5   :  { %v7178_v46 = vpop.f32.mrb[23].mxu0  ;;  %v2897_v44 = vld [vmem:[%s9229_s4 + $0x18] sm:$0xff] }
 0x8f8   :  { %v8552_v47 = vpop.f32.mrb[24].mxu1 }
 0x8f9   :  { %v7183_v48 = vpop.f32.mrb[25].mxu1  ;;  %v2168_v49 = vpop.f32.mrb[24].mxu0 }
 0x8fa   :  { %v7188_v50 = vpop.f32.mrb[25].mxu0 }
 0x8fc   :  { %v2246_v51 = vpop.f32.mrb[26].mxu1 }
 0x8fd   :  { %v7193_v52 = vpop.f32.mrb[27].mxu1  ;;  %v2484_v53 = vsel %vm198_vm2, %v2246_v51, -inf  ;;  %v2324_v54 = vpop.f32.mrb[26].mxu0 }
 0x8fe   :  { %2485 = vmax.xlane.f32.xlu0 %v2484_v53  ;;  %v7198_v55 = vpop.f32.mrb[27].mxu0  ;;  %v2487_v56 = vsel %vm198_vm2, %v2324_v54, -inf }
 0x8ff   :  { %2488 = vmax.xlane.f32.xlu1 %v2487_v56 }
 0x900   :  { %v2402_v57 = vpop.f32.mrb[28].mxu1 }
 0x901   :  { %v7203_v58 = vpop.f32.mrb[29].mxu1  ;;  %v2480_v59 = vpop.f32.mrb[28].mxu0  ;;  %v2490_v60 = vsel %vm198_vm2, %v2402_v57, -inf }
 0x902   :  { %2491 = vmax.xlane.f32.xlu0 %v2490_v60  ;;  %v7208_v61 = vpop.f32.mrb[29].mxu0  ;;  %v2493_v62 = vsel %vm198_vm2, %v2480_v59, -inf }
 0x906   :  { %2494 = vmax.xlane.f32.xlu0 %v2493_v62 }
 0x910   :  { %2528 = vrot.lane.b32.xlu1 %v8302_v14, %s8154_s18 }
 0x98b   :  { %v2486_v63 = vpop.xlane.xlu0 %2485 }
 0x98c   :  { %v2496_v0 = vsub.f32 %v2246_v51, %v2486_v63  ;;  %v2489_v1 = vpop.xlane.xlu1 %2488 }
 0x98d   :  { %v2497_v2 = vsub.f32 %v2324_v54, %v2489_v1 }
 0x98e   :  { %v2500_v3 = vmul.f32 1.442695, %v2496_v0 }
 0x98f   :  { %v2502_v4 = vmul.f32 1.442695, %v2497_v2  ;;  %v2492_v5 = vpop.xlane.xlu0 %2491 }
 0x990   :  { %7950 = vpow2.f32 %v2500_v3  ;;  %v2498_v6 = vsub.f32 %v2402_v57, %v2492_v5  ;;  %v2529_v7 = vpop.permute.xlu1 %2528 }
 0x991   :  { %7952 = vpow2.f32 %v2502_v4  ;;  %7210 = vmatpush3.msra.mxu1 %v2529_v7 }
 0x992   :  { %v2504_v8 = vmul.f32 1.442695, %v2498_v6  ;;  %7219 = vmatprep.subr.mxu1 %v8142_v10 }
 0x993   :  { %v2495_v9 = vpop.xlane.xlu0 %2494 }
 0x994   :  { %7954 = vpow2.f32 %v2504_v8  ;;  %v2499_v11 = vsub.f32 %v2480_v59, %v2495_v9 }
 0x996   :  { %v2506_v12 = vmul.f32 1.442695, %v2499_v11 }
 0x998   :  { %7956 = vpow2.f32 %v2506_v12 }
 0x99a   :  { %v7951_v14 = vpop.eup %7950 }
 0x99b   :  { %v7953_v13 = vpop.eup %7952  ;;  %v2508_v15 = vsel %vm198_vm2, %v7951_v14, 0.0 }
 0x99c   :  { %2509 = vadd.xlane.f32.xlu1 %v2508_v15  ;;  %v2511_v16 = vsel %vm198_vm2, %v7953_v13, 0.0 }
 0x99d   :  { %2512 = vadd.xlane.f32.xlu0 %v2511_v16 }
 0x99e   :  { %v7955_v20 = vpop.eup %7954 }
 0x99f   :  { %v2514_v22 = vsel %vm198_vm2, %v7955_v20, 0.0 }
 0x9a0   :  { %2515 = vadd.xlane.f32.xlu1 %v2514_v22  ;;  %v8063_v22 = vld [vmem:[%s9225_s0] sm:$0xff] }
 0x9a2   :  { %v7957_v24 = vpop.eup %7956 }
 0x9a3   :  { %v2517_v26 = vsel %vm198_vm2, %v7957_v24, 0.0 }
 0x9a4   :  { %2518 = vadd.xlane.f32.xlu0 %v2517_v26 }
 0x9b1   :  { %2680 = vrot.lane.b32.xlu1 %v8308_v18, %s8154_s18 }
 0x9b5   :  { %2756 = vrot.lane.b32.xlu1 %v8310_v19, %s8154_s18 }
 0x9b9   :  { %2838 = vrot.lane.b32.xlu1 %v8484_v31, %s8140_s24 }
 0x9ba   :  { %2604 = vrot.lane.b32.xlu0 %v8306_v17, %s8154_s18 }
 0x9bd   :  { %2854 = vrot.lane.b32.xlu1 %v2016_v45, %s8155_s19  ;;  %v7560_v45 = vpack.c.bf16 %v2897_v44, %v2896_v42 }
 0x9be   :  { %2836 = vrot.lane.b32.xlu0 %v8486_v34, %s8140_s24 }
 0x9c1   :  { %2842 = vrot.lane.b32.xlu1 %v8490_v38, %s8140_s24 }
 0x9c2   :  { %2852 = vrot.lane.b32.xlu0 %v8550_v43, %s8155_s19  ;;  %v7556_v43 = vpack.c.bf16 %v2895_v41, %v2894_v40 }
 0x9c5   :  { %2858 = vrot.lane.b32.xlu1 %v2168_v49, %s8155_s19 }
 0x9c6   :  { %2840 = vrot.lane.b32.xlu0 %v8488_v36, %s8140_s24 }
 0x9ca   :  { %2856 = vrot.lane.b32.xlu0 %v8552_v47, %s8155_s19 }
 0xa29   :  { %v2510_v17 = vpop.xlane.xlu1 %2509 }
 0xa2a   :  { %7958 = vrcp.f32 %v2510_v17  ;;  %v2513_v18 = vpop.xlane.xlu0 %2512 }
 0xa2b   :  { %7960 = vrcp.f32 %v2513_v18 }
 0xa2d   :  { %v2516_v19 = vpop.xlane.xlu1 %2515 }
 0xa2e   :  { %7962 = vrcp.f32 %v2516_v19 }
 0xa31   :  { %v2519_v31 = vpop.xlane.xlu0 %2518  ;;  %v2681_v34 = vpop.permute.xlu1 %2680 }
 0xa32   :  { %7964 = vrcp.f32 %v2519_v31 }
 0xa34   :  { %v7959_v38 = vpop.eup %7958 }
 0xa35   :  { %v7961_v27 = vpop.eup %7960  ;;  %v2605_v28 = vpop.permute.xlu0 %2604  ;;  %v2521_v29 = vmul.f32 %v7959_v38, %v7951_v14  ;;  %v8064_v38 = vld [vmem:[%s9225_s0 + $0x10] sm:$0xff] }
 0xa36   :  { %7215 = vmatpush3.msra.mxu0 %v2605_v28  ;;  %v2523_v30 = vmul.f32 %v7961_v27, %v7953_v13  ;;  %v2757_v33 = vpop.permute.xlu1 %2756 }
 0xa37   :  { %7212 = vmatmul.mubr.msk.f32.vlgmr.msra.gmra.mrb[30].mxu1 %vm198_vm2, %v2521_v29  ;;  %7224 = vmatprep.subr.mxu0 %v8142_v10  ;;  %v8065_v29 = vld [vmem:[%s9225_s0 + $0x18] sm:$0xff] }
 0xa38   :  { %v7963_v36 = vpop.eup %7962  ;;  %7220 = vmatpush3.msra.mxu1 %v2681_v34  ;;  %7217 = vmatmul.mubr.msk.f32.vlgmr.msra.gmra.mrb[30].mxu0 %vm198_vm2, %v2523_v30 }
 0xa39   :  { %7225 = vmatpush3.msra.mxu0 %v2757_v33  ;;  %7221 = vmatprep.mubr.msk.f32.mxu1 %vm8143_vm1, %v8142_v10  ;;  %v2525_v35 = vmul.f32 %v7963_v36, %v7955_v20  ;;  %v2837_v54 = vpop.permute.xlu0 %2836  ;;  %v8062_v20 = vld [vmem:[%s9225_s0 + $0x8] sm:$0xff] }
 0xa3a   :  { %7226 = vmatprep.mubr.msk.f32.mxu0 %vm8143_vm1, %v8142_v10  ;;  %7557 = vmatprep.subr.bf16.mxu1 %v7556_v43  ;;  %v2839_v55 = vpop.permute.xlu1 %2838  ;;  %v2880_v62 = vsel %vm198_vm2, %v8406_v21, %v2837_v54 }
 0xa3b   :  { %7222 = vmatmul.mubr.msk.f32.vlgmr.msra.gmra.mrb[32].mxu1 %vm198_vm2, %v2525_v35  ;;  %v2881_v63 = vsel %vm198_vm2, %v8408_v23, %v2839_v55 }
 0xa3c   :  { %v7965_v37 = vpop.eup %7964  ;;  %7559 = vmatpush3.bf16.msra.mxu1 %v7556_v43 }
 0xa3d   :  { %v2527_v39 = vmul.f32 %v7965_v37, %v7957_v24  ;;  %7561 = vmatprep.subr.bf16.mxu1 %v7560_v45  ;;  %v2853_v56 = vpop.permute.xlu0 %2852 }
 0xa3e   :  { %v2855_v57 = vpop.permute.xlu1 %2854  ;;  %v2885_v0 = vsel %vm2884_vm3, %v2880_v62, %v2853_v56  ;;  %v3075_v56 = vld [vmem:[%s9230_s5] sm:$0xff] }
 0xa3f   :  { %7227 = vmatmul.mubr.msk.f32.vlgmr.msra.gmra.mrb[32].mxu0 %vm198_vm2, %v2527_v39  ;;  %v2886_v2 = vsel %vm2884_vm3, %v2881_v63, %v2855_v57  ;;  %v3076_v57 = vld [vmem:[%s9230_s5 + $0x8] sm:$0xff]  ;;  %v3181_v62 = vld [vmem:[%s9231_s6] sm:$0xff] }
 0xa40   :  { %7278 = vmatprep.mubr.msk.f32.mxu0 %vm8143_vm1, %v8142_v10  ;;  %7563 = vmatpush3.bf16.msra.mxu1 %v7560_v45  ;;  %v3182_v63 = vld [vmem:[%s9231_s6 + $0x8] sm:$0xff] }
 0xa41   :  { %v2841_v58 = vpop.permute.xlu0 %2840 }
 0xa42   :  { %v2843_v59 = vpop.permute.xlu1 %2842  ;;  %v2882_v6 = vsel %vm198_vm2, %v8416_v32, %v2841_v58  ;;  %v6715_v32 = vld [vmem:[%s9237_s12] ss:$0 sm:$0xff]  ;;  %v7564_v58 = vpack.c.bf16 %v3076_v57, %v3075_v56 }
 0xa43   :  { %v2883_v8 = vsel %vm198_vm2, %v8410_v25, %v2843_v59  ;;  %v3077_v59 = vld [vmem:[%s9230_s5 + $0x10] sm:$0xff] }
 0xa44   :  { %7565 = vmatprep.subr.bf16.mxu1 %v7564_v58 }
 0xa45   :  { %v2857_v60 = vpop.permute.xlu0 %2856 }
 0xa46   :  { %v2859_v61 = vpop.permute.xlu1 %2858  ;;  %v2887_v21 = vsel %vm2884_vm3, %v2882_v6, %v2857_v60  ;;  %v3078_v60 = vld [vmem:[%s9230_s5 + $0x18] sm:$0xff] }
 0xa47   :  { %v2888_v9 = vsel %vm2884_vm3, %v2883_v8, %v2859_v61  ;;  %v7568_v61 = vpack.c.bf16 %v3078_v60, %v3077_v59 }
 0xb0a   :  { %v2600_v46 = vpop.f32.mrb[30].mxu1 }
 0xb0b   :  { %v7213_v47 = vpop.f32.mrb[31].mxu1  ;;  %2868 = vrot.lane.b32.xlu0 %v2600_v46, %s8156_s9  ;;  %v2676_v48 = vpop.f32.mrb[30].mxu0 }
 0xb0c   :  { %2870 = vrot.lane.b32.xlu1 %v2676_v48, %s8156_s9  ;;  %v7218_v49 = vpop.f32.mrb[31].mxu0 }
 0xb0e   :  { %v2752_v50 = vpop.f32.mrb[32].mxu1 }
 0xb0f   :  { %v7223_v51 = vpop.f32.mrb[33].mxu1  ;;  %2872 = vrot.lane.b32.xlu0 %v2752_v50, %s8156_s9 }
 0xb12   :  { %v2828_v52 = vpop.f32.mrb[32].mxu0 }
 0xb13   :  { %2874 = vrot.lane.b32.xlu1 %v2828_v52, %s8156_s9  ;;  %v7228_v53 = vpop.f32.mrb[33].mxu0 }
 0xb7d   :  { %v2869_v1 = vpop.permute.xlu0 %2868 }
 0xb7e   :  { %v2890_v3 = vsel %vm2889_vm4, %v2885_v0, %v2869_v1  ;;  %v2871_v4 = vpop.permute.xlu1 %2870  ;;  %v7572_v0 = vpack.c.bf16 %v3182_v63, %v3181_v62 }
 0xb7f   :  { %v2891_v5 = vsel %vm2889_vm4, %v2886_v2, %v2871_v4  ;;  %7237 = vmatprep.mubr.msk.f32.mxu1 %vm97_vm0, %v2890_v3 }
 0xb80   :  { %7238 = vmatmul.mubr.msk.f32.vlgmr.msra.gmra.mrb[34].mxu1 %vm97_vm0, %v2891_v5 }
 0xb81   :  { %v2873_v23 = vpop.permute.xlu0 %2872  ;;  %7567 = vmatpush3.bf16.msra.mxu1 %v7564_v58 }
 0xb82   :  { %v2892_v7 = vsel %vm2889_vm4, %v2887_v21, %v2873_v23  ;;  %7569 = vmatprep.subr.bf16.mxu1 %v7568_v61 }
 0xb83   :  { %7240 = vmatprep.mubr.msk.f32.mxu1 %vm97_vm0, %v2892_v7 }
 0xb85   :  { %v2875_v11 = vpop.permute.xlu1 %2874  ;;  %7571 = vmatpush3.bf16.msra.mxu1 %v7568_v61 }
 0xb86   :  { %v2893_v12 = vsel %vm2889_vm4, %v2888_v9, %v2875_v11  ;;  %7573 = vmatprep.subr.bf16.mxu1 %v7572_v0 }
 0xb87   :  { %7241 = vmatmul.mubr.msk.f32.gmra.mrb[36].mxu1 %vm97_vm0, %v2893_v12 }
 0xc53   :  { %v7239_v14 = vpop.f32.mrb[34].mxu1 }
 0xc54   :  { %v2987_v13 = vadd.f32 %v7239_v14, %v6715_v32  ;;  %v2981_v15 = vpop.f32.mrb[35].mxu1 }
 0xc55   :  { %v2982_v16 = vadd.f32 %v6715_v32, %v2981_v15 }
 0xc56   :  { %v3001_v25 = vadd.f32 %v8062_v20, %v2987_v13 }
 0xc57   :  { %v3000_v24 = vadd.f32 %v8063_v22, %v2982_v16  ;;  %v6721_v16 = vld [vmem:[%s9238_s13 + $0x1] ss:$0 sm:$0xff]  ;;  %v3183_v22 = vld [vmem:[%s9231_s6 + $0x10] sm:$0xff] }
 0xc58   :  { %v3009_v26 = vsel %vm97_vm0, %v3001_v25, 0.0 }
 0xc59   :  { %3010 = vadd.xlane.f32.xlu1 %v3009_v26  ;;  %v3006_v17 = vsel %vm97_vm0, %v3000_v24, 0.0 }
 0xc5a   :  { %v7242_v18 = vpop.f32.mrb[36].mxu1  ;;  %3007 = vadd.xlane.f32.xlu0 %v3006_v17 }
 0xc5b   :  { %v2991_v19 = vpop.f32.mrb[37].mxu1  ;;  %v2997_v31 = vadd.f32 %v7242_v18, %v6715_v32 }
 0xc5c   :  { %v2992_v34 = vadd.f32 %v6715_v32, %v2991_v19  ;;  %v6720_v32 = vld [vmem:[%s9238_s13] ss:$0 sm:$0xff] }
 0xc5d   :  { %v3003_v30 = vadd.f32 %v8065_v29, %v2997_v31 }
 0xc5e   :  { %v3002_v27 = vadd.f32 %v8064_v38, %v2992_v34 }
 0xc5f   :  { %v3015_v36 = vsel %vm97_vm0, %v3003_v30, 0.0 }
 0xc60   :  { %v3012_v28 = vsel %vm97_vm0, %v3002_v27, 0.0 }
 0xc61   :  { %3013 = vadd.xlane.f32.xlu0 %v3012_v28 }
 0xc65   :  { %3016 = vadd.xlane.f32.xlu0 %v3015_v36  ;;  %v80_v36 = vld [vmem:[%s9226_s1] sm:$0xff] }
 0xce6   :  { %v3011_v33 = vpop.xlane.xlu1 %3010 }
 0xce7   :  { %v3020_v35 = vmul.f32 0.03125, %v3011_v33  ;;  %v3008_v37 = vpop.xlane.xlu0 %3007  ;;  %v81_v33 = vld [vmem:[%s9226_s1 + $0x8] sm:$0xff] }
 0xce8   :  { %v3019_v39 = vmul.f32 0.03125, %v3008_v37  ;;  %v83_v37 = vld [vmem:[%s9226_s1 + $0x18] sm:$0xff] }
 0xce9   :  { %v3024_v40 = vsub.f32 %v3001_v25, %v3020_v35  ;;  %v82_v35 = vld [vmem:[%s9226_s1 + $0x10] sm:$0xff] }
 0xcea   :  { %v3023_v41 = vsub.f32 %v3000_v24, %v3019_v39  ;;  %v3184_v24 = vld [vmem:[%s9231_s6 + $0x18] sm:$0xff]  ;;  %v84_v39 = vld [vmem:[%s9226_s1 + $0x20] sm:$0xff] }
 0xceb   :  { %v3028_v42 = vmul.f32 %v3024_v40, %v3024_v40  ;;  %v7576_v18 = vpack.c.bf16 %v3184_v24, %v3183_v22 }
 0xcec   :  { %v3027_v43 = vmul.f32 %v3023_v41, %v3023_v41 }
 0xced   :  { %v3034_v44 = vsel %vm97_vm0, %v3028_v42, 0.0 }
 0xcee   :  { %v3014_v45 = vpop.xlane.xlu0 %3013  ;;  %3035 = vadd.xlane.f32.xlu0 %v3034_v44  ;;  %v3031_v46 = vsel %vm97_vm0, %v3027_v43, 0.0 }
 0xcef   :  { %v3021_v47 = vmul.f32 0.03125, %v3014_v45  ;;  %3032 = vadd.xlane.f32.xlu1 %v3031_v46  ;;  %v6727_v46 = vld [vmem:[%s9232_s7] ss:$0 sm:$0xff] }
 0xcf1   :  { %v3025_v48 = vsub.f32 %v3002_v27, %v3021_v47 }
 0xcf2   :  { %v3017_v49 = vpop.xlane.xlu0 %3016 }
 0xcf3   :  { %v3022_v50 = vmul.f32 0.03125, %v3017_v49  ;;  %v3029_v51 = vmul.f32 %v3025_v48, %v3025_v48 }
 0xcf5   :  { %v3026_v52 = vsub.f32 %v3003_v30, %v3022_v50  ;;  %v3037_v53 = vsel %vm97_vm0, %v3029_v51, 0.0  ;;  %v6722_v51 = vld [vmem:[%s9237_s12 + $0x1] ss:$0 sm:$0xff] }
 0xcf6   :  { %3038 = vadd.xlane.f32.xlu1 %v3037_v53 }
 0xcf7   :  { %v3030_v54 = vmul.f32 %v3026_v52, %v3026_v52 }
 0xcf9   :  { %v3040_v55 = vsel %vm97_vm0, %v3030_v54, 0.0 }
 0xcfa   :  { %3041 = vadd.xlane.f32.xlu0 %v3040_v55 }
 0xd7b   :  { %v3036_v1 = vpop.xlane.xlu0 %3035 }
 0xd7c   :  { %v3044_v2 = vmul.f32 0.03125, %v3036_v1  ;;  %v3033_v3 = vpop.xlane.xlu1 %3032 }
 0xd7d   :  { %v3043_v4 = vmul.f32 0.03125, %v3033_v3 }
 0xd7e   :  { %v3048_v5 = vadd.f32 1e-05, %v3044_v2 }
 0xd7f   :  { %v3047_v6 = vadd.f32 1e-05, %v3043_v4 }
 0xd80   :  { %7966 = vrsqrt.f32 %v3048_v5 }
 0xd81   :  { %7968 = vrsqrt.f32 %v3047_v6 }
 0xd83   :  { %v3039_v21 = vpop.xlane.xlu1 %3038 }
 0xd84   :  { %v3045_v23 = vmul.f32 0.03125, %v3039_v21 }
 0xd86   :  { %v3049_v7 = vadd.f32 1e-05, %v3045_v23 }
 0xd87   :  { %v3042_v8 = vpop.xlane.xlu0 %3041 }
 0xd88   :  { %7970 = vrsqrt.f32 %v3049_v7  ;;  %v3046_v9 = vmul.f32 0.03125, %v3042_v8 }
 0xd8a   :  { %v7967_v11 = vpop.eup %7966  ;;  %v3050_v12 = vadd.f32 1e-05, %v3046_v9 }
 0xd8b   :  { %v7969_v14 = vpop.eup %7968  ;;  %v3056_v13 = vmul.f32 %v7967_v11, %v3024_v40  ;;  %v85_v40 = vld [vmem:[%s9226_s1 + $0x28] sm:$0xff] }
 0xd8c   :  { %7972 = vrsqrt.f32 %v3050_v12  ;;  %v3055_v15 = vmul.f32 %v7969_v14, %v3023_v41  ;;  %v8157_v41 = vmov 0.0|0.0  }
 0xd8d   :  { %v3064_v20 = vmul.f32 %v6720_v32, %v3056_v13  ;;  %7580 = vmatprep.subr.bf16.mxu0 %v8157_v41 }
 0xd8e   :  { %v3063_v25 = vmul.f32 %v6720_v32, %v3055_v15 }
 0xd8f   :  { %v8687_v17 = vadd.f32 %v6721_v16, %v3064_v20 }
 0xd90   :  { %v8685_v26 = vadd.f32 %v6721_v16, %v3063_v25 }
 0xd92   :  { %v7971_v19 = vpop.eup %7970  ;;  %7251 = vmatprep.mubr.msk.f32.mxu1 %vm97_vm0, %v8685_v26 }
 0xd93   :  { %7252 = vmatmul.mubr.msk.f32.vlgmr.msra.gmra.mrb[38].mxu1 %vm97_vm0, %v8687_v17  ;;  %v3057_v31 = vmul.f32 %v7971_v19, %v3025_v48 }
 0xd94   :  { %7575 = vmatpush3.bf16.msra.mxu1 %v7572_v0 }
 0xd95   :  { %v3065_v34 = vmul.f32 %v6720_v32, %v3057_v31  ;;  %7577 = vmatprep.subr.bf16.mxu1 %v7576_v18 }
 0xd96   :  { %v7973_v38 = vpop.eup %7972 }
 0xd97   :  { %v8693_v27 = vadd.f32 %v6721_v16, %v3065_v34  ;;  %v3058_v28 = vmul.f32 %v7973_v38, %v3026_v52 }
 0xd98   :  { %7579 = vmatpush3.bf16.msra.mxu1 %v7576_v18 }
 0xd99   :  { %7254 = vmatprep.mubr.msk.f32.mxu1 %vm97_vm0, %v8693_v27  ;;  %v3066_v29 = vmul.f32 %v6720_v32, %v3058_v28  ;;  %7588 = vmatprep.subr.bf16.mxu1 %v8157_v41 }
 0xd9b   :  { %v8697_v30 = vadd.f32 %v6721_v16, %v3066_v29 }
 0xd9d   :  { %7255 = vmatmul.mubr.msk.f32.gmra.mrb[40].mxu1 %vm97_vm0, %v8697_v30 }
 0xd9e   :  { %7265 = vmatprep.mubr.msk.f32.mxu1 %vm97_vm0, %v80_v36 }
 0xda1   :  { %7266 = vmatmul.mubr.msk.f32.vlgmr.msra.gmra.mrb[42].mxu1 %vm97_vm0, %v81_v33 }
 0xda2   :  { %7268 = vmatprep.mubr.msk.f32.mxu1 %vm97_vm0, %v82_v35 }
 0xda5   :  { %7269 = vmatmul.mubr.msk.f32.gmra.mrb[44].mxu1 %vm97_vm0, %v83_v37 }
 0xda6   :  { %7271 = vmatprep.mubr.msk.f32.mxu1 %vm97_vm0, %v84_v39 }
 0xda9   :  { %7272 = vmatmul.mubr.msk.f32.gmra.mrb[46].mxu1 %vm97_vm0, %v85_v40 }
 0xdaa   :  { %7292 = vmatprep.mubr.msk.f32.mxu1 %vm8143_vm1, %v8142_v10 }
 0xe66   :  { %v7253_v42 = vpop.f32.mrb[38].mxu1 }
 0xe67   :  { %v3162_v43 = vpop.f32.mrb[39].mxu1  ;;  %v8770_v15 = vadd.f32 %v7253_v42, %v6722_v51 }
 0xe68   :  { %v8735_v59 = vadd.f32 %v6722_v51, %v3162_v43 }
 0xe70   :  { %v7256_v44 = vpop.f32.mrb[40].mxu1 }
 0xe71   :  { %v3172_v45 = vpop.f32.mrb[41].mxu1  ;;  %v8779_v16 = vadd.f32 %v7256_v44, %v6722_v51 }
 0xe72   :  { %v8763_v13 = vadd.f32 %v6722_v51, %v3172_v45 }
 0xe74   :  { %v7267_v47 = vpop.f32.mrb[42].mxu1 }
 0xe75   :  { %v3276_v48 = vpop.f32.mrb[43].mxu1  ;;  %v3282_v49 = vadd.f32 %v7267_v47, %v6727_v46 }
 0xe76   :  { %v3277_v50 = vadd.f32 %v6727_v46, %v3276_v48 }
 0xe77   :  { %v3312_v58 = vcombine.high %v3282_v49, %v3282_v49 }
 0xe78   :  { %v3311_v52 = vcombine.high %v3277_v50, %v3277_v50  ;;  %v7270_v53 = vpop.f32.mrb[44].mxu1 }
 0xe79   :  { %v3292_v54 = vadd.f32 %v7270_v53, %v6727_v46  ;;  %v3286_v55 = vpop.f32.mrb[45].mxu1 }
 0xe7a   :  { %v3317_v56 = vcombine.low %v3277_v50, %v3311_v52  ;;  %v3287_v57 = vadd.f32 %v6727_v46, %v3286_v55 }
 0xe7b   :  { %v3314_v60 = vcombine.high %v3292_v54, %v3292_v54 }
 0xe7c   :  { %v3313_v62 = vcombine.high %v3287_v57, %v3287_v57  ;;  %v3395_v63 = vcombine.low %v3312_v58, %v3287_v57  ;;  %v7273_v0 = vpop.f32.mrb[46].mxu1  ;;  %v7581_v1 = vpack.c.bf16 %v3282_v49, %v3317_v56  ;;  %v8743_v2 = vpack.i.bf16 %v3282_v49, %v3317_v56 }
 0xe7d   :  { %v3473_v3 = vcombine.low %v3292_v54, %v3314_v60  ;;  %v3302_v4 = vadd.f32 %v7273_v0, %v6727_v46  ;;  %v3296_v5 = vpop.f32.mrb[47].mxu1 }
 0xe7e   :  { %v3297_v6 = vadd.f32 %v6727_v46, %v3296_v5  ;;  %7583 = vmatpush3.bf16.xpose.msk.msra.mxu0 %vm8739_vm5, %v7581_v1  ;;  %v7585_v21 = vpack.c.bf16 %v3313_v62, %v3395_v63  ;;  %v8747_v23 = vpack.i.bf16 %v3313_v62, %v3395_v63 }
 0xe7f   :  { %v3316_v7 = vcombine.high %v3302_v4, %v3302_v4  ;;  %7584 = vmatprep.subr.bf16.mxu0 %v8157_v41 }
 0xe80   :  { %v3315_v8 = vcombine.high %v3297_v6, %v3297_v6  ;;  %v7589_v9 = vpack.c.bf16 %v3297_v6, %v3473_v3  ;;  %v8750_v11 = vpack.i.bf16 %v3297_v6, %v3473_v3 }
 0xe82   :  { %v3551_v12 = vcombine.low %v3315_v8, %v3302_v4  ;;  %7591 = vmatpush3.bf16.xpose.msk.msra.mxu1 %vm8739_vm5, %v7589_v9 }
 0xe83   :  { %7596 = vmatprep.subr.bf16.mxu1 %v8157_v41 }
 0xe84   :  { %v7593_v32 = vpack.c.bf16 %v3316_v7, %v3551_v12  ;;  %v8755_v14 = vpack.i.bf16 %v3316_v7, %v3551_v12 }
 0xe85   :  { %7279 = vmatmul.mubr.msk.f32.vlgmr.msra.gmra.mrb[34].mxu0 %vm198_vm2, %v8735_v59 }
 0xe86   :  { %7587 = vmatpush3.bf16.xpose.msk.msra.mxu0 %vm8739_vm5, %v7585_v21  ;;  %7285 = vmatprep.mubr.msk.f32.mxu0 %vm8143_vm1, %v8142_v10 }
 0xe87   :  { %7592 = vmatprep.subr.bf16.mxu0 %v8157_v41 }
 0xe89   :  { %7293 = vmatmul.mubr.msk.f32.vlgmr.msra.gmra.mrb[48].mxu1 %vm198_vm2, %v8763_v13 }
 0xe8a   :  { %7306 = vmatprep.mubr.msk.f32.mxu1 %vm8143_vm1, %v8142_v10 }
 0xe8d   :  { %7286 = vmatmul.mubr.msk.f32.vlgmr.msra.gmra.mrb[36].mxu0 %vm198_vm2, %v8770_v15 }
 0xe8e   :  { %7595 = vmatpush3.bf16.xpose.msk.msra.mxu0 %vm8739_vm5, %v7593_v32  ;;  %7299 = vmatprep.mubr.msk.f32.mxu0 %vm8143_vm1, %v8142_v10 }
 0xe8f   :  { %7604 = vmatprep.subr.bf16.mxu0 %v8157_v41 }
 0xe95   :  { %7300 = vmatmul.mubr.msk.f32.vlgmr.msra.gmra.mrb[38].mxu0 %vm198_vm2, %v8779_v16 }
 0xe96   :  { %7320 = vmatprep.mubr.msk.f32.mxu0 %vm8143_vm1, %v8142_v10 }
 0xf58   :  { %v3391_v20 = vpop.f32.mrb[34].mxu0 }
 0xf59   :  { %v7280_v25 = vpop.f32.mrb[35].mxu0  ;;  %v3630_v22 = vsel %vm3629_vm6, %v3391_v20, -inf }
 0xf5a   :  { %3631 = vmax.xlane.f32.xlu1 %v3630_v22 }
 0xf5c   :  { %v3547_v24 = vpop.f32.mrb[48].mxu1 }
 0xf5d   :  { %v7294_v18 = vpop.f32.mrb[49].mxu1  ;;  %v3636_v19 = vsel %vm3629_vm6, %v3547_v24, -inf }
 0xf5e   :  { %3637 = vmax.xlane.f32.xlu1 %v3636_v19 }
 0xf60   :  { %v3469_v31 = vpop.f32.mrb[36].mxu0 }
 0xf61   :  { %v7287_v34 = vpop.f32.mrb[37].mxu0  ;;  %v3633_v38 = vsel %vm3629_vm6, %v3469_v31, -inf }
 0xf62   :  { %3634 = vmax.xlane.f32.xlu0 %v3633_v38 }
 0xf68   :  { %v3625_v28 = vpop.f32.mrb[38].mxu0 }
 0xf69   :  { %v7301_v29 = vpop.f32.mrb[39].mxu0  ;;  %v3639_v36 = vsel %vm3629_vm6, %v3625_v28, -inf }
 0xf6a   :  { %3640 = vmax.xlane.f32.xlu0 %v3639_v36 }
 0xf6f   :  { %7763 = vrot.lane.b32.xlu1 %v8743_v2, %s8144_s25 }
 0xf73   :  { %7773 = vrot.lane.b32.xlu1 %v8750_v11, %s8144_s25 }
 0xf77   :  { %7778 = vrot.lane.b32.xlu1 %v8755_v14, %s8144_s25 }
 0xf80   :  { %7768 = vrot.lane.b32.xlu0 %v8747_v23, %s8144_s25 }
 0xfe7   :  { %v3632_v33 = vpop.xlane.xlu1 %3631 }
 0xfe8   :  { %v3642_v35 = vsub.f32 %v3391_v20, %v3632_v33 }
 0xfea   :  { %v3646_v37 = vmul.f32 1.442695, %v3642_v35 }
 0xfeb   :  { %v3638_v39 = vpop.xlane.xlu1 %3637 }
 0xfec   :  { %7974 = vpow2.f32 %v3646_v37  ;;  %v3644_v40 = vsub.f32 %v3547_v24, %v3638_v39 }
 0xfee   :  { %v3650_v42 = vmul.f32 1.442695, %v3644_v40 }
 0xfef   :  { %v3635_v43 = vpop.xlane.xlu0 %3634  ;;  %v7764_v44 = vpop.permute.xlu1 %7763 }
 0xff0   :  { %7976 = vpow2.f32 %v3650_v42  ;;  %v3643_v45 = vsub.f32 %v3469_v31, %v3635_v43  ;;  %v7766_v46 = vunpack.i.h.bf16 %v7764_v44  ;;  %v7765_v47 = vunpack.i.l.bf16 %v7764_v44 }
 0xff2   :  { %v3648_v49 = vmul.f32 1.442695, %v3643_v45  ;;  %v7597_v50 = vpack.c.bf16 %v7766_v46, %v7765_v47 }
 0xff3   :  { %v7774_v51 = vpop.permute.xlu1 %7773 }
 0xff4   :  { %7978 = vpow2.f32 %v3648_v49  ;;  %v7776_v52 = vunpack.i.h.bf16 %v7774_v51  ;;  %v7775_v53 = vunpack.i.l.bf16 %v7774_v51  ;;  %7599 = vmatpush3.bf16.msk.msra.mxu1 %vm8797_vm9, %v7597_v50 }
 0xff5   :  { %7600 = vmatprep.subr.bf16.mxu1 %v8157_v41 }
 0xff6   :  { %v7975_v54 = vpop.eup %7974  ;;  %v7605_v55 = vpack.c.bf16 %v7776_v52, %v7775_v53 }
 0xff7   :  { %v3654_v56 = vsel %vm3629_vm6, %v7975_v54, 0.0  ;;  %v3641_v63 = vpop.xlane.xlu0 %3640  ;;  %v7779_v5 = vpop.permute.xlu1 %7778 }
 0xff8   :  { %3655 = vadd.xlane.f32.xlu1 %v3654_v56  ;;  %7607 = vmatpush3.bf16.msk.msra.mxu0 %vm8797_vm9, %v7605_v55  ;;  %v3645_v0 = vsub.f32 %v3625_v28, %v3641_v63  ;;  %v7781_v38 = vunpack.i.h.bf16 %v7779_v5  ;;  %v7780_v28 = vunpack.i.l.bf16 %v7779_v5 }
 0xff9   :  { %7612 = vmatprep.subr.bf16.mxu0 %v8157_v41 }
 0xffa   :  { %v7977_v57 = vpop.eup %7976  ;;  %v3652_v1 = vmul.f32 1.442695, %v3645_v0  ;;  %v7609_v33 = vpack.c.bf16 %v7781_v38, %v7780_v28 }
 0xffb   :  { %v3660_v58 = vsel %vm3629_vm6, %v7977_v57, 0.0  ;;  %v7769_v21 = vpop.permute.xlu0 %7768 }
 0xffc   :  { %3661 = vadd.xlane.f32.xlu1 %v3660_v58  ;;  %7980 = vpow2.f32 %v3652_v1  ;;  %v7771_v9 = vunpack.i.h.bf16 %v7769_v21  ;;  %v7770_v12 = vunpack.i.l.bf16 %v7769_v21 }
 0xffe   :  { %v7979_v60 = vpop.eup %7978  ;;  %v7601_v22 = vpack.c.bf16 %v7771_v9, %v7770_v12 }
 0xfff   :  { %v3657_v62 = vsel %vm3629_vm6, %v7979_v60, 0.0 }
0x1000   :  { %3658 = vadd.xlane.f32.xlu0 %v3657_v62 }
0x1006   :  { %v7981_v3 = vpop.eup %7980 }
0x1007   :  { %v3663_v4 = vsel %vm3629_vm6, %v7981_v3, 0.0 }
0x100d   :  { %7788 = vrot.lane.b32.xlu1 %v8747_v23, %s8147_s27 }
0x1011   :  { %7793 = vrot.lane.b32.xlu1 %v8750_v11, %s8147_s27 }
0x1015   :  { %7798 = vrot.lane.b32.xlu1 %v8755_v14, %s8147_s27 }
0x1016   :  { %7783 = vrot.lane.b32.xlu0 %v8743_v2, %s8147_s27 }
0x1019   :  { %4241 = vrot.lane.b32.xlu1 %v8779_v16, %s8147_s27 }
0x1035   :  { %3664 = vadd.xlane.f32.xlu0 %v3663_v4 }
0x104b   :  { %3995 = vrot.lane.b32.xlu0 %v8735_v59, %s8147_s27 }
0x104f   :  { %4077 = vrot.lane.b32.xlu0 %v8770_v15, %s8147_s27 }
0x1053   :  { %4159 = vrot.lane.b32.xlu0 %v8763_v13, %s8147_s27  ;;  %s8159_s27 = smov [#allocation7]  }
0x1085   :  { %v3656_v6 = vpop.xlane.xlu1 %3655 }
0x1086   :  { %7982 = vrcp.f32 %v3656_v6 }
0x1089   :  { %v3662_v7 = vpop.xlane.xlu1 %3661 }
0x108a   :  { %7984 = vrcp.f32 %v3662_v7 }
0x108d   :  { %v3659_v8 = vpop.xlane.xlu0 %3658  ;;  %v7789_v35 = vpop.permute.xlu1 %7788 }
0x108e   :  { %7986 = vrcp.f32 %v3659_v8  ;;  %v7791_v46 = vunpack.i.h.bf16 %v7789_v35  ;;  %v7790_v47 = vunpack.i.l.bf16 %v7789_v35 }
0x1090   :  { %v7983_v32 = vpop.eup %7982  ;;  %v7617_v52 = vpack.c.bf16 %v7791_v46, %v7790_v47 }
0x1091   :  { %v3667_v20 = vmul.f32 %v7983_v32, %v7975_v54  ;;  %v7784_v25 = vpop.permute.xlu0 %7783  ;;  %v7794_v37 = vpop.permute.xlu1 %7793 }
0x1092   :  { %v7786_v24 = vunpack.i.h.bf16 %v7784_v25  ;;  %v7785_v18 = vunpack.i.l.bf16 %v7784_v25  ;;  %v7796_v39 = vunpack.i.h.bf16 %v7794_v37  ;;  %v7795_v40 = vunpack.i.l.bf16 %v7794_v37 }
0x1093   :  { %7307 = vmatmul.mubr.msk.f32.vlgmr.msra.gmra.mrb[50].mxu1 %vm3629_vm6, %v3667_v20 }
0x1094   :  { %v7985_v19 = vpop.eup %7984  ;;  %v7613_v31 = vpack.c.bf16 %v7786_v24, %v7785_v18  ;;  %7603 = vmatpush3.bf16.msk.msra.mxu1 %vm8797_vm9, %v7601_v22  ;;  %7313 = vmatprep.mubr.msk.f32.mxu1 %vm8143_vm1, %v8142_v10  ;;  %v7621_v43 = vpack.c.bf16 %v7796_v39, %v7795_v40 }
0x1095   :  { %v3671_v34 = vmul.f32 %v7985_v19, %v7977_v57  ;;  %7608 = vmatprep.subr.bf16.mxu1 %v8157_v41  ;;  %v7799_v53 = vpop.permute.xlu1 %7798 }
0x1096   :  { %v7801_v54 = vunpack.i.h.bf16 %v7799_v53  ;;  %v7800_v55 = vunpack.i.l.bf16 %v7799_v53 }
0x1097   :  { %7321 = vmatmul.mubr.msk.f32.vlgmr.msra.gmra.mrb[40].mxu0 %vm3629_vm6, %v3671_v34 }
0x1098   :  { %v7987_v29 = vpop.eup %7986  ;;  %7615 = vmatpush3.bf16.xpose.msk.msra.mxu0 %vm8739_vm5, %v7613_v31  ;;  %7334 = vmatprep.mubr.msk.f32.mxu0 %vm8143_vm1, %v8142_v10  ;;  %v7625_v56 = vpack.c.bf16 %v7801_v54, %v7800_v55 }
0x1099   :  { %v3669_v36 = vmul.f32 %v7987_v29, %v7979_v60  ;;  %7620 = vmatprep.subr.bf16.mxu0 %v8157_v41  ;;  %v4242_v57 = vpop.permute.xlu1 %4241 }
0x109b   :  { %7314 = vmatmul.mubr.msk.f32.vlgmr.msra.gmra.mrb[52].mxu1 %vm3629_vm6, %v3669_v36 }
0x109c   :  { %7611 = vmatpush3.bf16.msk.msra.mxu1 %vm8797_vm9, %v7609_v33  ;;  %7327 = vmatprep.mubr.msk.f32.mxu1 %vm8143_vm1, %v8142_v10 }
0x109d   :  { %7616 = vmatprep.subr.bf16.mxu1 %v8157_v41 }
0x10c2   :  { %v3665_v42 = vpop.xlane.xlu0 %3664 }
0x10c3   :  { %7988 = vrcp.f32 %v3665_v42 }
0x10c6   :  { %v3996_v44 = vpop.permute.xlu0 %3995 }
0x10c7   :  { %7335 = vmatmul.mubr.msk.f32.vlgmr.msra.gmra.mrb[42].mxu0 %vm198_vm2, %v3996_v44 }
0x10c8   :  { %7623 = vmatpush3.bf16.xpose.msk.msra.mxu0 %vm8739_vm5, %v7621_v43  ;;  %7348 = vmatprep.mubr.msk.f32.mxu0 %vm8143_vm1, %v8142_v10 }
0x10c9   :  { %7628 = vmatprep.subr.bf16.mxu0 %v8157_v41 }
0x10ca   :  { %v4078_v45 = vpop.permute.xlu0 %4077 }
0x10cd   :  { %v7989_v49 = vpop.eup %7988 }
0x10ce   :  { %v3673_v50 = vmul.f32 %v7989_v49, %v7981_v3  ;;  %v4160_v51 = vpop.permute.xlu0 %4159 }
0x10cf   :  { %7349 = vmatmul.mubr.msk.f32.vlgmr.msra.gmra.mrb[44].mxu0 %vm198_vm2, %v4160_v51 }
0x10d0   :  { %7328 = vmatmul.mubr.msk.f32.vlgmr.msra.gmra.mrb[54].mxu1 %vm3629_vm6, %v3673_v50  ;;  %7362 = vmatprep.mubr.msk.f32.mxu0 %vm8143_vm1, %v8142_v10 }
0x10d1   :  { %7619 = vmatpush3.bf16.xpose.msk.msra.mxu1 %vm8739_vm5, %v7617_v52  ;;  %7341 = vmatprep.mubr.msk.f32.mxu1 %vm8143_vm1, %v8142_v10 }
0x10d2   :  { %7624 = vmatprep.subr.bf16.mxu1 %v8157_v41 }
0x10d8   :  { %7342 = vmatmul.mubr.msk.f32.vlgmr.msra.gmra.mrb[56].mxu1 %vm198_vm2, %v4078_v45 }
0x10d9   :  { %7627 = vmatpush3.bf16.xpose.msk.msra.mxu1 %vm8739_vm5, %v7625_v56  ;;  %7355 = vmatprep.mubr.msk.f32.mxu1 %vm8143_vm1, %v8142_v10 }
0x10da   :  { %7632 = vmatprep.subr.bf16.mxu1 %v8157_v41 }
0x10e0   :  { %7356 = vmatmul.mubr.msk.f32.vlgmr.msra.gmra.mrb[58].mxu1 %vm198_vm2, %v4242_v57 }
0x10e1   :  { %7369 = vmatprep.mubr.msk.f32.mxu1 %vm8143_vm1, %v8142_v10 }
0x1166   :  { %v8869_v58 = vpop.f32.mrb[50].mxu1 }
0x1167   :  { %v7308_v60 = vpop.f32.mrb[51].mxu1 }
0x116a   :  { %v8871_v62 = vpop.f32.mrb[40].mxu0 }
0x116b   :  { %v7322_v63 = vpop.f32.mrb[41].mxu0 }
0x116e   :  { %v8873_v0 = vpop.f32.mrb[52].mxu1 }
0x116f   :  { %v7315_v1 = vpop.f32.mrb[53].mxu1 }
0x119a   :  { %v4073_v3 = vpop.f32.mrb[42].mxu0 }
0x119b   :  { %v7336_v4 = vpop.f32.mrb[43].mxu0  ;;  %v4323_v5 = vsel %vm3629_vm6, %v4073_v3, -inf }
0x119c   :  { %4324 = vmax.xlane.f32.xlu0 %v4323_v5 }
0x11a2   :  { %v4237_v6 = vpop.f32.mrb[44].mxu0 }
0x11a3   :  { %v8876_v21 = vpop.f32.mrb[54].mxu1  ;;  %v7350_v7 = vpop.f32.mrb[45].mxu0  ;;  %v4329_v8 = vsel %vm3629_vm6, %v4237_v6, -inf }
0x11a4   :  { %4330 = vmax.xlane.f32.xlu0 %v4329_v8  ;;  %v7329_v9 = vpop.f32.mrb[55].mxu1 }
0x11ab   :  { %v4155_v12 = vpop.f32.mrb[56].mxu1 }
0x11ac   :  { %v7343_v32 = vpop.f32.mrb[57].mxu1  ;;  %v4326_v20 = vsel %vm3629_vm6, %v4155_v12, -inf }
0x11ad   :  { %4327 = vmax.xlane.f32.xlu1 %v4326_v20 }
0x11b3   :  { %v4319_v25 = vpop.f32.mrb[58].mxu1 }
0x11b4   :  { %v7357_v22 = vpop.f32.mrb[59].mxu1  ;;  %v4332_v24 = vsel %vm3629_vm6, %v4319_v25, -inf }
0x11b5   :  { %4333 = vmax.xlane.f32.xlu0 %v4332_v24 }
0x11be   :  { %7803 = vrot.lane.b32.xlu1 %v8743_v2, %s8146_s26 }
0x11c2   :  { %7813 = vrot.lane.b32.xlu1 %v8750_v11, %s8146_s26 }
0x11c6   :  { %7818 = vrot.lane.b32.xlu1 %v8755_v14, %s8146_s26 }
0x11cb   :  { %7808 = vrot.lane.b32.xlu0 %v8747_v23, %s8146_s26 }
0x1229   :  { %v4325_v18 = vpop.xlane.xlu0 %4324 }
0x122a   :  { %v4335_v19 = vsub.f32 %v4073_v3, %v4325_v18 }
0x122c   :  { %v4339_v31 = vmul.f32 1.442695, %v4335_v19 }
0x122e   :  { %7990 = vpow2.f32 %v4339_v31 }
0x1231   :  { %v4331_v34 = vpop.xlane.xlu0 %4330 }
0x1232   :  { %v4337_v38 = vsub.f32 %v4237_v6, %v4331_v34 }
0x1234   :  { %v4343_v28 = vmul.f32 1.442695, %v4337_v38 }
0x1236   :  { %7992 = vpow2.f32 %v4343_v28 }
0x1238   :  { %v7991_v29 = vpop.eup %7990 }
0x1239   :  { %v4347_v36 = vsel %vm3629_vm6, %v7991_v29, 0.0 }
0x123a   :  { %v4328_v33 = vpop.xlane.xlu1 %4327  ;;  %4348 = vadd.xlane.f32.xlu1 %v4347_v36 }
0x123b   :  { %v4336_v35 = vsub.f32 %v4155_v12, %v4328_v33 }
0x123d   :  { %v4341_v37 = vmul.f32 1.442695, %v4336_v35 }
0x123e   :  { %v7804_v39 = vpop.permute.xlu1 %7803 }
0x123f   :  { %7994 = vpow2.f32 %v4341_v37  ;;  %v7806_v40 = vunpack.i.h.bf16 %v7804_v39  ;;  %v7805_v42 = vunpack.i.l.bf16 %v7804_v39 }
0x1240   :  { %v7993_v43 = vpop.eup %7992 }
0x1241   :  { %v7629_v44 = vpack.c.bf16 %v7806_v40, %v7805_v42  ;;  %v4353_v45 = vsel %vm3629_vm6, %v7993_v43, 0.0 }
0x1242   :  { %v4334_v46 = vpop.xlane.xlu0 %4333  ;;  %4354 = vadd.xlane.f32.xlu1 %v4353_v45  ;;  %v7814_v60 = vpop.permute.xlu1 %7813 }
0x1243   :  { %7631 = vmatpush3.bf16.msk.msra.mxu0 %vm8797_vm9, %v7629_v44  ;;  %v4338_v54 = vsub.f32 %v4319_v25, %v4334_v46  ;;  %v7816_v4 = vunpack.i.h.bf16 %v7814_v60  ;;  %v7815_v5 = vunpack.i.l.bf16 %v7814_v60 }
0x1244   :  { %7636 = vmatprep.subr.bf16.mxu0 %v8157_v41 }
0x1245   :  { %v4345_v55 = vmul.f32 1.442695, %v4338_v54  ;;  %v7637_v8 = vpack.c.bf16 %v7816_v4, %v7815_v5 }
0x1246   :  { %v7809_v47 = vpop.permute.xlu0 %7808  ;;  %v7819_v63 = vpop.permute.xlu1 %7818 }
0x1247   :  { %v7811_v49 = vunpack.i.h.bf16 %v7809_v47  ;;  %v7810_v50 = vunpack.i.l.bf16 %v7809_v47  ;;  %7996 = vpow2.f32 %v4345_v55  ;;  %v7821_v18 = vunpack.i.h.bf16 %v7819_v63 }
0x1248   :  { %v7820_v19 = vunpack.i.l.bf16 %v7819_v63 }
0x1249   :  { %v7995_v51 = vpop.eup %7994  ;;  %v7633_v52 = vpack.c.bf16 %v7811_v49, %v7810_v50 }
0x124a   :  { %v4350_v53 = vsel %vm3629_vm6, %v7995_v51, 0.0  ;;  %v7641_v38 = vpack.c.bf16 %v7821_v18, %v7820_v19 }
0x124b   :  { %4351 = vadd.xlane.f32.xlu0 %v4350_v53  ;;  %7635 = vmatpush3.bf16.msk.msra.mxu1 %vm8797_vm9, %v7633_v52 }
0x124c   :  { %7640 = vmatprep.subr.bf16.mxu1 %v8157_v41 }
0x1251   :  { %v7997_v56 = vpop.eup %7996 }
0x1252   :  { %v4356_v57 = vsel %vm3629_vm6, %v7997_v56, 0.0 }
0x1253   :  { %7828 = vrot.lane.b32.xlu1 %v8747_v23, %s8150_s16 }
0x1257   :  { %7833 = vrot.lane.b32.xlu1 %v8750_v11, %s8150_s16 }
0x125b   :  { %7838 = vrot.lane.b32.xlu1 %v8755_v14, %s8150_s16 }
0x125f   :  { %4933 = vrot.lane.b32.xlu1 %v8779_v16, %s8150_s16 }
0x1261   :  { %7823 = vrot.lane.b32.xlu0 %v8743_v2, %s8150_s16 }
0x1280   :  { %4357 = vadd.xlane.f32.xlu0 %v4356_v57 }
0x1296   :  { %4687 = vrot.lane.b32.xlu0 %v8735_v59, %s8150_s16 }
0x129a   :  { %4769 = vrot.lane.b32.xlu0 %v8770_v15, %s8150_s16 }
0x129e   :  { %4851 = vrot.lane.b32.xlu0 %v8763_v13, %s8150_s16 }
0x12c7   :  { %v4349_v1 = vpop.xlane.xlu1 %4348 }
0x12c8   :  { %7998 = vrcp.f32 %v4349_v1 }
0x12cf   :  { %v4355_v3 = vpop.xlane.xlu1 %4354 }
0x12d0   :  { %8000 = vrcp.f32 %v4355_v3 }
0x12d2   :  { %v7999_v6 = vpop.eup %7998 }
0x12d3   :  { %v4360_v7 = vmul.f32 %v7999_v6, %v7991_v29  ;;  %v7829_v28 = vpop.permute.xlu1 %7828 }
0x12d4   :  { %v7831_v42 = vunpack.i.h.bf16 %v7829_v28 }
0x12d5   :  { %7363 = vmatmul.mubr.msk.f32.vlgmr.msra.gmra.mrb[46].mxu0 %vm3629_vm6, %v4360_v7 }
0x12d6   :  { %7639 = vmatpush3.bf16.msk.msra.mxu0 %vm8797_vm9, %v7637_v8  ;;  %7376 = vmatprep.mubr.msk.f32.mxu0 %vm8143_vm1, %v8142_v10 }
0x12d7   :  { %7644 = vmatprep.subr.bf16.mxu0 %v8157_v41  ;;  %v7834_v29 = vpop.permute.xlu1 %7833 }
0x12d8   :  { %v4352_v9 = vpop.xlane.xlu0 %4351  ;;  %v7836_v36 = vunpack.i.h.bf16 %v7834_v29  ;;  %v7835_v33 = vunpack.i.l.bf16 %v7834_v29 }
0x12d9   :  { %8002 = vrcp.f32 %v4352_v9 }
0x12da   :  { %v8001_v12 = vpop.eup %8000  ;;  %v7653_v37 = vpack.c.bf16 %v7836_v36, %v7835_v33 }
0x12db   :  { %v4364_v32 = vmul.f32 %v8001_v12, %v7993_v43  ;;  %v7830_v43 = vunpack.i.l.bf16 %v7829_v28  ;;  %v7839_v49 = vpop.permute.xlu1 %7838 }
0x12dc   :  { %v7824_v20 = vpop.permute.xlu0 %7823  ;;  %v7841_v50 = vunpack.i.h.bf16 %v7839_v49 }
0x12dd   :  { %v7826_v25 = vunpack.i.h.bf16 %v7824_v20  ;;  %v7825_v22 = vunpack.i.l.bf16 %v7824_v20  ;;  %7377 = vmatmul.mubr.msk.f32.vlgmr.msra.gmra.mrb[48].mxu0 %vm3629_vm6, %v4364_v32  ;;  %v7649_v47 = vpack.c.bf16 %v7831_v42, %v7830_v43 }
0x12de   :  { %7390 = vmatprep.mubr.msk.f32.mxu0 %vm8143_vm1, %v8142_v10 }
0x12df   :  { %v7645_v24 = vpack.c.bf16 %v7826_v25, %v7825_v22  ;;  %v4934_v53 = vpop.permute.xlu1 %4933 }
0x12e1   :  { %7647 = vmatpush3.bf16.xpose.msk.msra.mxu0 %vm8739_vm5, %v7645_v24 }
0x12e2   :  { %7652 = vmatprep.subr.bf16.mxu0 %v8157_v41 }
0x12e3   :  { %v8003_v31 = vpop.eup %8002 }
0x12e4   :  { %v4362_v34 = vmul.f32 %v8003_v31, %v7995_v51  ;;  %v7840_v51 = vunpack.i.l.bf16 %v7839_v49 }
0x12e6   :  { %7370 = vmatmul.mubr.msk.f32.vlgmr.msra.gmra.mrb[60].mxu1 %vm3629_vm6, %v4362_v34  ;;  %v7657_v52 = vpack.c.bf16 %v7841_v50, %v7840_v51 }
0x12e7   :  { %7643 = vmatpush3.bf16.msk.msra.mxu1 %vm8797_vm9, %v7641_v38  ;;  %7383 = vmatprep.mubr.msk.f32.mxu1 %vm8143_vm1, %v8142_v10 }
0x12e8   :  { %7648 = vmatprep.subr.bf16.mxu1 %v8157_v41 }
0x130d   :  { %v4358_v35 = vpop.xlane.xlu0 %4357 }
0x130e   :  { %8004 = vrcp.f32 %v4358_v35 }
0x1311   :  { %v4688_v39 = vpop.permute.xlu0 %4687 }
0x1312   :  { %7391 = vmatmul.mubr.msk.f32.vlgmr.msra.gmra.mrb[50].mxu0 %vm198_vm2, %v4688_v39 }
0x1313   :  { %7655 = vmatpush3.bf16.xpose.msk.msra.mxu0 %vm8739_vm5, %v7653_v37  ;;  %7404 = vmatprep.mubr.msk.f32.mxu0 %vm8143_vm1, %v8142_v10 }
0x1314   :  { %7660 = vmatprep.subr.bf16.mxu0 %v8157_v41 }
0x1315   :  { %v4770_v40 = vpop.permute.xlu0 %4769 }
0x1318   :  { %v8005_v44 = vpop.eup %8004 }
0x1319   :  { %v4366_v45 = vmul.f32 %v8005_v44, %v7997_v56  ;;  %v4852_v46 = vpop.permute.xlu0 %4851 }
0x131a   :  { %7405 = vmatmul.mubr.msk.f32.vlgmr.msra.gmra.mrb[52].mxu0 %vm198_vm2, %v4852_v46 }
0x131b   :  { %7384 = vmatmul.mubr.msk.f32.vlgmr.msra.gmra.mrb[62].mxu1 %vm3629_vm6, %v4366_v45  ;;  %7418 = vmatprep.mubr.msk.f32.mxu0 %vm8143_vm1, %v8142_v10 }
0x131c   :  { %7651 = vmatpush3.bf16.xpose.msk.msra.mxu1 %vm8739_vm5, %v7649_v47  ;;  %7397 = vmatprep.mubr.msk.f32.mxu1 %vm8143_vm1, %v8142_v10 }
0x131d   :  { %7656 = vmatprep.subr.bf16.mxu1 %v8157_v41 }
0x1323   :  { %7398 = vmatmul.mubr.msk.f32.vlgmr.msra.gmra.mrb[64].mxu1 %vm198_vm2, %v4770_v40 }
0x1324   :  { %7659 = vmatpush3.bf16.xpose.msk.msra.mxu1 %vm8739_vm5, %v7657_v52  ;;  %7411 = vmatprep.mubr.msk.f32.mxu1 %vm8143_vm1, %v8142_v10 }
0x1325   :  { %7664 = vmatprep.subr.bf16.mxu1 %v8157_v41 }
0x132b   :  { %7412 = vmatmul.mubr.msk.f32.vlgmr.msra.gmra.mrb[66].mxu1 %vm198_vm2, %v4934_v53 }
0x132c   :  { %7425 = vmatprep.mubr.msk.f32.mxu1 %vm8143_vm1, %v8142_v10 }
0x13a8   :  { %v8957_v54 = vpop.f32.mrb[46].mxu0 }
0x13a9   :  { %v7364_v55 = vpop.f32.mrb[47].mxu0 }
0x13b0   :  { %v8959_v56 = vpop.f32.mrb[48].mxu0 }
0x13b1   :  { %v7378_v57 = vpop.f32.mrb[49].mxu0 }
0x13b9   :  { %v8961_v60 = vpop.f32.mrb[60].mxu1 }
0x13ba   :  { %v7371_v63 = vpop.f32.mrb[61].mxu1 }
0x13e5   :  { %v4765_v1 = vpop.f32.mrb[50].mxu0 }
0x13e6   :  { %v7392_v3 = vpop.f32.mrb[51].mxu0  ;;  %v5015_v4 = vsel %vm3629_vm6, %v4765_v1, -inf }
0x13e7   :  { %5016 = vmax.xlane.f32.xlu0 %v5015_v4 }
0x13ed   :  { %v4929_v5 = vpop.f32.mrb[52].mxu0 }
0x13ee   :  { %v8964_v6 = vpop.f32.mrb[62].mxu1  ;;  %v7406_v7 = vpop.f32.mrb[53].mxu0  ;;  %v5021_v8 = vsel %vm3629_vm6, %v4929_v5, -inf }
0x13ef   :  { %5022 = vmax.xlane.f32.xlu0 %v5021_v8  ;;  %v7385_v9 = vpop.f32.mrb[63].mxu1 }
0x13f6   :  { %v4847_v12 = vpop.f32.mrb[64].mxu1 }
0x13f7   :  { %v7399_v32 = vpop.f32.mrb[65].mxu1  ;;  %v5018_v20 = vsel %vm3629_vm6, %v4847_v12, -inf }
0x13f8   :  { %5019 = vmax.xlane.f32.xlu1 %v5018_v20 }
0x13fe   :  { %v5011_v25 = vpop.f32.mrb[66].mxu1 }
0x13ff   :  { %v7413_v22 = vpop.f32.mrb[67].mxu1  ;;  %v5024_v24 = vsel %vm3629_vm6, %v5011_v25, -inf }
0x1400   :  { %5025 = vmax.xlane.f32.xlu0 %v5024_v24 }
0x1409   :  { %7843 = vrot.lane.b32.xlu1 %v8743_v2, %s8149_s15 }
0x140d   :  { %7853 = vrot.lane.b32.xlu1 %v8750_v11, %s8149_s15 }
0x1411   :  { %7858 = vrot.lane.b32.xlu1 %v8755_v14, %s8149_s15 }
0x1416   :  { %7848 = vrot.lane.b32.xlu0 %v8747_v23, %s8149_s15  ;;  %s6649_s15 = sshll.u32 %s8159_s27, 4  ;;  %s6650_s15 = int_to_ptr.vmem [resolvable:$true] %s6649_s15 }
0x1417   :  { %p8115_p3 = scmp.lt.s32.totalorder %s6650_s15, %s6650_s15 }
0x1474   :  { %v5017_v18 = vpop.xlane.xlu0 %5016 }
0x1475   :  { %v5027_v19 = vsub.f32 %v4765_v1, %v5017_v18 }
0x1477   :  { %v5031_v31 = vmul.f32 1.442695, %v5027_v19 }
0x1479   :  { %8006 = vpow2.f32 %v5031_v31 }
0x147c   :  { %v5023_v34 = vpop.xlane.xlu0 %5022 }
0x147d   :  { %v5029_v38 = vsub.f32 %v4929_v5, %v5023_v34 }
0x147f   :  { %v5035_v28 = vmul.f32 1.442695, %v5029_v38 }
0x1481   :  { %8008 = vpow2.f32 %v5035_v28 }
0x1483   :  { %v8007_v29 = vpop.eup %8006 }
0x1484   :  { %v5039_v36 = vsel %vm3629_vm6, %v8007_v29, 0.0 }
0x1485   :  { %v5020_v33 = vpop.xlane.xlu1 %5019  ;;  %5040 = vadd.xlane.f32.xlu1 %v5039_v36 }
0x1486   :  { %v5028_v35 = vsub.f32 %v4847_v12, %v5020_v33 }
0x1488   :  { %v5033_v37 = vmul.f32 1.442695, %v5028_v35 }
0x1489   :  { %v7844_v39 = vpop.permute.xlu1 %7843 }
0x148a   :  { %8010 = vpow2.f32 %v5033_v37  ;;  %v7846_v40 = vunpack.i.h.bf16 %v7844_v39  ;;  %v7845_v42 = vunpack.i.l.bf16 %v7844_v39 }
0x148b   :  { %v8009_v43 = vpop.eup %8008 }
0x148c   :  { %v7661_v44 = vpack.c.bf16 %v7846_v40, %v7845_v42  ;;  %v5045_v45 = vsel %vm3629_vm6, %v8009_v43, 0.0 }
0x148d   :  { %v5026_v46 = vpop.xlane.xlu0 %5025  ;;  %5046 = vadd.xlane.f32.xlu1 %v5045_v45 }
0x148e   :  { %7663 = vmatpush3.bf16.msk.msra.mxu0 %vm8797_vm9, %v7661_v44  ;;  %v5030_v55 = vsub.f32 %v5011_v25, %v5026_v46 }
0x148f   :  { %7668 = vmatprep.subr.bf16.mxu0 %v8157_v41 }
0x1490   :  { %v5037_v57 = vmul.f32 1.442695, %v5030_v55 }
0x1491   :  { %v7849_v47 = vpop.permute.xlu0 %7848 }
0x1492   :  { %v7851_v49 = vunpack.i.h.bf16 %v7849_v47  ;;  %v7850_v50 = vunpack.i.l.bf16 %v7849_v47  ;;  %8012 = vpow2.f32 %v5037_v57 }
0x1494   :  { %v8011_v51 = vpop.eup %8010  ;;  %v7665_v52 = vpack.c.bf16 %v7851_v49, %v7850_v50 }
0x1495   :  { %v5042_v53 = vsel %vm3629_vm6, %v8011_v51, 0.0 }
0x1496   :  { %5043 = vadd.xlane.f32.xlu0 %v5042_v53  ;;  %7667 = vmatpush3.bf16.msk.msra.mxu1 %vm8797_vm9, %v7665_v52 }
0x1497   :  { %7672 = vmatprep.subr.bf16.mxu1 %v8157_v41 }
0x149c   :  { %v8013_v63 = vpop.eup %8012 }
0x149d   :  { %v5048_v1 = vsel %vm3629_vm6, %v8013_v63, 0.0 }
0x149e   :  { %7868 = vrot.lane.b32.xlu1 %v8747_v23, %s8153_s17 }
0x14a2   :  { %7878 = vrot.lane.b32.xlu1 %v8755_v14, %s8153_s17 }
0x14a6   :  { %5461 = vrot.lane.b32.xlu1 %v8770_v15, %s8153_s17  ;;  %v7854_v15 = vpop.permute.xlu1 %7853 }
0x14a7   :  { %v7856_v5 = vunpack.i.h.bf16 %v7854_v15  ;;  %v7855_v7 = vunpack.i.l.bf16 %v7854_v15 }
0x14a9   :  { %v7669_v12 = vpack.c.bf16 %v7856_v5, %v7855_v7 }
0x14aa   :  { %5625 = vrot.lane.b32.xlu1 %v8779_v16, %s8153_s17  ;;  %v7859_v16 = vpop.permute.xlu1 %7858 }
0x14ab   :  { %v7861_v18 = vunpack.i.h.bf16 %v7859_v16  ;;  %v7860_v19 = vunpack.i.l.bf16 %v7859_v16 }
0x14ac   :  { %7863 = vrot.lane.b32.xlu0 %v8743_v2, %s8153_s17 }
0x14ad   :  { %v7673_v38 = vpack.c.bf16 %v7861_v18, %v7860_v19 }
0x14cb   :  { %5049 = vadd.xlane.f32.xlu0 %v5048_v1 }
0x14e1   :  { %7873 = vrot.lane.b32.xlu0 %v8750_v11, %s8153_s17 }
0x14e5   :  { %5379 = vrot.lane.b32.xlu0 %v8735_v59, %s8153_s17 }
0x14e9   :  { %5543 = vrot.lane.b32.xlu0 %v8763_v13, %s8153_s17 }
0x1512   :  { %v5041_v3 = vpop.xlane.xlu1 %5040 }
0x1513   :  { %8014 = vrcp.f32 %v5041_v3 }
0x151a   :  { %v5047_v4 = vpop.xlane.xlu1 %5046 }
0x151b   :  { %8016 = vrcp.f32 %v5047_v4 }
0x151d   :  { %v8015_v8 = vpop.eup %8014 }
0x151e   :  { %v5052_v9 = vmul.f32 %v8015_v8, %v8007_v29  ;;  %v7869_v35 = vpop.permute.xlu1 %7868 }
0x151f   :  { %v7871_v40 = vunpack.i.h.bf16 %v7869_v35  ;;  %v7870_v42 = vunpack.i.l.bf16 %v7869_v35 }
0x1520   :  { %7419 = vmatmul.mubr.msk.f32.vlgmr.msra.gmra.mrb[54].mxu0 %vm3629_vm6, %v5052_v9 }
0x1521   :  { %7671 = vmatpush3.bf16.msk.msra.mxu0 %vm8797_vm9, %v7669_v12  ;;  %7432 = vmatprep.mubr.msk.f32.mxu0 %vm8143_vm1, %v8142_v10  ;;  %v7681_v45 = vpack.c.bf16 %v7871_v40, %v7870_v42 }
0x1522   :  { %7676 = vmatprep.subr.bf16.mxu0 %v8157_v41  ;;  %v7879_v46 = vpop.permute.xlu1 %7878 }
0x1523   :  { %v5044_v59 = vpop.xlane.xlu0 %5043  ;;  %v7881_v49 = vunpack.i.h.bf16 %v7879_v46  ;;  %v7880_v50 = vunpack.i.l.bf16 %v7879_v46 }
0x1524   :  { %8018 = vrcp.f32 %v5044_v59 }
0x1525   :  { %v8017_v13 = vpop.eup %8016 }
0x1526   :  { %v5056_v32 = vmul.f32 %v8017_v13, %v8009_v43  ;;  %v5462_v52 = vpop.permute.xlu1 %5461 }
0x1527   :  { %v7864_v20 = vpop.permute.xlu0 %7863 }
0x1528   :  { %v7866_v25 = vunpack.i.h.bf16 %v7864_v20  ;;  %v7865_v22 = vunpack.i.l.bf16 %v7864_v20  ;;  %7433 = vmatmul.mubr.msk.f32.vlgmr.msra.gmra.mrb[56].mxu0 %vm3629_vm6, %v5056_v32 }
0x1529   :  { %7446 = vmatprep.mubr.msk.f32.mxu0 %vm8143_vm1, %v8142_v10 }
0x152a   :  { %v7677_v24 = vpack.c.bf16 %v7866_v25, %v7865_v22  ;;  %v5626_v53 = vpop.permute.xlu1 %5625 }
0x152c   :  { %7679 = vmatpush3.bf16.xpose.msk.msra.mxu0 %vm8739_vm5, %v7677_v24 }
0x152d   :  { %7684 = vmatprep.subr.bf16.mxu0 %v8157_v41 }
0x152e   :  { %v8019_v31 = vpop.eup %8018 }
0x152f   :  { %v5054_v34 = vmul.f32 %v8019_v31, %v8011_v51  ;;  %v7689_v51 = vpack.c.bf16 %v7881_v49, %v7880_v50 }
0x1531   :  { %7426 = vmatmul.mubr.msk.f32.vlgmr.msra.gmra.mrb[68].mxu1 %vm3629_vm6, %v5054_v34 }
0x1532   :  { %7675 = vmatpush3.bf16.msk.msra.mxu1 %vm8797_vm9, %v7673_v38  ;;  %7439 = vmatprep.mubr.msk.f32.mxu1 %vm8143_vm1, %v8142_v10 }
0x1533   :  { %7680 = vmatprep.subr.bf16.mxu1 %v8157_v41 }
0x1558   :  { %v5050_v28 = vpop.xlane.xlu0 %5049 }
0x1559   :  { %8020 = vrcp.f32 %v5050_v28 }
0x155c   :  { %v7874_v29 = vpop.permute.xlu0 %7873 }
0x155d   :  { %v7876_v36 = vunpack.i.h.bf16 %v7874_v29  ;;  %v7875_v33 = vunpack.i.l.bf16 %v7874_v29 }
0x155f   :  { %v7685_v37 = vpack.c.bf16 %v7876_v36, %v7875_v33 }
0x1560   :  { %v5380_v39 = vpop.permute.xlu0 %5379 }
0x1561   :  { %7447 = vmatmul.mubr.msk.f32.vlgmr.msra.gmra.mrb[58].mxu0 %vm198_vm2, %v5380_v39 }
0x1562   :  { %7687 = vmatpush3.bf16.xpose.msk.msra.mxu0 %vm8739_vm5, %v7685_v37  ;;  %7460 = vmatprep.mubr.msk.f32.mxu0 %vm8143_vm1, %v8142_v10 }
0x1563   :  { %v8021_v43 = vpop.eup %8020  ;;  %7692 = vmatprep.subr.bf16.mxu0 %v8157_v41 }
0x1564   :  { %v5058_v44 = vmul.f32 %v8021_v43, %v8013_v63  ;;  %v5544_v47 = vpop.permute.xlu0 %5543 }
0x1566   :  { %7440 = vmatmul.mubr.msk.f32.vlgmr.msra.gmra.mrb[70].mxu1 %vm3629_vm6, %v5058_v44 }
0x1567   :  { %7683 = vmatpush3.bf16.xpose.msk.msra.mxu1 %vm8739_vm5, %v7681_v45  ;;  %7453 = vmatprep.mubr.msk.f32.mxu1 %vm8143_vm1, %v8142_v10 }
0x1568   :  { %7688 = vmatprep.subr.bf16.mxu1 %v8157_v41 }
0x1569   :  { %7461 = vmatmul.mubr.msk.f32.vlgmr.msra.gmra.mrb[60].mxu0 %vm198_vm2, %v5544_v47 }
0x156a   :  { %7474 = vmatprep.mubr.msk.f32.mxu0 %vm8143_vm1, %v8142_v10 }
0x156e   :  { %7454 = vmatmul.mubr.msk.f32.vlgmr.msra.gmra.mrb[72].mxu1 %vm198_vm2, %v5462_v52 }
0x156f   :  { %7691 = vmatpush3.bf16.xpose.msk.msra.mxu1 %vm8739_vm5, %v7689_v51  ;;  %7467 = vmatprep.mubr.msk.f32.mxu1 %vm8143_vm1, %v8142_v10 }
0x1570   :  { %7696 = vmatprep.subr.bf16.mxu1 %v8157_v41 }
0x1576   :  { %7468 = vmatmul.mubr.msk.f32.vlgmr.msra.gmra.mrb[74].mxu1 %vm198_vm2, %v5626_v53 }
0x1577   :  { %7481 = vmatprep.mubr.msk.f32.mxu1 %vm8143_vm1, %v8142_v10 }
0x15f3   :  { %v9045_v55 = vpop.f32.mrb[54].mxu0 }
0x15f4   :  { %v7420_v57 = vpop.f32.mrb[55].mxu0 }
0x15fb   :  { %v9047_v63 = vpop.f32.mrb[56].mxu0 }
0x15fc   :  { %v7434_v1 = vpop.f32.mrb[57].mxu0 }
0x1604   :  { %v5215_v15 = vpop.f32.mrb[68].mxu1 }
0x1605   :  { %v7427_v61 = vpop.f32.mrb[69].mxu1 }
0x1634   :  { %v5457_v16 = vpop.f32.mrb[58].mxu0 }
0x1635   :  { %v7448_v3 = vpop.f32.mrb[59].mxu0  ;;  %v5707_v4 = vsel %vm3629_vm6, %v5457_v16, -inf }
0x1636   :  { %5708 = vmax.xlane.f32.xlu0 %v5707_v4 }
0x1639   :  { %v5375_v5 = vpop.f32.mrb[70].mxu1 }
0x163a   :  { %v7441_v7 = vpop.f32.mrb[71].mxu1 }
0x163c   :  { %v5621_v8 = vpop.f32.mrb[60].mxu0 }
0x163d   :  { %v7462_v9 = vpop.f32.mrb[61].mxu0  ;;  %v5713_v12 = vsel %vm3629_vm6, %v5621_v8, -inf }
0x163e   :  { %5714 = vmax.xlane.f32.xlu0 %v5713_v12 }
0x1641   :  { %v5539_v59 = vpop.f32.mrb[72].mxu1 }
0x1642   :  { %v7455_v13 = vpop.f32.mrb[73].mxu1  ;;  %v5710_v32 = vsel %vm3629_vm6, %v5539_v59, -inf }
0x1643   :  { %5711 = vmax.xlane.f32.xlu1 %v5710_v32  ;;  %v6131_v13 = vld [vmem:[#allocation2] sm:$0xff]  ;;  %v6132_v32 = vld [vmem:[#allocation2 + $0x8] sm:$0xff] }
0x1649   :  { %v5703_v20 = vpop.f32.mrb[74].mxu1 }
0x164a   :  { %v7469_v25 = vpop.f32.mrb[75].mxu1  ;;  %v5716_v22 = vsel %vm3629_vm6, %v5703_v20, -inf }
0x164b   :  { %5717 = vmax.xlane.f32.xlu0 %v5716_v22  ;;  %v7708_v25 = vpack.c.bf16 %v6132_v32, %v6131_v13  ;;  %v6134_v22 = vld [vmem:[#allocation2 + $0x18] sm:$0xff] }
0x1654   :  { %7883 = vrot.lane.b32.xlu1 %v8743_v2, %s8152_s28 }
0x16c3   :  { %v5709_v24 = vpop.xlane.xlu0 %5708 }
0x16c4   :  { %v5719_v18 = vsub.f32 %v5457_v16, %v5709_v24 }
0x16c6   :  { %v5723_v19 = vmul.f32 1.442695, %v5719_v18 }
0x16c8   :  { %8022 = vpow2.f32 %v5723_v19 }
0x16cb   :  { %v5715_v31 = vpop.xlane.xlu0 %5714 }
0x16cc   :  { %v5721_v34 = vsub.f32 %v5621_v8, %v5715_v31 }
0x16ce   :  { %v5727_v38 = vmul.f32 1.442695, %v5721_v34 }
0x16d0   :  { %8024 = vpow2.f32 %v5727_v38  ;;  %v5712_v28 = vpop.xlane.xlu1 %5711 }
0x16d1   :  { %v5720_v29 = vsub.f32 %v5539_v59, %v5712_v28 }
0x16d2   :  { %v8023_v36 = vpop.eup %8022 }
0x16d3   :  { %v5725_v33 = vmul.f32 1.442695, %v5720_v29  ;;  %v5731_v35 = vsel %vm3629_vm6, %v8023_v36, 0.0 }
0x16d4   :  { %v7884_v37 = vpop.permute.xlu1 %7883  ;;  %5732 = vadd.xlane.f32.xlu1 %v5731_v35 }
0x16d5   :  { %8026 = vpow2.f32 %v5725_v33  ;;  %v7886_v39 = vunpack.i.h.bf16 %v7884_v37  ;;  %v7885_v40 = vunpack.i.l.bf16 %v7884_v37 }
0x16d7   :  { %v7693_v2 = vpack.c.bf16 %v7886_v39, %v7885_v40 }
0x16d8   :  { %v5718_v42 = vpop.xlane.xlu0 %5717 }
0x16d9   :  { %v5722_v43 = vsub.f32 %v5703_v20, %v5718_v42  ;;  %7695 = vmatpush3.bf16.msk.msra.mxu0 %vm8797_vm9, %v7693_v2  ;;  %v6133_v20 = vld [vmem:[#allocation2 + $0x10] sm:$0xff] }
0x16da   :  { %v8025_v44 = vpop.eup %8024  ;;  %7700 = vmatprep.subr.bf16.mxu0 %v8157_v41  ;;  %v7712_v24 = vpack.c.bf16 %v6134_v22, %v6133_v20 }
0x16db   :  { %v5729_v45 = vmul.f32 1.442695, %v5722_v43  ;;  %v5737_v46 = vsel %vm3629_vm6, %v8025_v44, 0.0 }
0x16dc   :  { %5738 = vadd.xlane.f32.xlu1 %v5737_v46 }
0x16dd   :  { %8028 = vpow2.f32 %v5729_v45 }
0x16df   :  { %v8027_v47 = vpop.eup %8026 }
0x16e0   :  { %v5734_v49 = vsel %vm3629_vm6, %v8027_v47, 0.0 }
0x16e1   :  { %5735 = vadd.xlane.f32.xlu0 %v5734_v49 }
0x16e7   :  { %v8029_v50 = vpop.eup %8028 }
0x16e8   :  { %v5740_v51 = vsel %vm3629_vm6, %v8029_v50, 0.0 }
0x16e9   :  { %5741 = vadd.xlane.f32.xlu0 %v5740_v51 }
0x16ed   :  { %7893 = vrot.lane.b32.xlu1 %v8750_v11, %s8152_s28 }
0x16f1   :  { %7898 = vrot.lane.b32.xlu1 %v8755_v14, %s8152_s28 }
0x16f5   :  { %6077 = vrot.lane.b32.xlu1 %v8961_v60, %s8140_s24 }
0x16f9   :  { %6093 = vrot.lane.b32.xlu1 %v5215_v15, %s8155_s19 }
0x16fd   :  { %6081 = vrot.lane.b32.xlu1 %v8964_v6, %s8140_s24 }
0x16ff   :  { %7888 = vrot.lane.b32.xlu0 %v8747_v23, %s8152_s28 }
0x1701   :  { %6097 = vrot.lane.b32.xlu1 %v5375_v5, %s8155_s19 }
0x1703   :  { %6075 = vrot.lane.b32.xlu0 %v8957_v54, %s8140_s24 }
0x1707   :  { %6091 = vrot.lane.b32.xlu0 %v9045_v55, %s8155_s19 }
0x170b   :  { %6079 = vrot.lane.b32.xlu0 %v8959_v56, %s8140_s24 }
0x170f   :  { %6095 = vrot.lane.b32.xlu0 %v9047_v63, %s8155_s19 }
0x1761   :  { %v5733_v11 = vpop.xlane.xlu1 %5732 }
0x1762   :  { %8030 = vrcp.f32 %v5733_v11 }
0x1769   :  { %v5739_v14 = vpop.xlane.xlu1 %5738 }
0x176a   :  { %8032 = vrcp.f32 %v5739_v14 }
0x176c   :  { %v8031_v60 = vpop.eup %8030 }
0x176d   :  { %v5744_v23 = vmul.f32 %v8031_v60, %v8023_v36  ;;  %v7894_v6 = vpop.permute.xlu1 %7893 }
0x176e   :  { %v7896_v52 = vunpack.i.h.bf16 %v7894_v6  ;;  %v7895_v53 = vunpack.i.l.bf16 %v7894_v6  ;;  %v5736_v57 = vpop.xlane.xlu0 %5735 }
0x176f   :  { %7475 = vmatmul.mubr.msk.f32.vlgmr.msra.gmra.mrb[62].mxu0 %vm3629_vm6, %v5744_v23  ;;  %8034 = vrcp.f32 %v5736_v57 }
0x1770   :  { %v7701_v54 = vpack.c.bf16 %v7896_v52, %v7895_v53  ;;  %7488 = vmatprep.mubr.msk.f32.mxu0 %vm8143_vm1, %v8142_v10 }
0x1771   :  { %v7899_v1 = vpop.permute.xlu1 %7898 }
0x1772   :  { %7703 = vmatpush3.bf16.msk.msra.mxu0 %vm8797_vm9, %v7701_v54  ;;  %v7901_v4 = vunpack.i.h.bf16 %v7899_v1  ;;  %v7900_v5 = vunpack.i.l.bf16 %v7899_v1 }
0x1773   :  { %7709 = vmatprep.subr.bf16.mxu0 %v7708_v25 }
0x1774   :  { %v8033_v56 = vpop.eup %8032  ;;  %v7705_v12 = vpack.c.bf16 %v7901_v4, %v7900_v5 }
0x1775   :  { %v5748_v55 = vmul.f32 %v8033_v56, %v8025_v44  ;;  %v6078_v35 = vpop.permute.xlu1 %6077 }
0x1776   :  { %v5742_v63 = vpop.xlane.xlu0 %5741  ;;  %v6120_v45 = vsel %vm198_vm2, %v8873_v0, %v6078_v35 }
0x1777   :  { %8036 = vrcp.f32 %v5742_v63  ;;  %7489 = vmatmul.mubr.msk.f32.vlgmr.msra.gmra.mrb[64].mxu0 %vm3629_vm6, %v5748_v55 }
0x1778   :  { %7711 = vmatpush3.bf16.msra.mxu0 %v7708_v25 }
0x1779   :  { %v8035_v3 = vpop.eup %8034  ;;  %7713 = vmatprep.subr.bf16.mxu0 %v7712_v24  ;;  %v6094_v42 = vpop.permute.xlu1 %6093 }
0x177a   :  { %v7889_v15 = vpop.permute.xlu0 %7888  ;;  %v5746_v8 = vmul.f32 %v8035_v3, %v8027_v47  ;;  %v6124_v47 = vsel %vm2884_vm3, %v6120_v45, %v6094_v42 }
0x177b   :  { %v7891_v61 = vunpack.i.h.bf16 %v7889_v15  ;;  %v7890_v16 = vunpack.i.l.bf16 %v7889_v15 }
0x177c   :  { %7715 = vmatpush3.bf16.msra.mxu0 %v7712_v24 }
0x177d   :  { %v7697_v7 = vpack.c.bf16 %v7891_v61, %v7890_v16  ;;  %v6082_v43 = vpop.permute.xlu1 %6081 }
0x177e   :  { %v6076_v28 = vpop.permute.xlu0 %6075  ;;  %v6122_v14 = vsel %vm198_vm2, %v8876_v21, %v6082_v43 }
0x177f   :  { %7699 = vmatpush3.bf16.msk.msra.mxu1 %vm8797_vm9, %v7697_v7  ;;  %v6119_v37 = vsel %vm198_vm2, %v8869_v58, %v6076_v28 }
0x1780   :  { %7704 = vmatprep.subr.bf16.mxu1 %v8157_v41 }
0x1781   :  { %v8037_v9 = vpop.eup %8036  ;;  %v6098_v44 = vpop.permute.xlu1 %6097 }
0x1782   :  { %7482 = vmatmul.mubr.msk.f32.vlgmr.msra.gmra.mrb[76].mxu1 %vm3629_vm6, %v5746_v8  ;;  %v5750_v59 = vmul.f32 %v8037_v9, %v8029_v50  ;;  %v6092_v29 = vpop.permute.xlu0 %6091  ;;  %v6126_v0 = vsel %vm2884_vm3, %v6122_v14, %v6098_v44  ;;  %v6820_v14 = vld [vmem:[%s9238_s13 + $0x3] ss:$0 sm:$0xff] }
0x1783   :  { %7707 = vmatpush3.bf16.msk.msra.mxu1 %vm8797_vm9, %v7705_v12  ;;  %7495 = vmatprep.mubr.msk.f32.mxu1 %vm8143_vm1, %v8142_v10  ;;  %v6123_v39 = vsel %vm2884_vm3, %v6119_v37, %v6092_v29  ;;  %v6314_v29 = vld [vmem:[#allocation5 + $0x18] sm:$0xff] }
0x1786   :  { %7496 = vmatmul.mubr.msk.f32.vlgmr.msra.gmra.mrb[78].mxu1 %vm3629_vm6, %v5750_v59  ;;  %v6080_v36 = vpop.permute.xlu0 %6079 }
0x1787   :  { %v6121_v49 = vsel %vm198_vm2, %v8871_v62, %v6080_v36  ;;  %v6814_v62 = vld [vmem:[%s9237_s12 + $0x2] ss:$0 sm:$0xff] }
0x178a   :  { %v6096_v33 = vpop.permute.xlu0 %6095 }
0x178b   :  { %v6125_v50 = vsel %vm2884_vm3, %v6121_v49, %v6096_v33 }
0x1842   :  { %v5827_v41 = vpop.f32.mrb[62].mxu0 }
0x1843   :  { %v7476_v18 = vpop.f32.mrb[63].mxu0  ;;  %6107 = vrot.lane.b32.xlu0 %v5827_v41, %s8156_s9 }
0x184a   :  { %v5987_v48 = vpop.f32.mrb[64].mxu0 }
0x184b   :  { %v7490_v19 = vpop.f32.mrb[65].mxu0  ;;  %6111 = vrot.lane.b32.xlu0 %v5987_v48, %s8156_s9 }
0x1855   :  { %v5907_v10 = vpop.f32.mrb[76].mxu1 }
0x1856   :  { %6109 = vrot.lane.b32.xlu1 %v5907_v10, %s8156_s9  ;;  %v7483_v31 = vpop.f32.mrb[77].mxu1 }
0x1857   :  { %v6311_v31 = vld [vmem:[#allocation5] sm:$0xff] }
0x1859   :  { %v6067_v34 = vpop.f32.mrb[78].mxu1 }
0x185a   :  { %6113 = vrot.lane.b32.xlu1 %v6067_v34, %s8156_s9  ;;  %v7497_v38 = vpop.f32.mrb[79].mxu1  ;;  %v6312_v34 = vld [vmem:[#allocation5 + $0x8] sm:$0xff] }
0x185b   :  { %v6313_v38 = vld [vmem:[#allocation5 + $0x10] sm:$0xff]  ;;  %v7716_v28 = vpack.c.bf16 %v6312_v34, %v6311_v31 }
0x185c   :  { %v7720_v36 = vpack.c.bf16 %v6314_v29, %v6313_v38 }
0x185d   :  { %7717 = vmatprep.subr.bf16.mxu1 %v7716_v28 }
0x185e   :  { %7719 = vmatpush3.bf16.msra.mxu1 %v7716_v28 }
0x185f   :  { %7721 = vmatprep.subr.bf16.mxu1 %v7720_v36 }
0x1862   :  { %7723 = vmatpush3.bf16.msra.mxu1 %v7720_v36 }
0x18b5   :  { %v6108_v40 = vpop.permute.xlu0 %6107 }
0x18b6   :  { %v6127_v2 = vsel %vm2889_vm4, %v6123_v39, %v6108_v40 }
0x18b7   :  { %7506 = vmatprep.mubr.msk.f32.mxu0 %vm97_vm0, %v6127_v2 }
0x18bd   :  { %v6112_v46 = vpop.permute.xlu0 %6111 }
0x18be   :  { %v6129_v11 = vsel %vm2889_vm4, %v6125_v50, %v6112_v46 }
0x18c8   :  { %v6110_v58 = vpop.permute.xlu1 %6109 }
0x18c9   :  { %v6128_v51 = vsel %vm2889_vm4, %v6124_v47, %v6110_v58  ;;  %v6819_v58 = vld [vmem:[%s9238_s13 + $0x2] ss:$0 sm:$0xff] }
0x18ca   :  { %7507 = vmatmul.mubr.msk.f32.vlgmr.msra.gmra.mrb[66].mxu0 %vm97_vm0, %v6128_v51 }
0x18cb   :  { %7509 = vmatprep.mubr.msk.f32.mxu0 %vm97_vm0, %v6129_v11 }
0x18cc   :  { %v6114_v60 = vpop.permute.xlu1 %6113 }
0x18cd   :  { %v6130_v23 = vsel %vm2889_vm4, %v6126_v0, %v6114_v60 }
0x18ce   :  { %7510 = vmatmul.mubr.msk.f32.gmra.mrb[68].mxu0 %vm97_vm0, %v6130_v23 }
0x199d   :  { %v7508_v6 = vpop.f32.mrb[66].mxu0 }
0x199e   :  { %v6224_v52 = vadd.f32 %v7508_v6, %v6814_v62  ;;  %v6218_v53 = vpop.f32.mrb[67].mxu0 }
0x199f   :  { %v6219_v54 = vadd.f32 %v6814_v62, %v6218_v53 }
0x19a0   :  { %v6238_v57 = vadd.f32 %v6224_v52, %v8687_v17 }
0x19a1   :  { %v6237_v21 = vadd.f32 %v6219_v54, %v8685_v26  ;;  %v7511_v56 = vpop.f32.mrb[68].mxu0 }
0x19a2   :  { %v6228_v55 = vpop.f32.mrb[69].mxu0  ;;  %v6246_v63 = vsel %vm97_vm0, %v6238_v57, 0.0  ;;  %v6234_v1 = vadd.f32 %v7511_v56, %v6814_v62 }
0x19a3   :  { %v6229_v15 = vadd.f32 %v6814_v62, %v6228_v55  ;;  %6247 = vadd.xlane.f32.xlu1 %v6246_v63  ;;  %v6243_v61 = vsel %vm97_vm0, %v6237_v21, 0.0  ;;  %v6455_v63 = vld [vmem:[%s9236_s11] sm:$0xff] }
0x19a4   :  { %6244 = vadd.xlane.f32.xlu0 %v6243_v61  ;;  %v6240_v3 = vadd.f32 %v6234_v1, %v8697_v30  ;;  %v6456_v1 = vld [vmem:[%s9236_s11 + $0x8] sm:$0xff]  ;;  %v6457_v61 = vld [vmem:[%s9236_s11 + $0x10] sm:$0xff] }
0x19a5   :  { %v6239_v16 = vadd.f32 %v6229_v15, %v8693_v27  ;;  %v7724_v15 = vpack.c.bf16 %v6456_v1, %v6455_v63 }
0x19a6   :  { %v6252_v17 = vsel %vm97_vm0, %v6240_v3, 0.0 }
0x19a7   :  { %v6249_v4 = vsel %vm97_vm0, %v6239_v16, 0.0  ;;  %7725 = vmatprep.subr.bf16.mxu0 %v7724_v15 }
0x19a8   :  { %6250 = vadd.xlane.f32.xlu0 %v6249_v4  ;;  %7727 = vmatpush3.bf16.msra.mxu0 %v7724_v15  ;;  %v6459_v4 = vld [vmem:[%s9236_s11 + $0x20] sm:$0xff] }
0x19ac   :  { %6253 = vadd.xlane.f32.xlu0 %v6252_v17  ;;  %v6460_v17 = vld [vmem:[%s9236_s11 + $0x28] sm:$0xff] }
0x1a30   :  { %v6248_v26 = vpop.xlane.xlu1 %6247 }
0x1a31   :  { %v6256_v5 = vmul.f32 0.03125, %v6248_v26  ;;  %v6245_v7 = vpop.xlane.xlu0 %6244  ;;  %v7732_v26 = vpack.c.bf16 %v6460_v17, %v6459_v4 }
0x1a32   :  { %v6255_v8 = vmul.f32 0.03125, %v6245_v7  ;;  %v6462_v7 = vld [vmem:[%s9236_s11 + $0x38] sm:$0xff] }
0x1a33   :  { %v6260_v9 = vsub.f32 %v6238_v57, %v6256_v5  ;;  %v6461_v5 = vld [vmem:[%s9236_s11 + $0x30] sm:$0xff] }
0x1a34   :  { %v6259_v12 = vsub.f32 %v6237_v21, %v6255_v8  ;;  %v7736_v8 = vpack.c.bf16 %v6462_v7, %v6461_v5 }
0x1a35   :  { %v6251_v59 = vpop.xlane.xlu0 %6250  ;;  %v6264_v13 = vmul.f32 %v6260_v9, %v6260_v9 }
0x1a36   :  { %v6257_v32 = vmul.f32 0.03125, %v6251_v59  ;;  %v6263_v20 = vmul.f32 %v6259_v12, %v6259_v12 }
0x1a37   :  { %v6270_v27 = vsel %vm97_vm0, %v6264_v13, 0.0 }
0x1a38   :  { %v6261_v25 = vsub.f32 %v6239_v16, %v6257_v32  ;;  %6271 = vadd.xlane.f32.xlu0 %v6270_v27  ;;  %v6267_v30 = vsel %vm97_vm0, %v6263_v20, 0.0  ;;  %v6458_v16 = vld [vmem:[%s9236_s11 + $0x18] sm:$0xff] }
0x1a39   :  { %6268 = vadd.xlane.f32.xlu1 %v6267_v30  ;;  %v6254_v22 = vpop.xlane.xlu0 %6253 }
0x1a3a   :  { %v6258_v24 = vmul.f32 0.03125, %v6254_v22  ;;  %v6265_v41 = vmul.f32 %v6261_v25, %v6261_v25 }
0x1a3c   :  { %v6262_v18 = vsub.f32 %v6240_v3, %v6258_v24  ;;  %v6273_v48 = vsel %vm97_vm0, %v6265_v41, 0.0  ;;  %v7728_v3 = vpack.c.bf16 %v6458_v16, %v6457_v61 }
0x1a3d   :  { %6274 = vadd.xlane.f32.xlu1 %v6273_v48 }
0x1a3e   :  { %v6266_v19 = vmul.f32 %v6262_v18, %v6262_v18  ;;  %7729 = vmatprep.subr.bf16.mxu0 %v7728_v3 }
0x1a3f   :  { %7731 = vmatpush3.bf16.msra.mxu0 %v7728_v3 }
0x1a40   :  { %v6276_v10 = vsel %vm97_vm0, %v6266_v19, 0.0  ;;  %7733 = vmatprep.subr.bf16.mxu0 %v7732_v26 }
0x1a41   :  { %6277 = vadd.xlane.f32.xlu0 %v6276_v10 }
0x1a43   :  { %7735 = vmatpush3.bf16.msra.mxu0 %v7732_v26 }
0x1a44   :  { %7737 = vmatprep.subr.bf16.mxu0 %v7736_v8 }
0x1a47   :  { %7739 = vmatpush3.bf16.msra.mxu0 %v7736_v8 }
0x1ac5   :  { %v6272_v33 = vpop.xlane.xlu0 %6271 }
0x1ac6   :  { %v6280_v35 = vmul.f32 0.03125, %v6272_v33  ;;  %v6269_v37 = vpop.xlane.xlu1 %6268 }
0x1ac7   :  { %v6279_v39 = vmul.f32 0.03125, %v6269_v37 }
0x1ac8   :  { %v6284_v40 = vadd.f32 1e-05, %v6280_v35 }
0x1ac9   :  { %v6283_v2 = vadd.f32 1e-05, %v6279_v39 }
0x1aca   :  { %8038 = vrsqrt.f32 %v6284_v40  ;;  %v6275_v42 = vpop.xlane.xlu1 %6274 }
0x1acb   :  { %8040 = vrsqrt.f32 %v6283_v2  ;;  %v6281_v43 = vmul.f32 0.03125, %v6275_v42 }
0x1acd   :  { %v6285_v44 = vadd.f32 1e-05, %v6281_v43 }
0x1ace   :  { %v6278_v45 = vpop.xlane.xlu0 %6277 }
0x1acf   :  { %8042 = vrsqrt.f32 %v6285_v44  ;;  %v6282_v46 = vmul.f32 0.03125, %v6278_v45 }
0x1ad1   :  { %v6286_v47 = vadd.f32 1e-05, %v6282_v46 }
0x1ad3   :  { %8044 = vrsqrt.f32 %v6286_v47 }
0x1ad4   :  { %v8039_v49 = vpop.eup %8038 }
0x1ad5   :  { %v8041_v50 = vpop.eup %8040  ;;  %v6292_v51 = vmul.f32 %v8039_v49, %v6260_v9  ;;  %v6821_v9 = vld [vmem:[%s9235_s10] ss:$0 sm:$0xff] }
0x1ad6   :  { %v6291_v11 = vmul.f32 %v8041_v50, %v6259_v12 }
0x1ad7   :  { %v6300_v0 = vmul.f32 %v6819_v58, %v6292_v51 }
0x1ad8   :  { %v6299_v60 = vmul.f32 %v6819_v58, %v6291_v11 }
0x1ad9   :  { %v8043_v23 = vpop.eup %8042  ;;  %v9144_v52 = vadd.f32 %v6820_v14, %v6300_v0 }
0x1ada   :  { %v9142_v62 = vadd.f32 %v6820_v14, %v6299_v60  ;;  %v6293_v6 = vmul.f32 %v8043_v23, %v6261_v25 }
0x1adc   :  { %7520 = vmatprep.mubr.msk.f32.mxu1 %vm97_vm0, %v9142_v62  ;;  %v6301_v53 = vmul.f32 %v6819_v58, %v6293_v6 }
0x1add   :  { %v8045_v54 = vpop.eup %8044  ;;  %7521 = vmatmul.mubr.msk.f32.vlgmr.msra.gmra.mrb[80].mxu1 %vm97_vm0, %v9144_v52 }
0x1ade   :  { %v9150_v57 = vadd.f32 %v6820_v14, %v6301_v53  ;;  %v6294_v21 = vmul.f32 %v8045_v54, %v6262_v18  ;;  %v6826_v54 = vld [vmem:[%s9237_s12 + $0x3] ss:$0 sm:$0xff] }
0x1ae0   :  { %7523 = vmatprep.mubr.msk.f32.mxu1 %vm97_vm0, %v9150_v57  ;;  %v6302_v56 = vmul.f32 %v6819_v58, %v6294_v21 }
0x1ae2   :  { %v9154_v55 = vadd.f32 %v6820_v14, %v6302_v56 }
0x1ae4   :  { %7524 = vmatmul.mubr.msk.f32.gmra.mrb[82].mxu1 %vm97_vm0, %v9154_v55 }
0x1bb0   :  { %v7522_v12 = vpop.f32.mrb[80].mxu1 }
0x1bb1   :  { %v6406_v59 = vadd.f32 %v7522_v12, %v6821_v9  ;;  %v6400_v13 = vpop.f32.mrb[81].mxu1 }
0x1bb2   :  { %v6401_v32 = vadd.f32 %v6821_v9, %v6400_v13 }
0x1bb3   :  { %v6424_v20 = vmul.f32 0.044715, %v6406_v59  ;;  %v6420_v49 = vmul.f32 0.5, %v6406_v59 }
0x1bb4   :  { %v6423_v27 = vmul.f32 0.044715, %v6401_v32  ;;  %v6419_v46 = vmul.f32 0.5, %v6401_v32 }
0x1bb5   :  { %v6428_v25 = vmul.f32 %v6424_v20, %v6406_v59 }
0x1bb6   :  { %v6427_v30 = vmul.f32 %v6423_v27, %v6401_v32 }
0x1bb7   :  { %v6432_v22 = vmul.f32 %v6428_v25, %v6406_v59  ;;  %v7525_v24 = vpop.f32.mrb[82].mxu1 }
0x1bb8   :  { %v6431_v41 = vmul.f32 %v6427_v30, %v6401_v32  ;;  %v6416_v18 = vadd.f32 %v7525_v24, %v6821_v9  ;;  %v6410_v48 = vpop.f32.mrb[83].mxu1 }
0x1bb9   :  { %v6436_v19 = vadd.f32 %v6432_v22, %v6406_v59  ;;  %v6411_v10 = vadd.f32 %v6821_v9, %v6410_v48 }
0x1bba   :  { %v6435_v31 = vadd.f32 %v6431_v41, %v6401_v32  ;;  %v6426_v34 = vmul.f32 0.044715, %v6416_v18  ;;  %v6422_v23 = vmul.f32 0.5, %v6416_v18 }
0x1bbb   :  { %v6440_v38 = vmul.f32 0.7978846, %v6436_v19  ;;  %v6425_v28 = vmul.f32 0.044715, %v6411_v10  ;;  %v6421_v0 = vmul.f32 0.5, %v6411_v10 }
0x1bbc   :  { %v6430_v29 = vmul.f32 %v6426_v34, %v6416_v18  ;;  %v6439_v36 = vmul.f32 0.7978846, %v6435_v31 }
0x1bbd   :  { %8046 = vtanh.f32 %v6440_v38  ;;  %v6429_v33 = vmul.f32 %v6425_v28, %v6411_v10 }
0x1bbe   :  { %v6434_v35 = vmul.f32 %v6430_v29, %v6416_v18  ;;  %8048 = vtanh.f32 %v6439_v36 }
0x1bbf   :  { %v6433_v37 = vmul.f32 %v6429_v33, %v6411_v10 }
0x1bc0   :  { %v6438_v39 = vadd.f32 %v6434_v35, %v6416_v18 }
0x1bc1   :  { %v6437_v40 = vadd.f32 %v6433_v37, %v6411_v10 }
0x1bc2   :  { %v6442_v2 = vmul.f32 0.7978846, %v6438_v39 }
0x1bc3   :  { %v6441_v42 = vmul.f32 0.7978846, %v6437_v40 }
0x1bc4   :  { %8050 = vtanh.f32 %v6442_v2 }
0x1bc5   :  { %8052 = vtanh.f32 %v6441_v42 }
0x1bc7   :  { %v8047_v43 = vpop.eup %8046 }
0x1bc8   :  { %v8049_v44 = vpop.eup %8048  ;;  %v6448_v45 = vadd.f32 1.0, %v8047_v43 }
0x1bc9   :  { %v6447_v47 = vadd.f32 1.0, %v8049_v44 }
0x1bca   :  { %v6452_v50 = vmul.f32 %v6448_v45, %v6420_v49  ;;  %v6831_v45 = vld [vmem:[%s9238_s13 + $0x4] ss:$0 sm:$0xff] }
0x1bcb   :  { %v6451_v58 = vmul.f32 %v6447_v47, %v6419_v46 }
0x1bcd   :  { %7542 = vmatprep.mubr.msk.f32.mxu0 %vm6468_vm10, %v6451_v58  ;;  %v6832_v58 = vld [vmem:[%s9238_s13 + $0x5] ss:$0 sm:$0xff]  ;;  %s8110_s13 = scalar_lea.vmem %s6650_s15, 512 }
0x1bce   :  { %v8051_v51 = vpop.eup %8050  ;;  %7543 = vmatmul.mubr.msk.f32.vlgmr.msra.gmra.mrb[70].mxu0 %vm6468_vm10, %v6452_v50  ;;  %p8111_p2 = scmp.ne.s32.totalorder %s6650_s15, %s8110_s13  ;;  %p8116_p4 = scmp.lt.s32.totalorder %s8110_s13, %s8110_s13 }
0x1bcf   :  { %v8053_v11 = vpop.eup %8052  ;;  %v6450_v14 = vadd.f32 1.0, %v8051_v51 }
0x1bd0   :  { %v6449_v60 = vadd.f32 1.0, %v8053_v11  ;;  %p8117_p5 = por %p8116_p4, %p8115_p3 }
0x1bd1   :  { %v6454_v53 = vmul.f32 %v6450_v14, %v6422_v23 }
0x1bd2   :  { %v6453_v6 = vmul.f32 %v6449_v60, %v6421_v0  ;;  %p8118_p6 = pnand %p8117_p5, %p8111_p2 }
0x1bd4   :  { %7545 = vmatprep.mubr.msk.f32.mxu0 %vm6468_vm10, %v6453_v6 }
0x1bd5   :  { %7546 = vmatmul.mubr.msk.f32.gmra.mrb[72].mxu0 %vm6468_vm10, %v6454_v53 }
0x1ca1   :  { %v7544_v21 = vpop.f32.mrb[70].mxu0 }
0x1ca2   :  { %v6553_v56 = vadd.f32 %v7544_v21, %v6826_v54  ;;  %v6547_v63 = vpop.f32.mrb[71].mxu0 }
0x1ca3   :  { %v6548_v1 = vadd.f32 %v6826_v54, %v6547_v63 }
0x1ca4   :  { %v6567_v15 = vadd.f32 %v6553_v56, %v9144_v52 }
0x1ca5   :  { %v6566_v61 = vadd.f32 %v6548_v1, %v9142_v62 }
0x1ca6   :  { %v6575_v16 = vsel %vm97_vm0, %v6567_v15, 0.0 }
0x1ca7   :  { %6576 = vadd.xlane.f32.xlu0 %v6575_v16  ;;  %v6572_v3 = vsel %vm97_vm0, %v6566_v61, 0.0 }
0x1ca8   :  { %v7547_v4 = vpop.f32.mrb[72].mxu0  ;;  %6573 = vadd.xlane.f32.xlu1 %v6572_v3 }
0x1ca9   :  { %v6563_v17 = vadd.f32 %v7547_v4, %v6826_v54  ;;  %v6557_v26 = vpop.f32.mrb[73].mxu0 }
0x1caa   :  { %v6558_v5 = vadd.f32 %v6826_v54, %v6557_v26 }
0x1cab   :  { %v6569_v7 = vadd.f32 %v6563_v17, %v9154_v55 }
0x1cac   :  { %v6568_v8 = vadd.f32 %v6558_v5, %v9150_v57 }
0x1cad   :  { %v6581_v9 = vsel %vm97_vm0, %v6569_v7, 0.0 }
0x1cae   :  { %6582 = vadd.xlane.f32.xlu0 %v6581_v9  ;;  %v6578_v52 = vsel %vm97_vm0, %v6568_v8, 0.0 }
0x1caf   :  { %6579 = vadd.xlane.f32.xlu1 %v6578_v52 }
0x1d34   :  { %v6577_v62 = vpop.xlane.xlu0 %6576 }
0x1d35   :  { %v6585_v12 = vmul.f32 0.03125, %v6577_v62  ;;  %v6574_v59 = vpop.xlane.xlu1 %6573 }
0x1d36   :  { %v6584_v13 = vmul.f32 0.03125, %v6574_v59 }
0x1d37   :  { %v6589_v32 = vsub.f32 %v6567_v15, %v6585_v12 }
0x1d38   :  { %v6588_v20 = vsub.f32 %v6566_v61, %v6584_v13 }
0x1d39   :  { %v6593_v27 = vmul.f32 %v6589_v32, %v6589_v32 }
0x1d3a   :  { %v6592_v25 = vmul.f32 %v6588_v20, %v6588_v20 }
0x1d3b   :  { %v6583_v30 = vpop.xlane.xlu0 %6582  ;;  %v6599_v22 = vsel %vm97_vm0, %v6593_v27, 0.0 }
0x1d3c   :  { %v6587_v55 = vmul.f32 0.03125, %v6583_v30  ;;  %6600 = vadd.xlane.f32.xlu0 %v6599_v22  ;;  %v6580_v57 = vpop.xlane.xlu1 %6579  ;;  %v6596_v24 = vsel %vm97_vm0, %v6592_v25, 0.0 }
0x1d3d   :  { %v6586_v41 = vmul.f32 0.03125, %v6580_v57  ;;  %6597 = vadd.xlane.f32.xlu1 %v6596_v24 }
0x1d3e   :  { %v6591_v18 = vsub.f32 %v6569_v7, %v6587_v55 }
0x1d3f   :  { %v6590_v48 = vsub.f32 %v6568_v8, %v6586_v41 }
0x1d40   :  { %v6595_v19 = vmul.f32 %v6591_v18, %v6591_v18 }
0x1d41   :  { %v6594_v10 = vmul.f32 %v6590_v48, %v6590_v48 }
0x1d42   :  { %v6605_v31 = vsel %vm97_vm0, %v6595_v19, 0.0 }
0x1d43   :  { %6606 = vadd.xlane.f32.xlu0 %v6605_v31  ;;  %v6602_v34 = vsel %vm97_vm0, %v6594_v10, 0.0 }
0x1d44   :  { %6603 = vadd.xlane.f32.xlu1 %v6602_v34 }
0x1dc9   :  { %v6601_v38 = vpop.xlane.xlu0 %6600 }
0x1dca   :  { %v6609_v28 = vmul.f32 0.03125, %v6601_v38  ;;  %v6598_v29 = vpop.xlane.xlu1 %6597 }
0x1dcb   :  { %v6608_v36 = vmul.f32 0.03125, %v6598_v29 }
0x1dcc   :  { %v6613_v33 = vadd.f32 1e-05, %v6609_v28 }
0x1dcd   :  { %v6612_v35 = vadd.f32 1e-05, %v6608_v36 }
0x1dce   :  { %8054 = vrsqrt.f32 %v6613_v33 }
0x1dcf   :  { %8056 = vrsqrt.f32 %v6612_v35 }
0x1dd0   :  { %v6607_v37 = vpop.xlane.xlu0 %6606 }
0x1dd1   :  { %v6611_v39 = vmul.f32 0.03125, %v6607_v37  ;;  %v6604_v40 = vpop.xlane.xlu1 %6603 }
0x1dd2   :  { %v6610_v2 = vmul.f32 0.03125, %v6604_v40 }
0x1dd3   :  { %v6615_v42 = vadd.f32 1e-05, %v6611_v39 }
0x1dd4   :  { %v6614_v43 = vadd.f32 1e-05, %v6610_v2 }
0x1dd5   :  { %8058 = vrsqrt.f32 %v6615_v42 }
0x1dd6   :  { %8060 = vrsqrt.f32 %v6614_v43 }
0x1dd8   :  { %v8055_v44 = vpop.eup %8054 }
0x1dd9   :  { %v8057_v46 = vpop.eup %8056  ;;  %v6621_v47 = vmul.f32 %v8055_v44, %v6589_v32 }
0x1dda   :  { %v6620_v49 = vmul.f32 %v8057_v46, %v6588_v20 }
0x1ddb   :  { %v6629_v50 = vmul.f32 %v6831_v45, %v6621_v47 }
0x1ddc   :  { %v6628_v51 = vmul.f32 %v6831_v45, %v6620_v49 }
0x1ddd   :  { %v6637_v11 = vadd.f32 %v6832_v58, %v6629_v50 }
0x1dde   :  { %v6636_v14 = vadd.f32 %v6832_v58, %v6628_v51 }
0x1ddf   :  { %v8059_v0 = vpop.eup %8058  ;;  %6641 = vst.msk [vmem:[#allocation7 + $0x8] sm:$0xff] %vm97_vm0, %v6637_v11 }
0x1de0   :  { %v8061_v60 = vpop.eup %8060  ;;  %v6623_v23 = vmul.f32 %v8059_v0, %v6591_v18  ;;  %6640 = vst.msk [vmem:[#allocation7] sm:$0xff] %vm97_vm0, %v6636_v14 }
0x1de1   :  { %v6622_v6 = vmul.f32 %v8061_v60, %v6590_v48 }
0x1de2   :  { %v6631_v53 = vmul.f32 %v6831_v45, %v6623_v23 }
0x1de3   :  { %v6630_v54 = vmul.f32 %v6831_v45, %v6622_v6 }
0x1de4   :  { %v6639_v21 = vadd.f32 %v6832_v58, %v6631_v53 }
0x1de5   :  { %v6638_v56 = vadd.f32 %v6832_v58, %v6630_v54 }
0x1de6   :  { %6643 = vst.msk [vmem:[#allocation7 + $0x18] sm:$0xff] %vm97_vm0, %v6639_v21 }
0x1de7   :  { %6642 = vst.msk [vmem:[#allocation7 + $0x10] sm:$0xff] %vm97_vm0, %v6638_v56 }
0x1de8   :  { %8121 = shalt.err (!%p8118_p6)
}
0x1de9   :  { %s8122_s17 = scalar_lea.hbm %s9239_s14, 512 }
0x1dea   :  { %p8123_p7 = scmp.ne.s32.totalorder %s9239_s14, %s8122_s17  ;;  %p8126_p8 = scmp.lt.u32.totalorder %s8122_s17, %s9239_s14 }
0x1dec   :  { %p8128_p9 = pnand %p8126_p8, %p8123_p7 }
0x1dee   :  { %8131 = shalt.err (!%p8128_p9)
}
0x1def   :  { %6655 = dma.vmem_to_hbm [thread:$0]  %s6650_s15, 512, %s9239_s14, [#allocation4], %s8139_s23, %s8139_s23, %s8140_s24  }
0x1df0   :  { %8136 = dma.done.wait [#allocation4], 512  }
0x1df1   :  { %8137 = vsyncadd [#allocation4], 4294966784 }
0x1df2   :  { %6659 = vsyncpa [#allocation3], 1 }
0x1df3   :  { %6660 = vsyncpa [#allocation6], 1 }
0x1df4   :  { %6661 = vsyncpa [#allocation4], 1 }

</bundles_post_ra>
